<compile_context>
chip_gen: v6e
topology: v6e:2x2x1
jax: 0.10.0
libtpu: 0.0.40
codegen_flags: <defaults>
</compile_context>

<pallas_src>
import functools

import jax
import jax.numpy as jnp
from jax.experimental import pallas as pl
from jax.experimental.pallas import tpu as pltpu


# ------------------------------ small helpers ------------------------------ #

def _round_up(x, m):
    return ((x + m - 1) // m) * m


def _pad2d(a, shape):
    pads = [(0, t - s) for s, t in zip(a.shape, shape)]
    if all(p == (0, 0) for p in pads):
        return a
    return jnp.pad(a, pads)


def _l2_normalize(v):
    return v / (jnp.linalg.norm(v) + 1e-12)


def _spectral_sigma(w_mat, u, power_iterations=1):
    # w_mat: (K, Cout) == transpose of PyTorch's w.view(Cout, -1)
    v = None
    for _ in range(power_iterations):
        v = _l2_normalize(w_mat @ u)        # (K,)
        u = _l2_normalize(w_mat.T @ v)      # (Cout,)
    return u @ (w_mat.T @ v)                # sigma (scalar)


# ------------------------------ Pallas kernel ------------------------------ #

def _matmul_bias_act_kernel(x_ref, w_ref, b_ref, s_ref, o_ref, acc_ref, *, act):
    k = pl.program_id(2)

    @pl.when(k == 0)
    def _zero():
        acc_ref[...] = jnp.zeros_like(acc_ref)

    acc_ref[...] += jnp.dot(x_ref[...], w_ref[...],
                            preferred_element_type=jnp.float32)

    @pl.when(k == pl.num_programs(2) - 1)
    def _epilogue():
        # spectral-norm scale (1/sigma) + bias + activation, once per (i, j) tile.
        y = acc_ref[...] * s_ref[...] + b_ref[...]
        if act == "leaky_relu":
            y = jnp.where(y >= 0, y, 0.2 * y)          # F.leaky_relu(x, 0.2)
        elif act == "sigmoid":
            y = jax.nn.sigmoid(y)
        o_ref[...] = y.astype(o_ref.dtype)


def _pallas_matmul_bias_act(x_bf16, w_bf16, bias_f32, scale_f32, act, out_dtype):
    M, K = x_bf16.shape
    N = w_bf16.shape[1]

    # Tile sizes: lane dims multiples of 128, sublane dims multiples of 16 (bf16-friendly),
    # capped so small problems don't over-pad.
    tm = min(512, _round_up(M, 16))
    tn = min(256, _round_up(N, 128))
    tk = min(512, _round_up(K, 128))
    Mp, Kp, Np = _round_up(M, tm), _round_up(K, tk), _round_up(N, tn)

    x_p = _pad2d(x_bf16, (Mp, Kp))
    w_p = _pad2d(w_bf16, (Kp, Np))
    b_p = _pad2d(bias_f32.reshape(1, N).astype(jnp.float32), (1, Np))
    s_p = scale_f32.reshape(1, 1).astype(jnp.float32)

    grid = (Mp // tm, Np // tn, Kp // tk)

    out = pl.pallas_call(
        functools.partial(_matmul_bias_act_kernel, act=act),
        out_shape=jax.ShapeDtypeStruct((Mp, Np), out_dtype),
        grid_spec=pltpu.PrefetchScalarGridSpec(
            num_scalar_prefetch=0,
            grid=grid,
            in_specs=[
                pl.BlockSpec((tm, tk), lambda i, j, k: (i, k)),
                pl.BlockSpec((tk, tn), lambda i, j, k: (k, j)),
                pl.BlockSpec((1, tn), lambda i, j, k: (0, j)),
                pl.BlockSpec((1, 1), lambda i, j, k: (0, 0)),
            ],
            out_specs=pl.BlockSpec((tm, tn), lambda i, j, k: (i, j)),
            scratch_shapes=[pltpu.VMEM((tm, tn), jnp.float32)],
        ),
        compiler_params=pltpu.CompilerParams(
            dimension_semantics=("parallel", "parallel", "arbitrary"),
            vmem_limit_bytes=32 * 1024 * 1024,
        ),
    )(x_p, w_p, b_p, s_p)
    return out[:M, :N]


# --------------------------- patch extraction ------------------------------ #

def _extract_patches(x_nhwc, kh, kw, stride, pad):
    # One XLA gather; feature dim ordered (Cin, KH, KW) (channel-major).
    patches = jax.lax.conv_general_dilated_patches(
        x_nhwc,
        filter_shape=(kh, kw),
        window_strides=(stride, stride),
        padding=((pad, pad), (pad, pad)),
        dimension_numbers=("NHWC", "HWIO", "NHWC"),
    )
    n, oh, ow, kdim = patches.shape
    return patches.reshape(n * oh * ow, kdim), (n, oh, ow)


# ------------------------------ conv layers -------------------------------- #

def _conv_sn_leaky(x_nhwc, w_mat, b, u, stride, pad):
    # w_mat: (Cin*KH*KW, Cout), stored pre-flattened at init (no per-forward transpose).
    inv_sigma = (1.0 / _spectral_sigma(w_mat, u)).astype(jnp.float32)
    patches, (n, oh, ow) = _extract_patches(x_nhwc.astype(jnp.bfloat16), 4, 4, stride, pad)
    out = _pallas_matmul_bias_act(
        patches, w_mat.astype(jnp.bfloat16), b, inv_sigma,
        act="leaky_relu", out_dtype=jnp.bfloat16)
    return out.reshape(n, oh, ow, w_mat.shape[1])


def _conv_sn_sigmoid_head(x_nhwc, w_mat, b, u):
    # Final conv: Cout=1, 1x1 spatial output -> plain dot (Pallas would waste 127/128 lanes).
    inv_sigma = (1.0 / _spectral_sigma(w_mat, u)).astype(jnp.float32)
    patches, (n, oh, ow) = _extract_patches(x_nhwc.astype(jnp.bfloat16), 4, 4, 1, 0)
    y = jnp.dot(patches, w_mat.astype(jnp.bfloat16),
                preferred_element_type=jnp.float32)
    y = y * inv_sigma + b
    y = jax.nn.sigmoid(y)
    return y.reshape(n, oh, ow, w_mat.shape[1])


# --------------------------- parameters / model ---------------------------- #

def init_discriminator_params(key, d=128):
    # Conv2d shapes from discriminator.__init__ (4x4 kernels everywhere).
    specs = [(1, d), (d, 2 * d), (2 * d, 4 * d), (4 * d, 8 * d), (8 * d, 1)]
    params = []
    for cin, cout in specs:
        k_w, k_u, key = jax.random.split(key, 3)
        w = 0.02 * jax.random.normal(k_w, (cout, cin, 4, 4), jnp.float32)  # PyTorch layout
        # pre-flatten to (Cin*KH*KW, Cout) to match patch ordering (c, kh, kw)
        w_mat = jnp.transpose(w, (1, 2, 3, 0)).reshape(cin * 16, cout)
        b = jnp.zeros((cout,), jnp.float32)
        u = _l2_normalize(jax.random.normal(k_u, (cout,), jnp.float32))
        params.append((w_mat, b, u))
    return params


def discriminator_forward(x_nchw, params):
    # input NCHW (PyTorch convention) -> NHWC internally -> output NCHW
    x = jnp.transpose(x_nchw, (0, 2, 3, 1))
    (w1, b1, u1), (w2, b2, u2), (w3, b3, u3), (w4, b4, u4), (w5, b5, u5) = params
    x = _conv_sn_leaky(x, w1, b1, u1, stride=2, pad=1)
    x = _conv_sn_leaky(x, w2, b2, u2, stride=2, pad=1)
    x = _conv_sn_leaky(x, w3, b3, u3, stride=2, pad=1)
    x = _conv_sn_leaky(x, w4, b4, u4, stride=2, pad=1)
    x = _conv_sn_sigmoid_head(x, w5, b5, u5)
    return jnp.transpose(x, (0, 3, 1, 2)).astype(jnp.float32)   # (N, 1, 1, 1)


# --------------------------- pure-XLA reference ----------------------------- #

def _reference_forward(x_nchw, params):
    # Same bf16 activations/weights + f32 accumulation as the kernel path, but via
    # lax.conv_general_dilated -- validates the Pallas path end to end.
    x = jnp.transpose(x_nchw, (0, 2, 3, 1)).astype(jnp.bfloat16)
    layer_cfg = [(2, 1), (2, 1), (2, 1), (2, 1), (1, 0)]
    for li, ((w_mat, b, u), (stride, pad)) in enumerate(zip(params, layer_cfg)):
        k_dim, cout = w_mat.shape
        cin = k_dim // 16
        inv_sigma = 1.0 / _spectral_sigma(w_mat, u)
        w_hwio = jnp.transpose(w_mat.reshape(cin, 4, 4, cout), (1, 2, 0, 3))
        y = jax.lax.conv_general_dilated(
            x, w_hwio.astype(jnp.bfloat16),
            window_strides=(stride, stride),
            padding=((pad, pad), (pad, pad)),
            dimension_numbers=("NHWC", "HWIO", "NHWC"),
            preferred_element_type=jnp.float32)
        y = y * inv_sigma + b
        if li < 4:
            x = jnp.where(y >= 0, y, 0.2 * y).astype(jnp.bfloat16)
        else:
            x = jax.nn.sigmoid(y)
    return jnp.transpose(x, (0, 3, 1, 2)).astype(jnp.float32)


# ---------------------------------- main ----------------------------------- #

if __name__ == "__main__":
    key = jax.random.PRNGKey(0)
    k_x, k_p = jax.random.split(key)

    # Architecture needs 64x64 single-channel inputs (64->32->16->8->4->1); small d.
    batch, d = 2, 32
    x = jax.random.normal(k_x, (batch, 1, 64, 64), jnp.float32)
    params = init_discriminator_params(k_p, d=d)

    fwd = jax.jit(discriminator_forward)
    out = fwd(x, params)
    jax.block_until_ready(out)

    assert out.shape == (batch, 1, 1, 1), out.shape
    assert bool(jnp.all((out >= 0.0) & (out <= 1.0)))           # sigmoid range

    ref = jax.jit(_reference_forward)(x, params)
    jax.block_until_ready(ref)
    assert bool(jnp.allclose(out, ref, atol=2e-2, rtol=2e-2)), (out, ref)

    print("KERNEL_OK")
</pallas_src>

<mosaic_0001>
module attributes {stable_mosaic.version = 11 : i64} {
  func.func @_matmul_bias_act_kernel(%arg0: i32, %arg1: i32, %arg2: i32, %arg3: memref<512x128xbf16, #tpu.memory_space<vmem>>, %arg4: memref<128x128xbf16, #tpu.memory_space<vmem>>, %arg5: memref<1x128xf32, #tpu.memory_space<vmem>>, %arg6: memref<1x1xf32, #tpu.memory_space<vmem>>, %arg7: memref<512x128xbf16, #tpu.memory_space<vmem>>, %arg8: memref<512x128xf32, #tpu.memory_space<vmem>>) attributes {dimension_semantics = [#tpu.dimension_semantics<parallel>, #tpu.dimension_semantics<parallel>, #tpu.dimension_semantics<arbitrary>], iteration_bounds = array<i64: 4, 1, 1>, scalar_prefetch = 0 : i64, scratch_operands = 1 : i64, tpu.core_type = #tpu.core_type<tc>, window_params = [{transform_indices = @transform_0, window_bounds = array<i64: 512, 128>}, {transform_indices = @transform_1, window_bounds = array<i64: 128, 128>}, {transform_indices = @transform_2, window_bounds = array<i64: 1, 128>}, {pipeline_mode = #tpu.pipeline_mode<synchronous>, transform_indices = @transform_3, window_bounds = array<i64: 1, 1>}, {transform_indices = @transform_4, window_bounds = array<i64: 512, 128>}]} {
    %c0_i32 = arith.constant 0 : i32
    %0 = arith.cmpi eq, %arg2, %c0_i32 : i32
    %1 = arith.extui %0 : i1 to i32
    %c0_i32_0 = arith.constant 0 : i32
    %2 = arith.cmpi ne, %1, %c0_i32_0 : i32
    scf.if %2 {
      %cst_10 = arith.constant 0.000000e+00 : f32
      %12 = vector.broadcast %cst_10 : f32 to vector<512x128xf32>
      %c0_11 = arith.constant 0 : index
      %c0_12 = arith.constant 0 : index
      %13 = vector.load %arg8[%c0_11, %c0_12] : memref<512x128xf32, #tpu.memory_space<vmem>>, vector<512x128xf32>
      tpu.vector_store %arg8[%c0_11, %c0_12], %12 {strides = array<i32>} : memref<512x128xf32, #tpu.memory_space<vmem>>, vector<512x128xf32>,
    } else {
    }
    %c0 = arith.constant 0 : index
    %c0_1 = arith.constant 0 : index
    %3 = vector.load %arg8[%c0, %c0_1] : memref<512x128xf32, #tpu.memory_space<vmem>>, vector<512x128xf32>
    %c0_2 = arith.constant 0 : index
    %c0_3 = arith.constant 0 : index
    %4 = vector.load %arg3[%c0_2, %c0_3] : memref<512x128xbf16, #tpu.memory_space<vmem>>, vector<512x128xbf16>
    %c0_4 = arith.constant 0 : index
    %c0_5 = arith.constant 0 : index
    %5 = vector.load %arg4[%c0_4, %c0_5] : memref<128x128xbf16, #tpu.memory_space<vmem>>, vector<128x128xbf16>
    %cst = arith.constant dense<0.000000e+00> : vector<512x128xf32>
    %6 = tpu.matmul %4, %5, %cst {dimension_numbers = #tpu.dot_dimension_numbers<[1], [0], [0], [1], [0, 0, 1, 1], [], []>} : vector<512x128xbf16>, vector<128x128xbf16>, vector<512x128xf32> -> vector<512x128xf32>
    %7 = arith.addf %3, %6 : vector<512x128xf32>
    %c0_6 = arith.constant 0 : index
    %c0_7 = arith.constant 0 : index
    %8 = vector.load %arg8[%c0_6, %c0_7] : memref<512x128xf32, #tpu.memory_space<vmem>>, vector<512x128xf32>
    tpu.vector_store %arg8[%c0_6, %c0_7], %7 {strides = array<i32>} : memref<512x128xf32, #tpu.memory_space<vmem>>, vector<512x128xf32>,
    %c0_i32_8 = arith.constant 0 : i32
    %9 = arith.cmpi eq, %arg2, %c0_i32_8 : i32
    %10 = arith.extui %9 : i1 to i32
    %c0_i32_9 = arith.constant 0 : i32
    %11 = arith.cmpi ne, %10, %c0_i32_9 : i32
    scf.if %11 {
      %c0_10 = arith.constant 0 : index
      %c0_11 = arith.constant 0 : index
      %12 = vector.load %arg8[%c0_10, %c0_11] : memref<512x128xf32, #tpu.memory_space<vmem>>, vector<512x128xf32>
      %c0_12 = arith.constant 0 : index
      %c0_13 = arith.constant 0 : index
      %13 = vector.load %arg6[%c0_12, %c0_13] : memref<1x1xf32, #tpu.memory_space<vmem>>, vector<1x1xf32>
      %14 = vector.broadcast %13 : vector<1x1xf32> to vector<512x128xf32>
      %15 = arith.mulf %12, %14 : vector<512x128xf32>
      %c0_14 = arith.constant 0 : index
      %c0_15 = arith.constant 0 : index
      %16 = vector.load %arg5[%c0_14, %c0_15] : memref<1x128xf32, #tpu.memory_space<vmem>>, vector<1x128xf32>
      %17 = vector.broadcast %16 : vector<1x128xf32> to vector<512x128xf32>
      %18 = arith.addf %15, %17 : vector<512x128xf32>
      %cst_16 = arith.constant 0.000000e+00 : f32
      %19 = vector.broadcast %cst_16 : f32 to vector<512x128xf32>
      %20 = arith.cmpf oge, %18, %19 : vector<512x128xf32>
      %cst_17 = arith.constant 2.000000e-01 : f32
      %21 = vector.broadcast %cst_17 : f32 to vector<512x128xf32>
      %22 = arith.mulf %21, %18 : vector<512x128xf32>
      %23 = arith.select %20, %18, %22 : vector<512x128xi1>, vector<512x128xf32>
      %24 = arith.truncf %23 : vector<512x128xf32> to vector<512x128xbf16>
      %c0_18 = arith.constant 0 : index
      %c0_19 = arith.constant 0 : index
      %25 = vector.load %arg7[%c0_18, %c0_19] : memref<512x128xbf16, #tpu.memory_space<vmem>>, vector<512x128xbf16>
      tpu.vector_store %arg7[%c0_18, %c0_19], %24 {strides = array<i32>} : memref<512x128xbf16, #tpu.memory_space<vmem>>, vector<512x128xbf16>,
    } else {
    }
    return
  }
  func.func @transform_0(%arg0: i32, %arg1: i32, %arg2: i32) -> (i32, i32) {
    %c0_i32 = arith.constant 0 : i32
    return %arg0, %arg2 : i32, i32
  }
  func.func @transform_1(%arg0: i32, %arg1: i32, %arg2: i32) -> (i32, i32) {
    %c0_i32 = arith.constant 0 : i32
    return %arg2, %arg1 : i32, i32
  }
  func.func @transform_2(%arg0: i32, %arg1: i32, %arg2: i32) -> (i32, i32) {
    %c0_i32 = arith.constant 0 : i32
    %c0_i32_0 = arith.constant 0 : i32
    return %c0_i32, %arg1 : i32, i32
  }
  func.func @transform_3(%arg0: i32, %arg1: i32, %arg2: i32) -> (i32, i32) {
    %c0_i32 = arith.constant 0 : i32
    %c0_i32_0 = arith.constant 0 : i32
    %c0_i32_1 = arith.constant 0 : i32
    return %c0_i32, %c0_i32_0 : i32, i32
  }
  func.func @transform_4(%arg0: i32, %arg1: i32, %arg2: i32) -> (i32, i32) {
    %c0_i32 = arith.constant 0 : i32
    return %arg0, %arg1 : i32, i32
  }
}

module attributes {stable_mosaic.version = 11 : i64} {
  func.func @_matmul_bias_act_kernel(%arg0: i32, %arg1: i32, %arg2: i32, %arg3: memref<512x512xbf16, #tpu.memory_space<vmem>>, %arg4: memref<512x128xbf16, #tpu.memory_space<vmem>>, %arg5: memref<1x128xf32, #tpu.memory_space<vmem>>, %arg6: memref<1x1xf32, #tpu.memory_space<vmem>>, %arg7: memref<512x128xbf16, #tpu.memory_space<vmem>>, %arg8: memref<512x128xf32, #tpu.memory_space<vmem>>) attributes {dimension_semantics = [#tpu.dimension_semantics<parallel>, #tpu.dimension_semantics<parallel>, #tpu.dimension_semantics<arbitrary>], iteration_bounds = array<i64: 1, 1, 1>, scalar_prefetch = 0 : i64, scratch_operands = 1 : i64, tpu.core_type = #tpu.core_type<tc>, window_params = [{transform_indices = @transform_0, window_bounds = array<i64: 512, 512>}, {transform_indices = @transform_1, window_bounds = array<i64: 512, 128>}, {transform_indices = @transform_2, window_bounds = array<i64: 1, 128>}, {pipeline_mode = #tpu.pipeline_mode<synchronous>, transform_indices = @transform_3, window_bounds = array<i64: 1, 1>}, {transform_indices = @transform_4, window_bounds = array<i64: 512, 128>}]} {
    %c0_i32 = arith.constant 0 : i32
    %0 = arith.cmpi eq, %arg2, %c0_i32 : i32
    %1 = arith.extui %0 : i1 to i32
    %c0_i32_0 = arith.constant 0 : i32
    %2 = arith.cmpi ne, %1, %c0_i32_0 : i32
    scf.if %2 {
      %cst_10 = arith.constant 0.000000e+00 : f32
      %12 = vector.broadcast %cst_10 : f32 to vector<512x128xf32>
      %c0_11 = arith.constant 0 : index
      %c0_12 = arith.constant 0 : index
      %13 = vector.load %arg8[%c0_11, %c0_12] : memref<512x128xf32, #tpu.memory_space<vmem>>, vector<512x128xf32>
      tpu.vector_store %arg8[%c0_11, %c0_12], %12 {strides = array<i32>} : memref<512x128xf32, #tpu.memory_space<vmem>>, vector<512x128xf32>,
    } else {
    }
    %c0 = arith.constant 0 : index
    %c0_1 = arith.constant 0 : index
    %3 = vector.load %arg8[%c0, %c0_1] : memref<512x128xf32, #tpu.memory_space<vmem>>, vector<512x128xf32>
    %c0_2 = arith.constant 0 : index
    %c0_3 = arith.constant 0 : index
    %4 = vector.load %arg3[%c0_2, %c0_3] : memref<512x512xbf16, #tpu.memory_space<vmem>>, vector<512x512xbf16>
    %c0_4 = arith.constant 0 : index
    %c0_5 = arith.constant 0 : index
    %5 = vector.load %arg4[%c0_4, %c0_5] : memref<512x128xbf16, #tpu.memory_space<vmem>>, vector<512x128xbf16>
    %cst = arith.constant dense<0.000000e+00> : vector<512x128xf32>
    %6 = tpu.matmul %4, %5, %cst {dimension_numbers = #tpu.dot_dimension_numbers<[1], [0], [0], [1], [0, 0, 1, 1], [], []>} : vector<512x512xbf16>, vector<512x128xbf16>, vector<512x128xf32> -> vector<512x128xf32>
    %7 = arith.addf %3, %6 : vector<512x128xf32>
    %c0_6 = arith.constant 0 : index
    %c0_7 = arith.constant 0 : index
    %8 = vector.load %arg8[%c0_6, %c0_7] : memref<512x128xf32, #tpu.memory_space<vmem>>, vector<512x128xf32>
    tpu.vector_store %arg8[%c0_6, %c0_7], %7 {strides = array<i32>} : memref<512x128xf32, #tpu.memory_space<vmem>>, vector<512x128xf32>,
    %c0_i32_8 = arith.constant 0 : i32
    %9 = arith.cmpi eq, %arg2, %c0_i32_8 : i32
    %10 = arith.extui %9 : i1 to i32
    %c0_i32_9 = arith.constant 0 : i32
    %11 = arith.cmpi ne, %10, %c0_i32_9 : i32
    scf.if %11 {
      %c0_10 = arith.constant 0 : index
      %c0_11 = arith.constant 0 : index
      %12 = vector.load %arg8[%c0_10, %c0_11] : memref<512x128xf32, #tpu.memory_space<vmem>>, vector<512x128xf32>
      %c0_12 = arith.constant 0 : index
      %c0_13 = arith.constant 0 : index
      %13 = vector.load %arg6[%c0_12, %c0_13] : memref<1x1xf32, #tpu.memory_space<vmem>>, vector<1x1xf32>
      %14 = vector.broadcast %13 : vector<1x1xf32> to vector<512x128xf32>
      %15 = arith.mulf %12, %14 : vector<512x128xf32>
      %c0_14 = arith.constant 0 : index
      %c0_15 = arith.constant 0 : index
      %16 = vector.load %arg5[%c0_14, %c0_15] : memref<1x128xf32, #tpu.memory_space<vmem>>, vector<1x128xf32>
      %17 = vector.broadcast %16 : vector<1x128xf32> to vector<512x128xf32>
      %18 = arith.addf %15, %17 : vector<512x128xf32>
      %cst_16 = arith.constant 0.000000e+00 : f32
      %19 = vector.broadcast %cst_16 : f32 to vector<512x128xf32>
      %20 = arith.cmpf oge, %18, %19 : vector<512x128xf32>
      %cst_17 = arith.constant 2.000000e-01 : f32
      %21 = vector.broadcast %cst_17 : f32 to vector<512x128xf32>
      %22 = arith.mulf %21, %18 : vector<512x128xf32>
      %23 = arith.select %20, %18, %22 : vector<512x128xi1>, vector<512x128xf32>
      %24 = arith.truncf %23 : vector<512x128xf32> to vector<512x128xbf16>
      %c0_18 = arith.constant 0 : index
      %c0_19 = arith.constant 0 : index
      %25 = vector.load %arg7[%c0_18, %c0_19] : memref<512x128xbf16, #tpu.memory_space<vmem>>, vector<512x128xbf16>
      tpu.vector_store %arg7[%c0_18, %c0_19], %24 {strides = array<i32>} : memref<512x128xbf16, #tpu.memory_space<vmem>>, vector<512x128xbf16>,
    } else {
    }
    return
  }
  func.func @transform_0(%arg0: i32, %arg1: i32, %arg2: i32) -> (i32, i32) {
    %c0_i32 = arith.constant 0 : i32
    return %arg0, %arg2 : i32, i32
  }
  func.func @transform_1(%arg0: i32, %arg1: i32, %arg2: i32) -> (i32, i32) {
    %c0_i32 = arith.constant 0 : i32
    return %arg2, %arg1 : i32, i32
  }
  func.func @transform_2(%arg0: i32, %arg1: i32, %arg2: i32) -> (i32, i32) {
    %c0_i32 = arith.constant 0 : i32
    %c0_i32_0 = arith.constant 0 : i32
    return %c0_i32, %arg1 : i32, i32
  }
  func.func @transform_3(%arg0: i32, %arg1: i32, %arg2: i32) -> (i32, i32) {
    %c0_i32 = arith.constant 0 : i32
    %c0_i32_0 = arith.constant 0 : i32
    %c0_i32_1 = arith.constant 0 : i32
    return %c0_i32, %c0_i32_0 : i32, i32
  }
  func.func @transform_4(%arg0: i32, %arg1: i32, %arg2: i32) -> (i32, i32) {
    %c0_i32 = arith.constant 0 : i32
    return %arg0, %arg1 : i32, i32
  }
}

module attributes {stable_mosaic.version = 11 : i64} {
  func.func @_matmul_bias_act_kernel(%arg0: i32, %arg1: i32, %arg2: i32, %arg3: memref<128x512xbf16, #tpu.memory_space<vmem>>, %arg4: memref<512x128xbf16, #tpu.memory_space<vmem>>, %arg5: memref<1x128xf32, #tpu.memory_space<vmem>>, %arg6: memref<1x1xf32, #tpu.memory_space<vmem>>, %arg7: memref<128x128xbf16, #tpu.memory_space<vmem>>, %arg8: memref<128x128xf32, #tpu.memory_space<vmem>>) attributes {dimension_semantics = [#tpu.dimension_semantics<parallel>, #tpu.dimension_semantics<parallel>, #tpu.dimension_semantics<arbitrary>], iteration_bounds = array<i64: 1, 1, 2>, scalar_prefetch = 0 : i64, scratch_operands = 1 : i64, tpu.core_type = #tpu.core_type<tc>, window_params = [{transform_indices = @transform_0, window_bounds = array<i64: 128, 512>}, {transform_indices = @transform_1, window_bounds = array<i64: 512, 128>}, {transform_indices = @transform_2, window_bounds = array<i64: 1, 128>}, {pipeline_mode = #tpu.pipeline_mode<synchronous>, transform_indices = @transform_3, window_bounds = array<i64: 1, 1>}, {transform_indices = @transform_4, window_bounds = array<i64: 128, 128>}]} {
    %c0_i32 = arith.constant 0 : i32
    %0 = arith.cmpi eq, %arg2, %c0_i32 : i32
    %1 = arith.extui %0 : i1 to i32
    %c0_i32_0 = arith.constant 0 : i32
    %2 = arith.cmpi ne, %1, %c0_i32_0 : i32
    scf.if %2 {
      %cst_9 = arith.constant 0.000000e+00 : f32
      %12 = vector.broadcast %cst_9 : f32 to vector<128x128xf32>
      %c0_10 = arith.constant 0 : index
      %c0_11 = arith.constant 0 : index
      %13 = vector.load %arg8[%c0_10, %c0_11] : memref<128x128xf32, #tpu.memory_space<vmem>>, vector<128x128xf32>
      tpu.vector_store %arg8[%c0_10, %c0_11], %12 {strides = array<i32>} : memref<128x128xf32, #tpu.memory_space<vmem>>, vector<128x128xf32>,
    } else {
    }
    %c0 = arith.constant 0 : index
    %c0_1 = arith.constant 0 : index
    %3 = vector.load %arg8[%c0, %c0_1] : memref<128x128xf32, #tpu.memory_space<vmem>>, vector<128x128xf32>
    %c0_2 = arith.constant 0 : index
    %c0_3 = arith.constant 0 : index
    %4 = vector.load %arg3[%c0_2, %c0_3] : memref<128x512xbf16, #tpu.memory_space<vmem>>, vector<128x512xbf16>
    %c0_4 = arith.constant 0 : index
    %c0_5 = arith.constant 0 : index
    %5 = vector.load %arg4[%c0_4, %c0_5] : memref<512x128xbf16, #tpu.memory_space<vmem>>, vector<512x128xbf16>
    %cst = arith.constant dense<0.000000e+00> : vector<128x128xf32>
    %6 = tpu.matmul %4, %5, %cst {dimension_numbers = #tpu.dot_dimension_numbers<[1], [0], [0], [1], [0, 0, 1, 1], [], []>} : vector<128x512xbf16>, vector<512x128xbf16>, vector<128x128xf32> -> vector<128x128xf32>
    %7 = arith.addf %3, %6 : vector<128x128xf32>
    %c0_6 = arith.constant 0 : index
    %c0_7 = arith.constant 0 : index
    %8 = vector.load %arg8[%c0_6, %c0_7] : memref<128x128xf32, #tpu.memory_space<vmem>>, vector<128x128xf32>
    tpu.vector_store %arg8[%c0_6, %c0_7], %7 {strides = array<i32>} : memref<128x128xf32, #tpu.memory_space<vmem>>, vector<128x128xf32>,
    %c1_i32 = arith.constant 1 : i32
    %9 = arith.cmpi eq, %arg2, %c1_i32 : i32
    %10 = arith.extui %9 : i1 to i32
    %c0_i32_8 = arith.constant 0 : i32
    %11 = arith.cmpi ne, %10, %c0_i32_8 : i32
    scf.if %11 {
      %c0_9 = arith.constant 0 : index
      %c0_10 = arith.constant 0 : index
      %12 = vector.load %arg8[%c0_9, %c0_10] : memref<128x128xf32, #tpu.memory_space<vmem>>, vector<128x128xf32>
      %c0_11 = arith.constant 0 : index
      %c0_12 = arith.constant 0 : index
      %13 = vector.load %arg6[%c0_11, %c0_12] : memref<1x1xf32, #tpu.memory_space<vmem>>, vector<1x1xf32>
      %14 = vector.broadcast %13 : vector<1x1xf32> to vector<128x128xf32>
      %15 = arith.mulf %12, %14 : vector<128x128xf32>
      %c0_13 = arith.constant 0 : index
      %c0_14 = arith.constant 0 : index
      %16 = vector.load %arg5[%c0_13, %c0_14] : memref<1x128xf32, #tpu.memory_space<vmem>>, vector<1x128xf32>
      %17 = vector.broadcast %16 : vector<1x128xf32> to vector<128x128xf32>
      %18 = arith.addf %15, %17 : vector<128x128xf32>
      %cst_15 = arith.constant 0.000000e+00 : f32
      %19 = vector.broadcast %cst_15 : f32 to vector<128x128xf32>
      %20 = arith.cmpf oge, %18, %19 : vector<128x128xf32>
      %cst_16 = arith.constant 2.000000e-01 : f32
      %21 = vector.broadcast %cst_16 : f32 to vector<128x128xf32>
      %22 = arith.mulf %21, %18 : vector<128x128xf32>
      %23 = arith.select %20, %18, %22 : vector<128x128xi1>, vector<128x128xf32>
      %24 = arith.truncf %23 : vector<128x128xf32> to vector<128x128xbf16>
      %c0_17 = arith.constant 0 : index
      %c0_18 = arith.constant 0 : index
      %25 = vector.load %arg7[%c0_17, %c0_18] : memref<128x128xbf16, #tpu.memory_space<vmem>>, vector<128x128xbf16>
      tpu.vector_store %arg7[%c0_17, %c0_18], %24 {strides = array<i32>} : memref<128x128xbf16, #tpu.memory_space<vmem>>, vector<128x128xbf16>,
    } else {
    }
    return
  }
  func.func @transform_0(%arg0: i32, %arg1: i32, %arg2: i32) -> (i32, i32) {
    %c0_i32 = arith.constant 0 : i32
    return %arg0, %arg2 : i32, i32
  }
  func.func @transform_1(%arg0: i32, %arg1: i32, %arg2: i32) -> (i32, i32) {
    %c0_i32 = arith.constant 0 : i32
    return %arg2, %arg1 : i32, i32
  }
  func.func @transform_2(%arg0: i32, %arg1: i32, %arg2: i32) -> (i32, i32) {
    %c0_i32 = arith.constant 0 : i32
    %c0_i32_0 = arith.constant 0 : i32
    return %c0_i32, %arg1 : i32, i32
  }
  func.func @transform_3(%arg0: i32, %arg1: i32, %arg2: i32) -> (i32, i32) {
    %c0_i32 = arith.constant 0 : i32
    %c0_i32_0 = arith.constant 0 : i32
    %c0_i32_1 = arith.constant 0 : i32
    return %c0_i32, %c0_i32_0 : i32, i32
  }
  func.func @transform_4(%arg0: i32, %arg1: i32, %arg2: i32) -> (i32, i32) {
    %c0_i32 = arith.constant 0 : i32
    return %arg0, %arg1 : i32, i32
  }
}

module attributes {stable_mosaic.version = 11 : i64} {
  func.func @_matmul_bias_act_kernel(%arg0: i32, %arg1: i32, %arg2: i32, %arg3: memref<32x512xbf16, #tpu.memory_space<vmem>>, %arg4: memref<512x256xbf16, #tpu.memory_space<vmem>>, %arg5: memref<1x256xf32, #tpu.memory_space<vmem>>, %arg6: memref<1x1xf32, #tpu.memory_space<vmem>>, %arg7: memref<32x256xbf16, #tpu.memory_space<vmem>>, %arg8: memref<32x256xf32, #tpu.memory_space<vmem>>) attributes {dimension_semantics = [#tpu.dimension_semantics<parallel>, #tpu.dimension_semantics<parallel>, #tpu.dimension_semantics<arbitrary>], iteration_bounds = array<i64: 1, 1, 4>, scalar_prefetch = 0 : i64, scratch_operands = 1 : i64, tpu.core_type = #tpu.core_type<tc>, window_params = [{transform_indices = @transform_0, window_bounds = array<i64: 32, 512>}, {transform_indices = @transform_1, window_bounds = array<i64: 512, 256>}, {transform_indices = @transform_2, window_bounds = array<i64: 1, 256>}, {pipeline_mode = #tpu.pipeline_mode<synchronous>, transform_indices = @transform_3, window_bounds = array<i64: 1, 1>}, {transform_indices = @transform_4, window_bounds = array<i64: 32, 256>}]} {
    %c0_i32 = arith.constant 0 : i32
    %0 = arith.cmpi eq, %arg2, %c0_i32 : i32
    %1 = arith.extui %0 : i1 to i32
    %c0_i32_0 = arith.constant 0 : i32
    %2 = arith.cmpi ne, %1, %c0_i32_0 : i32
    scf.if %2 {
      %cst_9 = arith.constant 0.000000e+00 : f32
      %12 = vector.broadcast %cst_9 : f32 to vector<32x256xf32>
      %c0_10 = arith.constant 0 : index
      %c0_11 = arith.constant 0 : index
      %13 = vector.load %arg8[%c0_10, %c0_11] : memref<32x256xf32, #tpu.memory_space<vmem>>, vector<32x256xf32>
      tpu.vector_store %arg8[%c0_10, %c0_11], %12 {strides = array<i32>} : memref<32x256xf32, #tpu.memory_space<vmem>>, vector<32x256xf32>,
    } else {
    }
    %c0 = arith.constant 0 : index
    %c0_1 = arith.constant 0 : index
    %3 = vector.load %arg8[%c0, %c0_1] : memref<32x256xf32, #tpu.memory_space<vmem>>, vector<32x256xf32>
    %c0_2 = arith.constant 0 : index
    %c0_3 = arith.constant 0 : index
    %4 = vector.load %arg3[%c0_2, %c0_3] : memref<32x512xbf16, #tpu.memory_space<vmem>>, vector<32x512xbf16>
    %c0_4 = arith.constant 0 : index
    %c0_5 = arith.constant 0 : index
    %5 = vector.load %arg4[%c0_4, %c0_5] : memref<512x256xbf16, #tpu.memory_space<vmem>>, vector<512x256xbf16>
    %cst = arith.constant dense<0.000000e+00> : vector<32x256xf32>
    %6 = tpu.matmul %4, %5, %cst {dimension_numbers = #tpu.dot_dimension_numbers<[1], [0], [0], [1], [0, 0, 1, 1], [], []>} : vector<32x512xbf16>, vector<512x256xbf16>, vector<32x256xf32> -> vector<32x256xf32>
    %7 = arith.addf %3, %6 : vector<32x256xf32>
    %c0_6 = arith.constant 0 : index
    %c0_7 = arith.constant 0 : index
    %8 = vector.load %arg8[%c0_6, %c0_7] : memref<32x256xf32, #tpu.memory_space<vmem>>, vector<32x256xf32>
    tpu.vector_store %arg8[%c0_6, %c0_7], %7 {strides = array<i32>} : memref<32x256xf32, #tpu.memory_space<vmem>>, vector<32x256xf32>,
    %c3_i32 = arith.constant 3 : i32
    %9 = arith.cmpi eq, %arg2, %c3_i32 : i32
    %10 = arith.extui %9 : i1 to i32
    %c0_i32_8 = arith.constant 0 : i32
    %11 = arith.cmpi ne, %10, %c0_i32_8 : i32
    scf.if %11 {
      %c0_9 = arith.constant 0 : index
      %c0_10 = arith.constant 0 : index
      %12 = vector.load %arg8[%c0_9, %c0_10] : memref<32x256xf32, #tpu.memory_space<vmem>>, vector<32x256xf32>
      %c0_11 = arith.constant 0 : index
      %c0_12 = arith.constant 0 : index
      %13 = vector.load %arg6[%c0_11, %c0_12] : memref<1x1xf32, #tpu.memory_space<vmem>>, vector<1x1xf32>
      %14 = vector.broadcast %13 : vector<1x1xf32> to vector<32x256xf32>
      %15 = arith.mulf %12, %14 : vector<32x256xf32>
      %c0_13 = arith.constant 0 : index
      %c0_14 = arith.constant 0 : index
      %16 = vector.load %arg5[%c0_13, %c0_14] : memref<1x256xf32, #tpu.memory_space<vmem>>, vector<1x256xf32>
      %17 = vector.broadcast %16 : vector<1x256xf32> to vector<32x256xf32>
      %18 = arith.addf %15, %17 : vector<32x256xf32>
      %cst_15 = arith.constant 0.000000e+00 : f32
      %19 = vector.broadcast %cst_15 : f32 to vector<32x256xf32>
      %20 = arith.cmpf oge, %18, %19 : vector<32x256xf32>
      %cst_16 = arith.constant 2.000000e-01 : f32
      %21 = vector.broadcast %cst_16 : f32 to vector<32x256xf32>
      %22 = arith.mulf %21, %18 : vector<32x256xf32>
      %23 = arith.select %20, %18, %22 : vector<32x256xi1>, vector<32x256xf32>
      %24 = arith.truncf %23 : vector<32x256xf32> to vector<32x256xbf16>
      %c0_17 = arith.constant 0 : index
      %c0_18 = arith.constant 0 : index
      %25 = vector.load %arg7[%c0_17, %c0_18] : memref<32x256xbf16, #tpu.memory_space<vmem>>, vector<32x256xbf16>
      tpu.vector_store %arg7[%c0_17, %c0_18], %24 {strides = array<i32>} : memref<32x256xbf16, #tpu.memory_space<vmem>>, vector<32x256xbf16>,
    } else {
    }
    return
  }
  func.func @transform_0(%arg0: i32, %arg1: i32, %arg2: i32) -> (i32, i32) {
    %c0_i32 = arith.constant 0 : i32
    return %arg0, %arg2 : i32, i32
  }
  func.func @transform_1(%arg0: i32, %arg1: i32, %arg2: i32) -> (i32, i32) {
    %c0_i32 = arith.constant 0 : i32
    return %arg2, %arg1 : i32, i32
  }
  func.func @transform_2(%arg0: i32, %arg1: i32, %arg2: i32) -> (i32, i32) {
    %c0_i32 = arith.constant 0 : i32
    %c0_i32_0 = arith.constant 0 : i32
    return %c0_i32, %arg1 : i32, i32
  }
  func.func @transform_3(%arg0: i32, %arg1: i32, %arg2: i32) -> (i32, i32) {
    %c0_i32 = arith.constant 0 : i32
    %c0_i32_0 = arith.constant 0 : i32
    %c0_i32_1 = arith.constant 0 : i32
    return %c0_i32, %c0_i32_0 : i32, i32
  }
  func.func @transform_4(%arg0: i32, %arg1: i32, %arg2: i32) -> (i32, i32) {
    %c0_i32 = arith.constant 0 : i32
    return %arg0, %arg1 : i32, i32
  }
}

</mosaic_0001>

<bundles_post_ra>
// kernel: discriminator_forward.4
= control target key start
LH: loop header
LB: loop body
LE: loop exit
PB: predicated region body
PF: predicated region fallthrough
CT: control target
= control target key end

     0   :  { %s2622_s17 = smov 0   ;;  %s2624_s18 = smov 0   ;;  %s2934_s0 = inlined_call_operand.vmem [shape: bf16[2048,128], index: 0, kind: input, shape index: {}]   ;;  %s2935_s1 = inlined_call_operand.vmem [shape: bf16[128,128], index: 1, kind: input, shape index: {}]   ;;  %s2936_s2 = inlined_call_operand.vmem [shape: f32[1,128], index: 2, kind: input, shape index: {}]   ;;  %s2937_s3 = inlined_call_operand.<no memory space> [shape: f32[1,1], index: 3, kind: input, shape index: {}]   ;;  %s2938_s4 = inlined_call_operand.vmem [shape: bf16[2048,128], index: 4, kind: output, shape index: {}]  }
   0x1   :  { %v9_v0 = vstv %s2937_s3  ;;  %s2626_s19 = smov 0  }
   0x2   :  { %10 = vst [vmem:[#allocation3] sm:$0x1] %v9_v0 }
   0x3 LB: > { %s35_s3 = sadd.s32 1, %s2587_s18  ;;  %p1999_p0 = scmp.ge.s32.totalorder %s2591_s19, 1  ;;  %s2591_s19 = sphi %s2626_s19, %s16_s19   ;;  %s2587_s18 = sphi %s2624_s18, %s2940_s18   ;;  %s2583_s17 = sphi %s2622_s17, %s2939_s17  }
   0x4   : > { %p37_p1 = scmp.ge.s32.totalorder %s35_s3, 4  ;;  %p215_p2 = scmp.lt.s32.totalorder %s2591_s19, 5 }
   0x6   : > { %s2942_s3 = smov (%p37_p1, %s35_s3), 0  ;;  %p216_p3 = pnand %p1999_p0, %p215_p2 }
   0x7   : > { %s2000_s22 = sshll.u32 (!%p216_p3), %s2583_s17, 6 }
   0x8   : > { %219 = sbr.rel (%p216_p3) target bundleno = 335 (0x14f), region = 36  ;;  %p259_p4 = scmp.lt.s32.totalorder (!%p216_p3), %s2000_s22, 255 }
   0xd   : > { %v2529_v1 = vld [vmem:[%s2935_s1 + $0x38] sm:$0xff]   ;;  %v2530_v2 = vld [vmem:[%s2935_s1 + $0x30] sm:$0xff]   ;;  %s2944_s22 = smov (!%p259_p4, %s2000_s22), 255  ;;  %v2531_v3 = vld [vmem:[%s2935_s1 + $0x28] sm:$0xff]   ;;  %v2593_v4 = vmov 0  }
   0xe   : > { %2407 = vmatprep.subr.bf16.mxu0 %v2529_v1  ;;  %2487 = vmatprep.subr.bf16.mxu1 %v2529_v1  ;;  %s2001_s27 = sshll.u32 %s2944_s22, 2  ;;  %v2532_v5 = vld [vmem:[%s2935_s1 + $0x20] sm:$0xff]   ;;  %v2533_v8 = vld [vmem:[%s2935_s1 + $0x18] sm:$0xff]   ;;  %v2534_v9 = vld [vmem:[%s2935_s1 + $0x10] sm:$0xff]  }
   0xf   : > { %2408 = vmatpush3.bf16.msra.mxu0 %v2529_v1  ;;  %2495 = vmatpush3.bf16.msra.mxu1 %v2529_v1  ;;  %s2657_s30 = scalar_lea.vmem %s2934_s0, %s2001_s27  ;;  %v2535_v10 = vld [vmem:[%s2935_s1 + $0x8] sm:$0xff]   ;;  %v2536_v11 = vld [vmem:[%s2935_s1] sm:$0xff]   ;;  %s2736_s21 = scalar_lea.vmem %s2938_s4, %s2001_s27 }
  0x10   : > { %2409 = vmatprep.subr.bf16.mxu0 %v2530_v2  ;;  %2488 = vmatprep.subr.bf16.mxu1 %v2530_v2  ;;  %v2537_v6 = vld [vmem:[%s2657_s30] sm:$0xff]   ;;  %v2539_v12 = vld [vmem:[%s2657_s30 + $0x8] sm:$0xff]   ;;  %v2541_v14 = vld [vmem:[%s2657_s30 + $0x10] sm:$0xff]  }
  0x11   : > { %2528 = vset.pattern.permute.xlu0 %v2593_v4  ;;  %v2538_v7 = vld [vmem:[%s2657_s30 + $0x80] sm:$0xff]   ;;  %2423 = vmatprep.mubr.bf16.mxu0 %v2537_v6  ;;  %v2540_v13 = vld [vmem:[%s2657_s30 + $0x88] sm:$0xff]   ;;  %v2542_v15 = vld [vmem:[%s2657_s30 + $0x90] sm:$0xff]  }
  0x12   : > { %2455 = vmatprep.mubr.bf16.mxu1 %v2538_v7  ;;  %v2543_v16 = vld [vmem:[%s2657_s30 + $0x18] sm:$0xff]   ;;  %v2545_v18 = vld [vmem:[%s2657_s30 + $0x20] sm:$0xff]   ;;  %v2547_v21 = vld [vmem:[%s2657_s30 + $0x28] sm:$0xff]  }
  0x13   : > { %2410 = vmatpush3.bf16.msra.mxu0 %v2530_v2  ;;  %2496 = vmatpush3.bf16.msra.mxu1 %v2530_v2  ;;  %v2544_v17 = vld [vmem:[%s2657_s30 + $0x98] sm:$0xff]   ;;  %v2546_v19 = vld [vmem:[%s2657_s30 + $0xa0] sm:$0xff]   ;;  %v2548_v22 = vld [vmem:[%s2657_s30 + $0xa8] sm:$0xff]  }
  0x14   : > { %2411 = vmatprep.subr.bf16.mxu0 %v2531_v3  ;;  %2489 = vmatprep.subr.bf16.mxu1 %v2531_v3  ;;  %v2044_v20 = vld [vmem:[#allocation3] ss:$0 sm:$0xff]  ;;  %v2549_v23 = vld [vmem:[%s2657_s30 + $0x30] sm:$0xff]   ;;  %v2551_v25 = vld [vmem:[%s2657_s30 + $0x38] sm:$0xff]  }
  0x15   : > { %1232 = vperm.xlu0 %2528, %v2044_v20   ;;  %v2550_v24 = vld [vmem:[%s2657_s30 + $0xb0] sm:$0xff]   ;;  %v2552_v26 = vld [vmem:[%s2657_s30 + $0xb8] sm:$0xff]   ;;  %v2553_v27 = vld [vmem:[%s2657_s30 + $0x40] sm:$0xff]  }
  0x16   : > { %v2554_v28 = vld [vmem:[%s2657_s30 + $0xc0] sm:$0xff]   ;;  %v2555_v29 = vld [vmem:[%s2657_s30 + $0x48] sm:$0xff]   ;;  %v2557_v31 = vld [vmem:[%s2657_s30 + $0x50] sm:$0xff]  }
  0x17   : > { %2412 = vmatpush3.bf16.msra.mxu0 %v2531_v3  ;;  %2497 = vmatpush3.bf16.msra.mxu1 %v2531_v3  ;;  %v2556_v30 = vld [vmem:[%s2657_s30 + $0xc8] sm:$0xff]   ;;  %v2558_v32 = vld [vmem:[%s2657_s30 + $0xd0] sm:$0xff]   ;;  %v2559_v33 = vld [vmem:[%s2657_s30 + $0x58] sm:$0xff]  }
  0x18   : > { %2413 = vmatprep.subr.bf16.mxu0 %v2532_v5  ;;  %2490 = vmatprep.subr.bf16.mxu1 %v2532_v5  ;;  %v2560_v34 = vld [vmem:[%s2657_s30 + $0xd8] sm:$0xff]   ;;  %v2561_v35 = vld [vmem:[%s2657_s30 + $0x60] sm:$0xff]   ;;  %v2563_v37 = vld [vmem:[%s2657_s30 + $0x68] sm:$0xff]  }
  0x19   : > { %v2562_v36 = vld [vmem:[%s2657_s30 + $0xe0] sm:$0xff]   ;;  %v2564_v38 = vld [vmem:[%s2657_s30 + $0xe8] sm:$0xff]   ;;  %v2565_v39 = vld [vmem:[%s2657_s30 + $0x70] sm:$0xff]  }
  0x1a   : > { %v2566_v40 = vld [vmem:[%s2657_s30 + $0xf0] sm:$0xff]   ;;  %v2567_v41 = vld [vmem:[%s2657_s30 + $0x78] sm:$0xff]   ;;  %v2711_v45 = vld [vmem:[%s2936_s2] ss:$0 sm:$0xff] }
  0x1b   : > { %2414 = vmatpush3.bf16.msra.mxu0 %v2532_v5  ;;  %2498 = vmatpush3.bf16.msra.mxu1 %v2532_v5  ;;  %v2568_v42 = vld [vmem:[%s2657_s30 + $0xf8] sm:$0xff]  }
  0x1c   : > { %2415 = vmatprep.subr.bf16.mxu0 %v2533_v8  ;;  %2491 = vmatprep.subr.bf16.mxu1 %v2533_v8 }
  0x1f   : > { %2416 = vmatpush3.bf16.msra.mxu0 %v2533_v8  ;;  %2499 = vmatpush3.bf16.msra.mxu1 %v2533_v8 }
  0x20   : > { %2417 = vmatprep.subr.bf16.mxu0 %v2534_v9  ;;  %2492 = vmatprep.subr.bf16.mxu1 %v2534_v9 }
  0x23   : > { %2418 = vmatpush3.bf16.msra.mxu0 %v2534_v9  ;;  %2500 = vmatpush3.bf16.msra.mxu1 %v2534_v9 }
  0x24   : > { %2419 = vmatprep.subr.bf16.mxu0 %v2535_v10  ;;  %2493 = vmatprep.subr.bf16.mxu1 %v2535_v10 }
  0x27   : > { %2420 = vmatpush3.bf16.msra.mxu0 %v2535_v10  ;;  %2501 = vmatpush3.bf16.msra.mxu1 %v2535_v10 }
  0x28   : > { %2421 = vmatprep.subr.bf16.mxu0 %v2536_v11  ;;  %2494 = vmatprep.subr.bf16.mxu1 %v2536_v11 }
  0x2b   : > { %2422 = vmatpush3.bf16.msra.mxu0 %v2536_v11  ;;  %2502 = vmatpush3.bf16.msra.mxu1 %v2536_v11 }
  0x2e   : > { %2424 = vmatmul.mubr.bf16.vlgmr.msra.gmra.mxu0 %v2539_v12  ;;  %2456 = vmatmul.mubr.bf16.vlgmr.msra.gmra.mxu1 %v2540_v13 }
  0x2f   : > { %2427 = vmatprep.mubr.bf16.mxu0 %v2541_v14  ;;  %2459 = vmatprep.mubr.bf16.mxu1 %v2542_v15 }
  0x36   : > { %2428 = vmatmul.mubr.bf16.gmra.mxu0 %v2543_v16  ;;  %2460 = vmatmul.mubr.bf16.gmra.mxu1 %v2544_v17 }
  0x37   : > { %2431 = vmatprep.mubr.bf16.mxu0 %v2545_v18  ;;  %2463 = vmatprep.mubr.bf16.mxu1 %v2546_v19 }
  0x3e   : > { %2432 = vmatmul.mubr.bf16.gmra.mxu0 %v2547_v21  ;;  %2464 = vmatmul.mubr.bf16.gmra.mxu1 %v2548_v22 }
  0x3f   : > { %2435 = vmatprep.mubr.bf16.mxu0 %v2549_v23  ;;  %2467 = vmatprep.mubr.bf16.mxu1 %v2550_v24 }
  0x46   : > { %2436 = vmatmul.mubr.bf16.gmra.mxu0 %v2551_v25  ;;  %2468 = vmatmul.mubr.bf16.gmra.mxu1 %v2552_v26 }
  0x47   : > { %2439 = vmatprep.mubr.bf16.mxu0 %v2553_v27  ;;  %2471 = vmatprep.mubr.bf16.mxu1 %v2554_v28 }
  0x4e   : > { %2440 = vmatmul.mubr.bf16.gmra.mxu0 %v2555_v29  ;;  %2472 = vmatmul.mubr.bf16.gmra.mxu1 %v2556_v30 }
  0x4f   : > { %2443 = vmatprep.mubr.bf16.mxu0 %v2557_v31  ;;  %2475 = vmatprep.mubr.bf16.mxu1 %v2558_v32 }
  0x56   : > { %2444 = vmatmul.mubr.bf16.gmra.mxu0 %v2559_v33  ;;  %2476 = vmatmul.mubr.bf16.gmra.mxu1 %v2560_v34 }
  0x57   : > { %2447 = vmatprep.mubr.bf16.mxu0 %v2561_v35  ;;  %2479 = vmatprep.mubr.bf16.mxu1 %v2562_v36 }
  0x5e   : > { %2448 = vmatmul.mubr.bf16.gmra.mxu0 %v2563_v37  ;;  %2480 = vmatmul.mubr.bf16.gmra.mxu1 %v2564_v38 }
  0x5f   : > { %2451 = vmatprep.mubr.bf16.mxu0 %v2565_v39  ;;  %2483 = vmatprep.mubr.bf16.mxu1 %v2566_v40 }
  0x66   : > { %2452 = vmatmul.mubr.bf16.gmra.mxu0 %v2567_v41  ;;  %2484 = vmatmul.mubr.bf16.gmra.mxu1 %v2568_v42 }
  0x90   : > { %v2706_v43 = vpop.permute.xlu0 %1232 }
  0xee   : > { %v2425_v44 = vpop.f32.mrf.mxu0  ;;  %v2457_v46 = vpop.f32.mrf.mxu1 }
  0xef   : > { %v1237_v47 = vmul.f32 %v2425_v44, %v2706_v43  ;;  %v1269_v48 = vmul.f32 %v2457_v46, %v2706_v43 }
  0xf0   : > { %v775_v49 = vpop.f32.mrf.mxu0  ;;  %v903_v50 = vpop.f32.mrf.mxu1 }
  0xf1   : > { %v1308_v51 = vadd.f32 %v2711_v45, %v1237_v47  ;;  %v1340_v52 = vadd.f32 %v2711_v45, %v1269_v48  ;;  %v1235_v53 = vmul.f32 %v2706_v43, %v775_v49  ;;  %v1267_v54 = vmul.f32 %v2706_v43, %v903_v50 }
  0xf2   : > { %v2426_v55 = vpop.f32.mrf.mxu0  ;;  %v2458_v56 = vpop.f32.mrf.mxu1 }
  0xf3   : > { %vm1372_vm0 = vcmp.ge.f32.partialorder %v1308_v51, 0.0  ;;  %v1436_v57 = vmul.f32 0.2, %v1308_v51  ;;  %vm1404_vm1 = vcmp.ge.f32.partialorder %v1340_v52, 0.0  ;;  %v1468_v58 = vmul.f32 0.2, %v1340_v52 }
  0xf4   : > { %v1306_v59 = vadd.f32 %v2711_v45, %v1235_v53  ;;  %v1338_v60 = vadd.f32 %v2711_v45, %v1267_v54  ;;  %v1238_v61 = vmul.f32 %v2426_v55, %v2706_v43  ;;  %v1270_v62 = vmul.f32 %v2458_v56, %v2706_v43  ;;  %v778_v63 = vpop.f32.mrf.mxu0  ;;  %v906_v0 = vpop.f32.mrf.mxu1 }
  0xf5   : > { %v1500_v1 = vsel %vm1372_vm0, %v1308_v51, %v1436_v57  ;;  %v1532_v2 = vsel %vm1404_vm1, %v1340_v52, %v1468_v58  ;;  %v1236_v3 = vmul.f32 %v2706_v43, %v778_v63  ;;  %v1268_v4 = vmul.f32 %v2706_v43, %v906_v0 }
  0xf6   : > { %vm1370_vm2 = vcmp.ge.f32.partialorder %v1306_v59, 0.0  ;;  %v1434_v5 = vmul.f32 0.2, %v1306_v59  ;;  %vm1402_vm3 = vcmp.ge.f32.partialorder %v1338_v60, 0.0  ;;  %v1466_v6 = vmul.f32 0.2, %v1338_v60  ;;  %v2429_v7 = vpop.f32.mrf.mxu0  ;;  %v2461_v8 = vpop.f32.mrf.mxu1 }
  0xf7   : > { %v1309_v9 = vadd.f32 %v2711_v45, %v1238_v61  ;;  %v1341_v10 = vadd.f32 %v2711_v45, %v1270_v62  ;;  %v1307_v11 = vadd.f32 %v2711_v45, %v1236_v3  ;;  %v1339_v12 = vadd.f32 %v2711_v45, %v1268_v4 }
  0xf8   : > { %v1498_v13 = vsel %vm1370_vm2, %v1306_v59, %v1434_v5  ;;  %v1530_v14 = vsel %vm1402_vm3, %v1338_v60, %v1466_v6  ;;  %v1241_v15 = vmul.f32 %v2429_v7, %v2706_v43  ;;  %v1273_v16 = vmul.f32 %v2461_v8, %v2706_v43  ;;  %v791_v17 = vpop.f32.mrf.mxu0  ;;  %v919_v18 = vpop.f32.mrf.mxu1 }
  0xf9   : > { %vm1373_vm4 = vcmp.ge.f32.partialorder %v1309_v9, 0.0  ;;  %v1437_v19 = vmul.f32 0.2, %v1309_v9  ;;  %vm1405_vm5 = vcmp.ge.f32.partialorder %v1341_v10, 0.0  ;;  %v1469_v20 = vmul.f32 0.2, %v1341_v10 }
  0xfa   : > { %vm1371_vm6 = vcmp.ge.f32.partialorder %v1307_v11, 0.0  ;;  %v1435_v21 = vmul.f32 0.2, %v1307_v11  ;;  %vm1403_vm7 = vcmp.ge.f32.partialorder %v1339_v12, 0.0  ;;  %v1467_v22 = vmul.f32 0.2, %v1339_v12  ;;  %v2430_v23 = vpop.f32.mrf.mxu0  ;;  %v2462_v24 = vpop.f32.mrf.mxu1 }
  0xfb   : > { %v1501_v25 = vsel %vm1373_vm4, %v1309_v9, %v1437_v19  ;;  %v1533_v26 = vsel %vm1405_vm5, %v1341_v10, %v1469_v20  ;;  %v1312_v27 = vadd.f32 %v2711_v45, %v1241_v15  ;;  %v1344_v28 = vadd.f32 %v2711_v45, %v1273_v16 }
  0xfc   : > { %v2184_v29 = vpack.c.bf16 %v1501_v25, %v1500_v1  ;;  %v2264_v30 = vpack.c.bf16 %v1533_v26, %v1532_v2  ;;  %v1499_v31 = vsel %vm1371_vm6, %v1307_v11, %v1435_v21  ;;  %v1531_v32 = vsel %vm1403_vm7, %v1339_v12, %v1467_v22  ;;  %v794_v33 = vpop.f32.mrf.mxu0  ;;  %v922_v34 = vpop.f32.mrf.mxu1 }
  0xfd   : > { %v2179_v35 = vpack.c.bf16 %v1499_v31, %v1498_v13  ;;  %v2259_v36 = vpack.c.bf16 %v1531_v32, %v1530_v14  ;;  %vm1376_vm8 = vcmp.ge.f32.partialorder %v1312_v27, 0.0  ;;  %v1440_v37 = vmul.f32 0.2, %v1312_v27 }
  0xfe   : > { %2336 = vst [vmem:[%s2736_s21 + $0x8] sm:$0xff] %v2184_v29   ;;  %2352 = vst [vmem:[%s2736_s21 + $0x88] sm:$0xff] %v2264_v30   ;;  %vm1408_vm9 = vcmp.ge.f32.partialorder %v1344_v28, 0.0  ;;  %v1472_v38 = vmul.f32 0.2, %v1344_v28  ;;  %v1239_v39 = vmul.f32 %v2706_v43, %v791_v17  ;;  %v1271_v40 = vmul.f32 %v2706_v43, %v919_v18  ;;  %v2433_v41 = vpop.f32.mrf.mxu0  ;;  %v2465_v42 = vpop.f32.mrf.mxu1 }
  0xff   : > { %2180 = vst [vmem:[%s2736_s21] sm:$0xff] %v2179_v35   ;;  %2351 = vst [vmem:[%s2736_s21 + $0x80] sm:$0xff] %v2259_v36   ;;  %v1504_v44 = vsel %vm1376_vm8, %v1312_v27, %v1440_v37  ;;  %v1242_v46 = vmul.f32 %v2430_v23, %v2706_v43  ;;  %v1274_v47 = vmul.f32 %v2462_v24, %v2706_v43 }
 0x100   : > { %v1240_v48 = vmul.f32 %v2706_v43, %v794_v33  ;;  %v1536_v49 = vsel %vm1408_vm9, %v1344_v28, %v1472_v38  ;;  %v1310_v50 = vadd.f32 %v2711_v45, %v1239_v39  ;;  %v1342_v51 = vadd.f32 %v2711_v45, %v1271_v40  ;;  %v807_v53 = vpop.f32.mrf.mxu0  ;;  %v935_v54 = vpop.f32.mrf.mxu1 }
 0x101   : > { %v1272_v52 = vmul.f32 %v2706_v43, %v922_v34  ;;  %v1313_v55 = vadd.f32 %v2711_v45, %v1242_v46  ;;  %v1345_v56 = vadd.f32 %v2711_v45, %v1274_v47  ;;  %v1245_v58 = vmul.f32 %v2433_v41, %v2706_v43 }
 0x102   : > { %v1311_v57 = vadd.f32 %v2711_v45, %v1240_v48  ;;  %vm1374_vm10 = vcmp.ge.f32.partialorder %v1310_v50, 0.0  ;;  %v1438_v59 = vmul.f32 0.2, %v1310_v50  ;;  %vm1406_vm11 = vcmp.ge.f32.partialorder %v1342_v51, 0.0  ;;  %v2434_v61 = vpop.f32.mrf.mxu0  ;;  %v2466_v62 = vpop.f32.mrf.mxu1 }
 0x103   : > { %v1470_v60 = vmul.f32 0.2, %v1342_v51  ;;  %vm1377_vm12 = vcmp.ge.f32.partialorder %v1313_v55, 0.0  ;;  %v1441_v63 = vmul.f32 0.2, %v1313_v55  ;;  %vm1409_vm13 = vcmp.ge.f32.partialorder %v1345_v56, 0.0 }
 0x104   : > { %v1473_v0 = vmul.f32 0.2, %v1345_v56  ;;  %v1502_v1 = vsel %vm1374_vm10, %v1310_v50, %v1438_v59  ;;  %vm1375_vm14 = vcmp.ge.f32.partialorder %v1311_v57, 0.0  ;;  %v1439_v3 = vmul.f32 0.2, %v1311_v57  ;;  %v810_v4 = vpop.f32.mrf.mxu0  ;;  %v938_v5 = vpop.f32.mrf.mxu1 }
 0x105   : > { %v1534_v2 = vsel %vm1406_vm11, %v1342_v51, %v1470_v60  ;;  %v1505_v6 = vsel %vm1377_vm12, %v1313_v55, %v1441_v63  ;;  %v1343_v8 = vadd.f32 %v2711_v45, %v1272_v52  ;;  %v1316_v9 = vadd.f32 %v2711_v45, %v1245_v58 }
 0x106   : > { %v1537_v7 = vsel %vm1409_vm13, %v1345_v56, %v1473_v0  ;;  %v2194_v10 = vpack.c.bf16 %v1505_v6, %v1504_v44  ;;  %v1503_v12 = vsel %vm1375_vm14, %v1311_v57, %v1439_v3  ;;  %v1277_v13 = vmul.f32 %v2465_v42, %v2706_v43  ;;  %v2437_v14 = vpop.f32.mrf.mxu0  ;;  %v2469_v15 = vpop.f32.mrf.mxu1 }
 0x107   : > { %v2274_v11 = vpack.c.bf16 %v1537_v7, %v1536_v49  ;;  %v2189_v16 = vpack.c.bf16 %v1503_v12, %v1502_v1  ;;  %vm1407_vm15 = vcmp.ge.f32.partialorder %v1343_v8, 0.0  ;;  %v1471_v17 = vmul.f32 0.2, %v1343_v8 }
 0x108   : > { %vm1380_vm0 = vcmp.ge.f32.partialorder %v1316_v9, 0.0  ;;  %2338 = vst [vmem:[%s2736_s21 + $0x18] sm:$0xff] %v2194_v10   ;;  %v1444_v18 = vmul.f32 0.2, %v1316_v9  ;;  %v1348_v19 = vadd.f32 %v2711_v45, %v1277_v13  ;;  %v1243_v20 = vmul.f32 %v2706_v43, %v807_v53  ;;  %v823_v22 = vpop.f32.mrf.mxu0  ;;  %v951_v23 = vpop.f32.mrf.mxu1 }
 0x109   : > { %2354 = vst [vmem:[%s2736_s21 + $0x98] sm:$0xff] %v2274_v11   ;;  %v1275_v21 = vmul.f32 %v2706_v43, %v935_v54  ;;  %2337 = vst [vmem:[%s2736_s21 + $0x10] sm:$0xff] %v2189_v16   ;;  %v1535_v24 = vsel %vm1407_vm15, %v1343_v8, %v1471_v17  ;;  %v1246_v25 = vmul.f32 %v2434_v61, %v2706_v43 }
 0x10a   : > { %v1278_v26 = vmul.f32 %v2466_v62, %v2706_v43  ;;  %v1244_v27 = vmul.f32 %v2706_v43, %v810_v4  ;;  %v2269_v28 = vpack.c.bf16 %v1535_v24, %v1534_v2  ;;  %v1508_v29 = vsel %vm1380_vm0, %v1316_v9, %v1444_v18  ;;  %v2438_v31 = vpop.f32.mrf.mxu0  ;;  %v2470_v32 = vpop.f32.mrf.mxu1 }
 0x10b   : > { %vm1412_vm1 = vcmp.ge.f32.partialorder %v1348_v19, 0.0  ;;  %v1476_v30 = vmul.f32 0.2, %v1348_v19  ;;  %v1314_v33 = vadd.f32 %v2711_v45, %v1243_v20  ;;  %v1346_v34 = vadd.f32 %v2711_v45, %v1275_v21 }
 0x10c   : > { %v1317_v35 = vadd.f32 %v2711_v45, %v1246_v25  ;;  %v1349_v36 = vadd.f32 %v2711_v45, %v1278_v26  ;;  %2353 = vst [vmem:[%s2736_s21 + $0x90] sm:$0xff] %v2269_v28   ;;  %v1315_v38 = vadd.f32 %v2711_v45, %v1244_v27  ;;  %v1276_v39 = vmul.f32 %v2706_v43, %v938_v5  ;;  %v826_v41 = vpop.f32.mrf.mxu0  ;;  %v954_v42 = vpop.f32.mrf.mxu1 }
 0x10d   : > { %v1540_v37 = vsel %vm1412_vm1, %v1348_v19, %v1476_v30  ;;  %v1249_v40 = vmul.f32 %v2437_v14, %v2706_v43  ;;  %vm1378_vm2 = vcmp.ge.f32.partialorder %v1314_v33, 0.0  ;;  %v1442_v44 = vmul.f32 0.2, %v1314_v33 }
 0x10e   : > { %vm1410_vm3 = vcmp.ge.f32.partialorder %v1346_v34, 0.0  ;;  %v1474_v46 = vmul.f32 0.2, %v1346_v34  ;;  %vm1381_vm4 = vcmp.ge.f32.partialorder %v1317_v35, 0.0  ;;  %v1445_v47 = vmul.f32 0.2, %v1317_v35  ;;  %v2441_v49 = vpop.f32.mrf.mxu0  ;;  %v2776_v50 = vpop.f32.mrf.mxu1 }
 0x10f   : > { %vm1413_vm5 = vcmp.ge.f32.partialorder %v1349_v36, 0.0  ;;  %v1477_v48 = vmul.f32 0.2, %v1349_v36  ;;  %v1506_v51 = vsel %vm1378_vm2, %v1314_v33, %v1442_v44  ;;  %vm1379_vm6 = vcmp.ge.f32.partialorder %v1315_v38, 0.0 }
 0x110   : > { %v1538_v52 = vsel %vm1410_vm3, %v1346_v34, %v1474_v46  ;;  %v1443_v53 = vmul.f32 0.2, %v1315_v38  ;;  %v1509_v54 = vsel %vm1381_vm4, %v1317_v35, %v1445_v47  ;;  %v1347_v56 = vadd.f32 %v2711_v45, %v1276_v39  ;;  %v2780_v58 = vpop.f32.mrf.mxu0  ;;  %v2782_v59 = vpop.f32.mrf.mxu1 }
 0x111   : > { %v1541_v55 = vsel %vm1413_vm5, %v1349_v36, %v1477_v48  ;;  %v1320_v57 = vadd.f32 %v2711_v45, %v1249_v40  ;;  %v2204_v60 = vpack.c.bf16 %v1509_v54, %v1508_v29  ;;  %v1281_v63 = vmul.f32 %v2469_v15, %v2706_v43 }
 0x112   : > { %v2284_v61 = vpack.c.bf16 %v1541_v55, %v1540_v37  ;;  %v1507_v62 = vsel %vm1379_vm6, %v1315_v38, %v1443_v53  ;;  %vm1411_vm7 = vcmp.ge.f32.partialorder %v1347_v56, 0.0  ;;  %v1475_v1 = vmul.f32 0.2, %v1347_v56  ;;  %v2785_v2 = vpop.f32.mrf.mxu0  ;;  %v2787_v3 = vpop.f32.mrf.mxu1 }
 0x113   : > { %v2199_v0 = vpack.c.bf16 %v1507_v62, %v1506_v51  ;;  %vm1384_vm8 = vcmp.ge.f32.partialorder %v1320_v57, 0.0  ;;  %2340 = vst [vmem:[%s2736_s21 + $0x28] sm:$0xff] %v2204_v60   ;;  %v1448_v4 = vmul.f32 0.2, %v1320_v57  ;;  %v1352_v5 = vadd.f32 %v2711_v45, %v1281_v63 }
 0x114   : > { %2356 = vst [vmem:[%s2736_s21 + $0xa8] sm:$0xff] %v2284_v61   ;;  %v1247_v6 = vmul.f32 %v2706_v43, %v823_v22  ;;  %v1279_v7 = vmul.f32 %v2706_v43, %v951_v23  ;;  %v1539_v8 = vsel %vm1411_vm7, %v1347_v56, %v1475_v1  ;;  %v1250_v9 = vmul.f32 %v2438_v31, %v2706_v43  ;;  %v842_v12 = vpop.f32.mrf.mxu0  ;;  %v2798_v13 = vpop.f32.mrf.mxu1 }
 0x115   : > { %2339 = vst [vmem:[%s2736_s21 + $0x20] sm:$0xff] %v2199_v0   ;;  %v1282_v10 = vmul.f32 %v2470_v32, %v2706_v43  ;;  %v1248_v11 = vmul.f32 %v2706_v43, %v826_v41  ;;  %v2279_v14 = vpack.c.bf16 %v1539_v8, %v1538_v52  ;;  %v1512_v15 = vsel %vm1384_vm8, %v1320_v57, %v1448_v4 }
 0x116   : > { %vm1416_vm9 = vcmp.ge.f32.partialorder %v1352_v5, 0.0  ;;  %v1480_v16 = vmul.f32 0.2, %v1352_v5  ;;  %v1318_v17 = vadd.f32 %v2711_v45, %v1247_v6  ;;  %v1350_v18 = vadd.f32 %v2711_v45, %v1279_v7  ;;  %v2445_v21 = vpop.f32.mrf.mxu0  ;;  %v2805_v22 = vpop.f32.mrf.mxu1 }
 0x117   : > { %v1321_v19 = vadd.f32 %v2711_v45, %v1250_v9  ;;  %v1353_v20 = vadd.f32 %v2711_v45, %v1282_v10  ;;  %2355 = vst [vmem:[%s2736_s21 + $0xa0] sm:$0xff] %v2279_v14   ;;  %v1319_v24 = vadd.f32 %v2711_v45, %v1248_v11  ;;  %v1280_v25 = vmul.f32 %v2706_v43, %v954_v42 }
 0x118   : > { %v1544_v23 = vsel %vm1416_vm9, %v1352_v5, %v1480_v16  ;;  %v1253_v26 = vmul.f32 %v2441_v49, %v2706_v43  ;;  %vm1382_vm10 = vcmp.ge.f32.partialorder %v1318_v17, 0.0  ;;  %v1446_v27 = vmul.f32 0.2, %v1318_v17  ;;  %v2811_v29 = vpop.f32.mrf.mxu0  ;;  %v2813_v30 = vpop.f32.mrf.mxu1 }
 0x119   : > { %vm1414_vm11 = vcmp.ge.f32.partialorder %v1350_v18, 0.0  ;;  %v1478_v28 = vmul.f32 0.2, %v1350_v18  ;;  %vm1385_vm12 = vcmp.ge.f32.partialorder %v1321_v19, 0.0  ;;  %v1449_v31 = vmul.f32 0.2, %v1321_v19 }
 0x11a   : > { %vm1417_vm13 = vcmp.ge.f32.partialorder %v1353_v20, 0.0  ;;  %v1481_v32 = vmul.f32 0.2, %v1353_v20  ;;  %v1510_v33 = vsel %vm1382_vm10, %v1318_v17, %v1446_v27  ;;  %vm1383_vm14 = vcmp.ge.f32.partialorder %v1319_v24, 0.0  ;;  %v2815_v36 = vpop.f32.mrf.mxu0  ;;  %v2821_v47 = vpop.f32.mrf.mxu1 }
 0x11b   : > { %v1542_v34 = vsel %vm1414_vm11, %v1350_v18, %v1478_v28  ;;  %v1447_v35 = vmul.f32 0.2, %v1319_v24  ;;  %v1513_v37 = vsel %vm1385_vm12, %v1321_v19, %v1449_v31  ;;  %v1351_v39 = vadd.f32 %v2711_v45, %v1280_v25 }
 0x11c   : > { %v1545_v38 = vsel %vm1417_vm13, %v1353_v20, %v1481_v32  ;;  %v1324_v40 = vadd.f32 %v2711_v45, %v1253_v26  ;;  %v2214_v41 = vpack.c.bf16 %v1513_v37, %v1512_v15  ;;  %v1285_v46 = vmul.f32 %v2776_v50, %v2706_v43  ;;  %v2823_v51 = vpop.f32.mrf.mxu0  ;;  %v986_v0 = vpop.f32.mrf.mxu1 }
 0x11d   : > { %v2294_v42 = vpack.c.bf16 %v1545_v38, %v1544_v23  ;;  %v1511_v44 = vsel %vm1383_vm14, %v1319_v24, %v1447_v35  ;;  %vm1415_vm15 = vcmp.ge.f32.partialorder %v1351_v39, 0.0  ;;  %v1479_v49 = vmul.f32 0.2, %v1351_v39 }
 0x11e   : > { %v2209_v48 = vpack.c.bf16 %v1511_v44, %v1510_v33  ;;  %vm1388_vm0 = vcmp.ge.f32.partialorder %v1324_v40, 0.0  ;;  %2342 = vst [vmem:[%s2736_s21 + $0x38] sm:$0xff] %v2214_v41   ;;  %v1452_v52 = vmul.f32 0.2, %v1324_v40  ;;  %v1356_v53 = vadd.f32 %v2711_v45, %v1285_v46  ;;  %v2449_v5 = vpop.f32.mrf.mxu0 }
 0x11f   : > { %2358 = vst [vmem:[%s2736_s21 + $0xb8] sm:$0xff] %v2294_v42   ;;  %v1251_v54 = vmul.f32 %v2706_v43, %v2780_v58  ;;  %v1283_v55 = vmul.f32 %v2706_v43, %v2782_v59  ;;  %v1543_v50 = vsel %vm1415_vm15, %v1351_v39, %v1479_v49  ;;  %v1254_v56 = vmul.f32 %v2785_v2, %v2706_v43 }
 0x120   : > { %2341 = vst [vmem:[%s2736_s21 + $0x30] sm:$0xff] %v2209_v48   ;;  %v1286_v57 = vmul.f32 %v2787_v3, %v2706_v43  ;;  %v1252_v60 = vmul.f32 %v2706_v43, %v842_v12  ;;  %v2289_v61 = vpack.c.bf16 %v1543_v50, %v1542_v34  ;;  %v1516_v62 = vsel %vm1388_vm0, %v1324_v40, %v1452_v52  ;;  %v2847_v12 = vpop.f32.mrf.mxu1  ;;  %v2849_v17 = vpop.f32.mrf.mxu0 }
 0x121   : > { %vm1420_vm1 = vcmp.ge.f32.partialorder %v1356_v53, 0.0  ;;  %v1484_v63 = vmul.f32 0.2, %v1356_v53  ;;  %v1322_v58 = vadd.f32 %v2711_v45, %v1251_v54  ;;  %v1354_v59 = vadd.f32 %v2711_v45, %v1283_v55 }
 0x122   : > { %v1325_v1 = vadd.f32 %v2711_v45, %v1254_v56  ;;  %v1357_v4 = vadd.f32 %v2711_v45, %v1286_v57  ;;  %2357 = vst [vmem:[%s2736_s21 + $0xb0] sm:$0xff] %v2289_v61   ;;  %v1323_v3 = vadd.f32 %v2711_v45, %v1252_v60  ;;  %v1284_v6 = vmul.f32 %v2706_v43, %v2798_v13  ;;  %v999_v28 = vpop.f32.mrf.mxu1  ;;  %v2450_v35 = vpop.f32.mrf.mxu0 }
 0x123   : > { %v1548_v2 = vsel %vm1420_vm1, %v1356_v53, %v1484_v63  ;;  %v1257_v7 = vmul.f32 %v2445_v21, %v2706_v43  ;;  %vm1386_vm2 = vcmp.ge.f32.partialorder %v1322_v58, 0.0  ;;  %v1450_v8 = vmul.f32 0.2, %v1322_v58 }
 0x124   : > { %vm1418_vm3 = vcmp.ge.f32.partialorder %v1354_v59, 0.0  ;;  %v1482_v9 = vmul.f32 0.2, %v1354_v59  ;;  %vm1389_vm4 = vcmp.ge.f32.partialorder %v1325_v1, 0.0  ;;  %v1453_v10 = vmul.f32 0.2, %v1325_v1  ;;  %v2482_v48 = vpop.f32.mrf.mxu1  ;;  %v874_v52 = vpop.f32.mrf.mxu0 }
 0x125   : > { %vm1421_vm5 = vcmp.ge.f32.partialorder %v1357_v4, 0.0  ;;  %v1485_v11 = vmul.f32 0.2, %v1357_v4  ;;  %v1514_v14 = vsel %vm1386_vm2, %v1322_v58, %v1450_v8  ;;  %vm1387_vm6 = vcmp.ge.f32.partialorder %v1323_v3, 0.0 }
 0x126   : > { %v1546_v15 = vsel %vm1418_vm3, %v1354_v59, %v1482_v9  ;;  %v1451_v16 = vmul.f32 0.2, %v1323_v3  ;;  %v1517_v13 = vsel %vm1389_vm4, %v1325_v1, %v1453_v10  ;;  %v1355_v19 = vadd.f32 %v2711_v45, %v1284_v6  ;;  %v1002_v61 = vpop.f32.mrf.mxu1  ;;  %v2453_v59 = vpop.f32.mrf.mxu0 }
 0x127   : > { %v1549_v18 = vsel %vm1421_vm5, %v1357_v4, %v1485_v11  ;;  %v1328_v20 = vadd.f32 %v2711_v45, %v1257_v7  ;;  %v2224_v21 = vpack.c.bf16 %v1517_v13, %v1516_v62  ;;  %v1289_v25 = vmul.f32 %v2805_v22, %v2706_v43 }
 0x128   : > { %v2304_v23 = vpack.c.bf16 %v1549_v18, %v1548_v2  ;;  %v1515_v24 = vsel %vm1387_vm6, %v1323_v3, %v1451_v16  ;;  %vm1419_vm7 = vcmp.ge.f32.partialorder %v1355_v19, 0.0  ;;  %v1483_v27 = vmul.f32 0.2, %v1355_v19  ;;  %v2485_v11 = vpop.f32.mrf.mxu1  ;;  %v887_v13 = vpop.f32.mrf.mxu0 }
 0x129   : > { %v2219_v26 = vpack.c.bf16 %v1515_v24, %v1514_v14  ;;  %vm1392_vm8 = vcmp.ge.f32.partialorder %v1328_v20, 0.0  ;;  %2344 = vst [vmem:[%s2736_s21 + $0x48] sm:$0xff] %v2224_v21   ;;  %v1456_v31 = vmul.f32 0.2, %v1328_v20  ;;  %v1360_v32 = vadd.f32 %v2711_v45, %v1289_v25 }
 0x12a   : > { %2360 = vst [vmem:[%s2736_s21 + $0xc8] sm:$0xff] %v2304_v23   ;;  %v1255_v33 = vmul.f32 %v2706_v43, %v2811_v29  ;;  %v1287_v34 = vmul.f32 %v2706_v43, %v2813_v30  ;;  %v1547_v22 = vsel %vm1419_vm7, %v1355_v19, %v1483_v27  ;;  %v1258_v37 = vmul.f32 %v2815_v36, %v2706_v43 }
 0x12b   : > { %2343 = vst [vmem:[%s2736_s21 + $0x40] sm:$0xff] %v2219_v26   ;;  %v1290_v38 = vmul.f32 %v2821_v47, %v2706_v43  ;;  %v1256_v39 = vmul.f32 %v2706_v43, %v2823_v51  ;;  %v2299_v40 = vpack.c.bf16 %v1547_v22, %v1546_v15  ;;  %v1520_v41 = vsel %vm1392_vm8, %v1328_v20, %v1456_v31 }
 0x12c   : > { %vm1424_vm9 = vcmp.ge.f32.partialorder %v1360_v32, 0.0  ;;  %v1488_v29 = vmul.f32 0.2, %v1360_v32  ;;  %v1326_v42 = vadd.f32 %v2711_v45, %v1255_v33  ;;  %v1358_v30 = vadd.f32 %v2711_v45, %v1287_v34  ;;  %v2454_v34 = vpop.f32.mrf.mxu0 }
 0x12d   : > { %v1329_v44 = vadd.f32 %v2711_v45, %v1258_v37  ;;  %v1361_v46 = vadd.f32 %v2711_v45, %v1290_v38  ;;  %2359 = vst [vmem:[%s2736_s21 + $0xc0] sm:$0xff] %v2299_v40   ;;  %v1327_v47 = vadd.f32 %v2711_v45, %v1256_v39  ;;  %v1288_v49 = vmul.f32 %v2706_v43, %v986_v0 }
 0x12e   : > { %v1552_v36 = vsel %vm1424_vm9, %v1360_v32, %v1488_v29  ;;  %v1261_v51 = vmul.f32 %v2449_v5, %v2706_v43  ;;  %vm1390_vm10 = vcmp.ge.f32.partialorder %v1326_v42, 0.0  ;;  %v1454_v53 = vmul.f32 0.2, %v1326_v42 }
 0x12f   : > { %vm1422_vm11 = vcmp.ge.f32.partialorder %v1358_v30, 0.0  ;;  %v1486_v54 = vmul.f32 0.2, %v1358_v30  ;;  %vm1393_vm12 = vcmp.ge.f32.partialorder %v1329_v44, 0.0  ;;  %v1457_v55 = vmul.f32 0.2, %v1329_v44 }
 0x130   : > { %vm1425_vm13 = vcmp.ge.f32.partialorder %v1361_v46, 0.0  ;;  %v1489_v50 = vmul.f32 0.2, %v1361_v46  ;;  %v1518_v56 = vsel %vm1390_vm10, %v1326_v42, %v1454_v53  ;;  %vm1391_vm14 = vcmp.ge.f32.partialorder %v1327_v47, 0.0 }
 0x131   : > { %v1550_v57 = vsel %vm1422_vm11, %v1358_v30, %v1486_v54  ;;  %v1455_v60 = vmul.f32 0.2, %v1327_v47  ;;  %v1521_v62 = vsel %vm1393_vm12, %v1329_v44, %v1457_v55  ;;  %v1359_v0 = vadd.f32 %v2711_v45, %v1288_v49 }
 0x132   : > { %v1553_v63 = vsel %vm1425_vm13, %v1361_v46, %v1489_v50  ;;  %v1332_v58 = vadd.f32 %v2711_v45, %v1261_v51  ;;  %v2234_v1 = vpack.c.bf16 %v1521_v62, %v1520_v41  ;;  %v1293_v2 = vmul.f32 %v2847_v12, %v2706_v43 }
 0x133   : > { %v2314_v4 = vpack.c.bf16 %v1553_v63, %v1552_v36  ;;  %v1519_v5 = vsel %vm1391_vm14, %v1327_v47, %v1455_v60  ;;  %vm1423_vm15 = vcmp.ge.f32.partialorder %v1359_v0, 0.0  ;;  %v1487_v6 = vmul.f32 0.2, %v1359_v0  ;;  %v890_v36 = vpop.f32.mrf.mxu0 }
 0x134   : > { %v2229_v3 = vpack.c.bf16 %v1519_v5, %v1518_v56  ;;  %vm1396_vm0 = vcmp.ge.f32.partialorder %v1332_v58, 0.0  ;;  %2346 = vst [vmem:[%s2736_s21 + $0x58] sm:$0xff] %v2234_v1   ;;  %v1460_v7 = vmul.f32 0.2, %v1332_v58  ;;  %v1364_v8 = vadd.f32 %v2711_v45, %v1293_v2 }
 0x135   : > { %2362 = vst [vmem:[%s2736_s21 + $0xd8] sm:$0xff] %v2314_v4   ;;  %v1259_v9 = vmul.f32 %v2706_v43, %v2849_v17  ;;  %v1291_v10 = vmul.f32 %v2706_v43, %v999_v28  ;;  %v1551_v14 = vsel %vm1423_vm15, %v1359_v0, %v1487_v6  ;;  %v1262_v12 = vmul.f32 %v2450_v35, %v2706_v43  ;;  %v1015_v28 = vpop.f32.mrf.mxu1 }
 0x136   : > { %2345 = vst [vmem:[%s2736_s21 + $0x50] sm:$0xff] %v2229_v3   ;;  %v1294_v15 = vmul.f32 %v2482_v48, %v2706_v43  ;;  %v1260_v16 = vmul.f32 %v2706_v43, %v874_v52  ;;  %v2309_v18 = vpack.c.bf16 %v1551_v14, %v1550_v57  ;;  %vm1428_vm1 = vcmp.ge.f32.partialorder %v1364_v8, 0.0 }
 0x137   : > { %v1492_v19 = vmul.f32 0.2, %v1364_v8  ;;  %v1330_v20 = vadd.f32 %v2711_v45, %v1259_v9  ;;  %v1362_v17 = vadd.f32 %v2711_v45, %v1291_v10  ;;  %v1333_v21 = vadd.f32 %v2711_v45, %v1262_v12  ;;  %v2486_v42 = vpop.f32.mrf.mxu1 }
 0x138   : > { %v1365_v23 = vadd.f32 %v2711_v45, %v1294_v15  ;;  %2361 = vst [vmem:[%s2736_s21 + $0xd0] sm:$0xff] %v2309_v18   ;;  %v1524_v24 = vsel %vm1396_vm0, %v1332_v58, %v1460_v7  ;;  %v1331_v25 = vadd.f32 %v2711_v45, %v1260_v16  ;;  %v1292_v26 = vmul.f32 %v2706_v43, %v1002_v61 }
 0x139   : > { %v1265_v27 = vmul.f32 %v2453_v59, %v2706_v43  ;;  %v1556_v31 = vsel %vm1428_vm1, %v1364_v8, %v1492_v19  ;;  %vm1394_vm2 = vcmp.ge.f32.partialorder %v1330_v20, 0.0  ;;  %v1458_v32 = vmul.f32 0.2, %v1330_v20  ;;  %v1018_v61 = vpop.f32.mrf.mxu1 }
 0x13a   : > { %v1490_v33 = vmul.f32 0.2, %v1362_v17  ;;  %vm1397_vm3 = vcmp.ge.f32.partialorder %v1333_v21, 0.0  ;;  %v1461_v35 = vmul.f32 0.2, %v1333_v21  ;;  %vm1429_vm4 = vcmp.ge.f32.partialorder %v1365_v23, 0.0 }
 0x13b   : > { %v1493_v22 = vmul.f32 0.2, %v1365_v23  ;;  %v1522_v37 = vsel %vm1394_vm2, %v1330_v20, %v1458_v32  ;;  %vm1426_vm5 = vcmp.ge.f32.partialorder %v1362_v17, 0.0  ;;  %vm1395_vm6 = vcmp.ge.f32.partialorder %v1331_v25, 0.0 }
 0x13c   : > { %v1459_v38 = vmul.f32 0.2, %v1331_v25  ;;  %v1525_v39 = vsel %vm1397_vm3, %v1333_v21, %v1461_v35  ;;  %v1363_v41 = vadd.f32 %v2711_v45, %v1292_v26  ;;  %v1336_v29 = vadd.f32 %v2711_v45, %v1265_v27 }
 0x13d   : > { %v1557_v40 = vsel %vm1429_vm4, %v1365_v23, %v1493_v22  ;;  %v2244_v30 = vpack.c.bf16 %v1525_v39, %v1524_v24  ;;  %v1297_v48 = vmul.f32 %v2485_v11, %v2706_v43  ;;  %v1554_v47 = vsel %vm1426_vm5, %v1362_v17, %v1490_v33 }
 0x13e   : > { %v2324_v44 = vpack.c.bf16 %v1557_v40, %v1556_v31  ;;  %v1523_v46 = vsel %vm1395_vm6, %v1331_v25, %v1459_v38  ;;  %vm1427_vm7 = vcmp.ge.f32.partialorder %v1363_v41, 0.0  ;;  %v1491_v51 = vmul.f32 0.2, %v1363_v41 }
 0x13f   : > { %v2239_v49 = vpack.c.bf16 %v1523_v46, %v1522_v37  ;;  %2348 = vst [vmem:[%s2736_s21 + $0x68] sm:$0xff] %v2244_v30   ;;  %v1464_v52 = vmul.f32 0.2, %v1336_v29  ;;  %v1368_v53 = vadd.f32 %v2711_v45, %v1297_v48  ;;  %v1263_v54 = vmul.f32 %v2706_v43, %v887_v13 }
 0x140   : > { %2364 = vst [vmem:[%s2736_s21 + $0xe8] sm:$0xff] %v2324_v44   ;;  %v1295_v55 = vmul.f32 %v2706_v43, %v1015_v28  ;;  %v1555_v50 = vsel %vm1427_vm7, %v1363_v41, %v1491_v51  ;;  %v1266_v56 = vmul.f32 %v2454_v34, %v2706_v43  ;;  %v1298_v57 = vmul.f32 %v2486_v42, %v2706_v43 }
 0x141   : > { %2347 = vst [vmem:[%s2736_s21 + $0x60] sm:$0xff] %v2239_v49   ;;  %v1264_v60 = vmul.f32 %v2706_v43, %v890_v36  ;;  %v2319_v62 = vpack.c.bf16 %v1555_v50, %v1554_v47  ;;  %vm1400_vm8 = vcmp.ge.f32.partialorder %v1336_v29, 0.0  ;;  %v1496_v63 = vmul.f32 0.2, %v1368_v53 }
 0x142   : > { %v1334_v0 = vadd.f32 %v2711_v45, %v1263_v54  ;;  %v1366_v58 = vadd.f32 %v2711_v45, %v1295_v55  ;;  %v1337_v59 = vadd.f32 %v2711_v45, %v1266_v56  ;;  %v1369_v1 = vadd.f32 %v2711_v45, %v1298_v57 }
 0x143   : > { %2363 = vst [vmem:[%s2736_s21 + $0xe0] sm:$0xff] %v2319_v62   ;;  %vm1432_vm9 = vcmp.ge.f32.partialorder %v1368_v53, 0.0  ;;  %v1335_v4 = vadd.f32 %v2711_v45, %v1264_v60  ;;  %v1296_v5 = vmul.f32 %v2706_v43, %v1018_v61  ;;  %v1528_v2 = vsel %vm1400_vm8, %v1336_v29, %v1464_v52 }
 0x144   : > { %vm1398_vm10 = vcmp.ge.f32.partialorder %v1334_v0, 0.0  ;;  %v1462_v3 = vmul.f32 0.2, %v1334_v0  ;;  %vm1401_vm11 = vcmp.ge.f32.partialorder %v1337_v59, 0.0  ;;  %v1465_v6 = vmul.f32 0.2, %v1337_v59 }
 0x145   : > { %vm1433_vm12 = vcmp.ge.f32.partialorder %v1369_v1, 0.0  ;;  %v1497_v7 = vmul.f32 0.2, %v1369_v1  ;;  %v1560_v8 = vsel %vm1432_vm9, %v1368_v53, %v1496_v63  ;;  %vm1430_vm13 = vcmp.ge.f32.partialorder %v1366_v58, 0.0 }
 0x146   : > { %vm1399_vm14 = vcmp.ge.f32.partialorder %v1335_v4, 0.0  ;;  %v1463_v9 = vmul.f32 0.2, %v1335_v4  ;;  %v1494_v10 = vmul.f32 0.2, %v1366_v58  ;;  %v1529_v11 = vsel %vm1401_vm11, %v1337_v59, %v1465_v6 }
 0x147   : > { %v1561_v14 = vsel %vm1433_vm12, %v1369_v1, %v1497_v7  ;;  %v1367_v43 = vadd.f32 %v2711_v45, %v1296_v5  ;;  %v1526_v12 = vsel %vm1398_vm10, %v1334_v0, %v1462_v3  ;;  %v2254_v15 = vpack.c.bf16 %v1529_v11, %v1528_v2 }
 0x148   : > { %v2334_v16 = vpack.c.bf16 %v1561_v14, %v1560_v8  ;;  %v1527_v13 = vsel %vm1399_vm14, %v1335_v4, %v1463_v9  ;;  %v1558_v20 = vsel %vm1430_vm13, %v1366_v58, %v1494_v10 }
 0x149   : > { %v2249_v18 = vpack.c.bf16 %v1527_v13, %v1526_v12  ;;  %vm1431_vm15 = vcmp.ge.f32.partialorder %v1367_v43, 0.0  ;;  %v1495_v19 = vmul.f32 0.2, %v1367_v43  ;;  %2350 = vst [vmem:[%s2736_s21 + $0x78] sm:$0xff] %v2254_v15  }
 0x14a   : > { %2366 = vst [vmem:[%s2736_s21 + $0xf8] sm:$0xff] %v2334_v16  }
 0x14b   : > { %2349 = vst [vmem:[%s2736_s21 + $0x70] sm:$0xff] %v2249_v18   ;;  %v1559_v17 = vsel %vm1431_vm15, %v1367_v43, %v1495_v19 }
 0x14c   : > { %v2329_v21 = vpack.c.bf16 %v1559_v17, %v1558_v20 }
 0x14e   : > { %2365 = vst [vmem:[%s2736_s21 + $0xf0] sm:$0xff] %v2329_v21  }
 0x14f PF: > { %s16_s19 = sadd.s32 1, %s2591_s19   ;;  %s2939_s17 = smov %s2587_s18 }
 0x150   : > { %p13_p5 = scmp.ge.s32.totalorder %s16_s19, 6   ;;  %s2940_s18 = smov %s2942_s3 }
 0x152   :  { %15 = sbr.rel (!%p13_p5) target bundleno = 3 (0x3), region = 80 }

// kernel: discriminator_forward.5
= control target key start
LH: loop header
LB: loop body
LE: loop exit
PB: predicated region body
PF: predicated region fallthrough
CT: control target
= control target key end

     0   :  { %v3318_v0 = vmov 0   ;;  %s4096_s1 = inlined_call_operand.vmem [shape: bf16[512,128], index: 1, kind: input, shape index: {}]   ;;  %s4097_s3 = inlined_call_operand.<no memory space> [shape: f32[1,1], index: 3, kind: input, shape index: {}]   ;;  %s4098_s0 = inlined_call_operand.vmem [shape: bf16[512,512], index: 0, kind: input, shape index: {}]   ;;  %s4099_s2 = inlined_call_operand.vmem [shape: f32[1,128], index: 2, kind: input, shape index: {}]   ;;  %s4100_s4 = inlined_call_operand.vmem [shape: bf16[512,128], index: 4, kind: output, shape index: {}]  }
   0x1   :  { %1176 = vmatprep.subr.bf16.mxu0 %v3318_v0  ;;  %1465 = vmatprep.subr.bf16.mxu1 %v3318_v0  ;;  %v3093_v1 = vld [vmem:[%s4096_s1 + $0x38] sm:$0xff]   ;;  %v9_v2 = vstv %s4097_s3  ;;  %v3095_v4 = vld [vmem:[%s4096_s1 + $0x30] sm:$0xff]   ;;  %v3097_v6 = vld [vmem:[%s4096_s1 + $0x28] sm:$0xff]  }
   0x2   :  { %v3094_v3 = vld [vmem:[%s4096_s1 + $0xb8] sm:$0xff]   ;;  %3092 = vset.pattern.permute.xlu0 %v3318_v0  ;;  %10 = vst [vmem:[#allocation3] sm:$0x1] %v9_v2  ;;  %1177 = vmatpush1.bf16.msra.mxu0 %v3093_v1  ;;  %v3096_v5 = vld [vmem:[%s4096_s1 + $0xb0] sm:$0xff]   ;;  %v3098_v7 = vld [vmem:[%s4096_s1 + $0xa8] sm:$0xff]  }
   0x3   :  { %1466 = vmatpush1.bf16.msra.mxu1 %v3094_v3  ;;  %1178 = vmatprep.subr.bf16.mxu0 %v3318_v0  ;;  %v3099_v8 = vld [vmem:[%s4096_s1 + $0x20] sm:$0xff]   ;;  %v3101_v10 = vld [vmem:[%s4096_s1 + $0x18] sm:$0xff]   ;;  %v3103_v12 = vld [vmem:[%s4096_s1 + $0x10] sm:$0xff]  }
   0x4   :  { %1467 = vmatprep.subr.bf16.mxu1 %v3318_v0  ;;  %v3100_v9 = vld [vmem:[%s4096_s1 + $0xa0] sm:$0xff]   ;;  %v3102_v11 = vld [vmem:[%s4096_s1 + $0x98] sm:$0xff]   ;;  %v3104_v13 = vld [vmem:[%s4096_s1 + $0x90] sm:$0xff]  }
   0x5   :  { %v3105_v14 = vld [vmem:[%s4096_s1 + $0x8] sm:$0xff]   ;;  %v3107_v16 = vld [vmem:[%s4096_s1] sm:$0xff]   ;;  %v3109_v18 = vld [vmem:[%s4096_s1 + $0x78] sm:$0xff]  }
   0x6   :  { %1179 = vmatpush1.bf16.msra.mxu0 %v3095_v4  ;;  %v3106_v15 = vld [vmem:[%s4096_s1 + $0x88] sm:$0xff]   ;;  %v3108_v17 = vld [vmem:[%s4096_s1 + $0x80] sm:$0xff]   ;;  %v3110_v19 = vld [vmem:[%s4096_s1 + $0xf8] sm:$0xff]  }
   0x7   :  { %1468 = vmatpush1.bf16.msra.mxu1 %v3096_v5  ;;  %1180 = vmatprep.subr.bf16.mxu0 %v3318_v0  ;;  %v3127_v20 = vld [vmem:[%s4098_s0 + $0x4] ss:$16 sps:$4 sm:$0xff]   ;;  %v3130_v22 = vld [vmem:[%s4098_s0 + $0xc] ss:$16 sps:$4 sm:$0xff]   ;;  %v3125_v37 = vld [vmem:[%s4098_s0] ss:$16 sps:$4 sm:$0xff]  }
   0x8   :  { %1469 = vmatprep.subr.bf16.mxu1 %v3318_v0  ;;  %v3111_v21 = vld [vmem:[%s4096_s1 + $0x70] sm:$0xff]   ;;  %1208 = vmatprep.mubr.bf16.mxu0 %v3127_v20  ;;  %v3113_v24 = vld [vmem:[%s4096_s1 + $0x68] sm:$0xff]   ;;  %v3115_v26 = vld [vmem:[%s4096_s1 + $0x60] sm:$0xff]  }
   0x9   :  { %v3112_v23 = vld [vmem:[%s4096_s1 + $0xf0] sm:$0xff]   ;;  %1497 = vmatprep.mubr.bf16.mxu1 %v3130_v22  ;;  %v3114_v25 = vld [vmem:[%s4096_s1 + $0xe8] sm:$0xff]   ;;  %v3116_v27 = vld [vmem:[%s4096_s1 + $0xe0] sm:$0xff]  }
   0xa   :  { %1181 = vmatpush1.bf16.msra.mxu0 %v3097_v6  ;;  %v3117_v28 = vld [vmem:[%s4096_s1 + $0x58] sm:$0xff]   ;;  %v3119_v30 = vld [vmem:[%s4096_s1 + $0x50] sm:$0xff]   ;;  %v3121_v32 = vld [vmem:[%s4096_s1 + $0x48] sm:$0xff]  }
   0xb   :  { %1470 = vmatpush1.bf16.msra.mxu1 %v3098_v7  ;;  %1182 = vmatprep.subr.bf16.mxu0 %v3318_v0  ;;  %v3118_v29 = vld [vmem:[%s4096_s1 + $0xd8] sm:$0xff]   ;;  %v3120_v31 = vld [vmem:[%s4096_s1 + $0xd0] sm:$0xff]   ;;  %v3122_v33 = vld [vmem:[%s4096_s1 + $0xc8] sm:$0xff]  }
   0xc   :  { %1471 = vmatprep.subr.bf16.mxu1 %v3318_v0  ;;  %v2770_v34 = vld [vmem:[#allocation3] ss:$0 sm:$0xff]  ;;  %v3128_v38 = vld [vmem:[%s4098_s0 + $0x8] ss:$16 sps:$4 sm:$0xff]   ;;  %v3131_v39 = vld [vmem:[%s4098_s0 + $0x24] ss:$16 sps:$4 sm:$0xff]  }
   0xd   :  { %1956 = vperm.xlu0 %3092, %v2770_v34   ;;  %v3123_v35 = vld [vmem:[%s4096_s1 + $0x40] sm:$0xff]   ;;  %v3133_v40 = vld [vmem:[%s4098_s0 + $0x2c] ss:$16 sps:$4 sm:$0xff]   ;;  %v3136_v42 = vld [vmem:[%s4098_s0 + $0x28] ss:$16 sps:$4 sm:$0xff]  }
   0xe   :  { %1183 = vmatpush1.bf16.msra.mxu0 %v3099_v8  ;;  %v3124_v36 = vld [vmem:[%s4096_s1 + $0xc0] sm:$0xff]   ;;  %v3139_v44 = vld [vmem:[%s4098_s0 + $0x4c] ss:$16 sps:$4 sm:$0xff]   ;;  %v3142_v46 = vld [vmem:[%s4098_s0 + $0x48] ss:$16 sps:$4 sm:$0xff]  }
   0xf   :  { %1472 = vmatpush1.bf16.msra.mxu1 %v3100_v9  ;;  %1184 = vmatprep.subr.bf16.mxu0 %v3318_v0  ;;  %v3135_v41 = vld [vmem:[%s4098_s0 + $0x20] ss:$16 sps:$4 sm:$0xff]   ;;  %v3137_v43 = vld [vmem:[%s4098_s0 + $0x44] ss:$16 sps:$4 sm:$0xff]   ;;  %v3145_v48 = vld [vmem:[%s4098_s0 + $0x6c] ss:$16 sps:$4 sm:$0xff]  }
  0x10   :  { %1473 = vmatprep.subr.bf16.mxu1 %v3318_v0  ;;  %v3141_v45 = vld [vmem:[%s4098_s0 + $0x40] ss:$16 sps:$4 sm:$0xff]   ;;  %v3143_v47 = vld [vmem:[%s4098_s0 + $0x64] ss:$16 sps:$4 sm:$0xff]   ;;  %v3148_v50 = vld [vmem:[%s4098_s0 + $0x68] ss:$16 sps:$4 sm:$0xff]  }
  0x11   :  { %v3147_v49 = vld [vmem:[%s4098_s0 + $0x60] ss:$16 sps:$4 sm:$0xff]   ;;  %v3149_v51 = vld [vmem:[%s4098_s0 + $0x84] ss:$16 sps:$4 sm:$0xff]   ;;  %v3151_v52 = vld [vmem:[%s4098_s0 + $0x8c] ss:$16 sps:$4 sm:$0xff]  }
  0x12   :  { %1185 = vmatpush1.bf16.msra.mxu0 %v3101_v10  ;;  %v3153_v53 = vld [vmem:[%s4098_s0 + $0x80] ss:$16 sps:$4 sm:$0xff]   ;;  %v3154_v54 = vld [vmem:[%s4098_s0 + $0x88] ss:$16 sps:$4 sm:$0xff]   ;;  %v3155_v55 = vld [vmem:[%s4098_s0 + $0xa4] ss:$16 sps:$4 sm:$0xff]  }
  0x13   :  { %1474 = vmatpush1.bf16.msra.mxu1 %v3102_v11  ;;  %1186 = vmatprep.subr.bf16.mxu0 %v3318_v0  ;;  %v3157_v56 = vld [vmem:[%s4098_s0 + $0xac] ss:$16 sps:$4 sm:$0xff]   ;;  %v3159_v57 = vld [vmem:[%s4098_s0 + $0xa0] ss:$16 sps:$4 sm:$0xff]   ;;  %v3160_v58 = vld [vmem:[%s4098_s0 + $0xa8] ss:$16 sps:$4 sm:$0xff]  }
  0x14   :  { %1475 = vmatprep.subr.bf16.mxu1 %v3318_v0  ;;  %v3161_v59 = vld [vmem:[%s4098_s0 + $0xc4] ss:$16 sps:$4 sm:$0xff]   ;;  %v3163_v60 = vld [vmem:[%s4098_s0 + $0xcc] ss:$16 sps:$4 sm:$0xff]   ;;  %v3165_v61 = vld [vmem:[%s4098_s0 + $0xc0] ss:$16 sps:$4 sm:$0xff]  }
  0x15   :  { %v3166_v62 = vld [vmem:[%s4098_s0 + $0xc8] ss:$16 sps:$4 sm:$0xff]   ;;  %v3167_v63 = vld [vmem:[%s4098_s0 + $0xe4] ss:$16 sps:$4 sm:$0xff]   ;;  %v3171_v1 = vld [vmem:[%s4098_s0 + $0xe0] ss:$16 sps:$4 sm:$0xff]  }
  0x16   :  { %1187 = vmatpush1.bf16.msra.mxu0 %v3103_v12  ;;  %v3172_v2 = vld [vmem:[%s4098_s0 + $0xe8] ss:$16 sps:$4 sm:$0xff]   ;;  %v3173_v3 = vld [vmem:[%s4098_s0 + $0x104] ss:$16 sps:$4 sm:$0xff]   ;;  %v3175_v4 = vld [vmem:[%s4098_s0 + $0x10c] ss:$16 sps:$4 sm:$0xff]  }
  0x17   :  { %1476 = vmatpush1.bf16.msra.mxu1 %v3104_v13  ;;  %1188 = vmatprep.subr.bf16.mxu0 %v3318_v0  ;;  %v3177_v5 = vld [vmem:[%s4098_s0 + $0x100] ss:$16 sps:$4 sm:$0xff]   ;;  %v3178_v6 = vld [vmem:[%s4098_s0 + $0x108] ss:$16 sps:$4 sm:$0xff]   ;;  %v3179_v7 = vld [vmem:[%s4098_s0 + $0x124] ss:$16 sps:$4 sm:$0xff]  }
  0x18   :  { %1477 = vmatprep.subr.bf16.mxu1 %v3318_v0  ;;  %v3181_v8 = vld [vmem:[%s4098_s0 + $0x12c] ss:$16 sps:$4 sm:$0xff]   ;;  %v3183_v9 = vld [vmem:[%s4098_s0 + $0x120] ss:$16 sps:$4 sm:$0xff]   ;;  %v3184_v10 = vld [vmem:[%s4098_s0 + $0x128] ss:$16 sps:$4 sm:$0xff]  }
  0x19   :  { %v3185_v11 = vld [vmem:[%s4098_s0 + $0x144] ss:$16 sps:$4 sm:$0xff]   ;;  %v3187_v12 = vld [vmem:[%s4098_s0 + $0x14c] ss:$16 sps:$4 sm:$0xff]   ;;  %v3189_v13 = vld [vmem:[%s4098_s0 + $0x140] ss:$16 sps:$4 sm:$0xff]  }
  0x1a   :  { %1189 = vmatpush1.bf16.msra.mxu0 %v3105_v14  ;;  %v3190_v14 = vld [vmem:[%s4098_s0 + $0x148] ss:$16 sps:$4 sm:$0xff]   ;;  %v3199_v20 = vld [vmem:[%s4098_s0 + $0x18c] ss:$16 sps:$4 sm:$0xff]  }
  0x1b   :  { %1478 = vmatpush1.bf16.msra.mxu1 %v3106_v15  ;;  %1190 = vmatprep.subr.bf16.mxu0 %v3318_v0  ;;  %v3191_v15 = vld [vmem:[%s4098_s0 + $0x164] ss:$16 sps:$4 sm:$0xff]   ;;  %v3202_v22 = vld [vmem:[%s4098_s0 + $0x188] ss:$16 sps:$4 sm:$0xff]  }
  0x1c   :  { %1479 = vmatprep.subr.bf16.mxu1 %v3318_v0  ;;  %v3220_v34 = vld [vmem:[%s4098_s0 + $0x1e8] ss:$16 sps:$4 sm:$0xff]  }
  0x1e   :  { %1191 = vmatpush1.bf16.msra.mxu0 %v3107_v16  ;;  %v3193_v16 = vld [vmem:[%s4098_s0 + $0x16c] ss:$16 sps:$4 sm:$0xff]  }
  0x1f   :  { %1480 = vmatpush1.bf16.msra.mxu1 %v3108_v17  ;;  %1192 = vmatprep.subr.bf16.mxu0 %v3318_v0  ;;  %v3195_v17 = vld [vmem:[%s4098_s0 + $0x160] ss:$16 sps:$4 sm:$0xff]  }
  0x20   :  { %1481 = vmatprep.subr.bf16.mxu1 %v3318_v0 }
  0x22   :  { %1193 = vmatpush2.bf16.msra.mxu0 %v3109_v18  ;;  %v3196_v18 = vld [vmem:[%s4098_s0 + $0x168] ss:$16 sps:$4 sm:$0xff]  }
  0x23   :  { %1482 = vmatpush2.bf16.msra.mxu1 %v3110_v19  ;;  %1194 = vmatprep.subr.bf16.mxu0 %v3318_v0  ;;  %v3197_v19 = vld [vmem:[%s4098_s0 + $0x184] ss:$16 sps:$4 sm:$0xff]  }
  0x24   :  { %1483 = vmatprep.subr.bf16.mxu1 %v3318_v0 }
  0x26   :  { %1195 = vmatpush2.bf16.msra.mxu0 %v3111_v21  ;;  %v3201_v21 = vld [vmem:[%s4098_s0 + $0x180] ss:$16 sps:$4 sm:$0xff]  }
  0x27   :  { %1484 = vmatpush2.bf16.msra.mxu1 %v3112_v23  ;;  %1196 = vmatprep.subr.bf16.mxu0 %v3318_v0  ;;  %v3203_v23 = vld [vmem:[%s4098_s0 + $0x1a4] ss:$16 sps:$4 sm:$0xff]  }
  0x28   :  { %1485 = vmatprep.subr.bf16.mxu1 %v3318_v0 }
  0x2a   :  { %1197 = vmatpush2.bf16.msra.mxu0 %v3113_v24  ;;  %v3205_v24 = vld [vmem:[%s4098_s0 + $0x1ac] ss:$16 sps:$4 sm:$0xff]  }
  0x2b   :  { %1486 = vmatpush2.bf16.msra.mxu1 %v3114_v25  ;;  %1198 = vmatprep.subr.bf16.mxu0 %v3318_v0  ;;  %v3207_v25 = vld [vmem:[%s4098_s0 + $0x1a0] ss:$16 sps:$4 sm:$0xff]  }
  0x2c   :  { %1487 = vmatprep.subr.bf16.mxu1 %v3318_v0 }
  0x2e   :  { %1199 = vmatpush2.bf16.msra.mxu0 %v3115_v26  ;;  %v3208_v26 = vld [vmem:[%s4098_s0 + $0x1a8] ss:$16 sps:$4 sm:$0xff]  }
  0x2f   :  { %1488 = vmatpush2.bf16.msra.mxu1 %v3116_v27  ;;  %1200 = vmatprep.subr.bf16.mxu0 %v3318_v0  ;;  %v3209_v27 = vld [vmem:[%s4098_s0 + $0x1c4] ss:$16 sps:$4 sm:$0xff]  }
  0x30   :  { %1489 = vmatprep.subr.bf16.mxu1 %v3318_v0 }
  0x32   :  { %1201 = vmatpush2.bf16.msra.mxu0 %v3117_v28  ;;  %v3211_v28 = vld [vmem:[%s4098_s0 + $0x1cc] ss:$16 sps:$4 sm:$0xff]  }
  0x33   :  { %1490 = vmatpush2.bf16.msra.mxu1 %v3118_v29  ;;  %1202 = vmatprep.subr.bf16.mxu0 %v3318_v0  ;;  %v3213_v29 = vld [vmem:[%s4098_s0 + $0x1c0] ss:$16 sps:$4 sm:$0xff]  }
  0x34   :  { %1491 = vmatprep.subr.bf16.mxu1 %v3318_v0 }
  0x36   :  { %1203 = vmatpush2.bf16.msra.mxu0 %v3119_v30  ;;  %v3214_v30 = vld [vmem:[%s4098_s0 + $0x1c8] ss:$16 sps:$4 sm:$0xff]  }
  0x37   :  { %1492 = vmatpush2.bf16.msra.mxu1 %v3120_v31  ;;  %1204 = vmatprep.subr.bf16.mxu0 %v3318_v0  ;;  %v3215_v31 = vld [vmem:[%s4098_s0 + $0x1e4] ss:$16 sps:$4 sm:$0xff]  }
  0x38   :  { %1493 = vmatprep.subr.bf16.mxu1 %v3318_v0 }
  0x3a   :  { %1205 = vmatpush2.bf16.msra.mxu0 %v3121_v32  ;;  %v3217_v32 = vld [vmem:[%s4098_s0 + $0x1ec] ss:$16 sps:$4 sm:$0xff]  }
  0x3b   :  { %1494 = vmatpush2.bf16.msra.mxu1 %v3122_v33  ;;  %1206 = vmatprep.subr.bf16.mxu0 %v3318_v0  ;;  %v3219_v33 = vld [vmem:[%s4098_s0 + $0x1e0] ss:$16 sps:$4 sm:$0xff]  }
  0x3c   :  { %1495 = vmatprep.subr.bf16.mxu1 %v3318_v0  ;;  %v3169_v0 = vld [vmem:[%s4098_s0 + $0xec] ss:$16 sps:$4 sm:$0xff]  }
  0x3e   :  { %1207 = vmatpush2.bf16.msra.mxu0 %v3123_v35  ;;  %v3221_v35 = vld [vmem:[%s4098_s0 + $0x204] ss:$16 sps:$4 sm:$0xff]  }
  0x3f   :  { %1496 = vmatpush2.bf16.msra.mxu1 %v3124_v36  ;;  %v3223_v36 = vld [vmem:[%s4098_s0 + $0x20c] ss:$16 sps:$4 sm:$0xff]  }
  0x41   :  { %1209 = vmatmul.mubr.bf16.vlgmr.msra.gmra.mxu0 %v3125_v37  ;;  %v3225_v37 = vld [vmem:[%s4098_s0 + $0x200] ss:$16 sps:$4 sm:$0xff]  }
  0x42   :  { %1498 = vmatmul.mubr.bf16.vlgmr.msra.gmra.mxu1 %v3128_v38  ;;  %1216 = vmatprep.mubr.bf16.mxu0 %v3131_v39  ;;  %v3226_v38 = vld [vmem:[%s4098_s0 + $0x208] ss:$16 sps:$4 sm:$0xff]   ;;  %v3227_v39 = vld [vmem:[%s4098_s0 + $0x224] ss:$16 sps:$4 sm:$0xff]  }
  0x43   :  { %1505 = vmatprep.mubr.bf16.mxu1 %v3133_v40  ;;  %v3229_v40 = vld [vmem:[%s4098_s0 + $0x22c] ss:$16 sps:$4 sm:$0xff]  }
  0x49   :  { %1217 = vmatmul.mubr.bf16.gmra.mxu0 %v3135_v41  ;;  %v3231_v41 = vld [vmem:[%s4098_s0 + $0x220] ss:$16 sps:$4 sm:$0xff]  }
  0x4a   :  { %1506 = vmatmul.mubr.bf16.gmra.mxu1 %v3136_v42  ;;  %1224 = vmatprep.mubr.bf16.mxu0 %v3137_v43  ;;  %v3232_v42 = vld [vmem:[%s4098_s0 + $0x228] ss:$16 sps:$4 sm:$0xff]   ;;  %v3233_v43 = vld [vmem:[%s4098_s0 + $0x244] ss:$16 sps:$4 sm:$0xff]  }
  0x4b   :  { %1513 = vmatprep.mubr.bf16.mxu1 %v3139_v44  ;;  %v3235_v44 = vld [vmem:[%s4098_s0 + $0x24c] ss:$16 sps:$4 sm:$0xff]  }
  0x51   :  { %1225 = vmatmul.mubr.bf16.gmra.mxu0 %v3141_v45  ;;  %v3237_v45 = vld [vmem:[%s4098_s0 + $0x240] ss:$16 sps:$4 sm:$0xff]  }
  0x52   :  { %1514 = vmatmul.mubr.bf16.gmra.mxu1 %v3142_v46  ;;  %1232 = vmatprep.mubr.bf16.mxu0 %v3143_v47  ;;  %v3238_v46 = vld [vmem:[%s4098_s0 + $0x248] ss:$16 sps:$4 sm:$0xff]   ;;  %v3239_v47 = vld [vmem:[%s4098_s0 + $0x264] ss:$16 sps:$4 sm:$0xff]  }
  0x53   :  { %1521 = vmatprep.mubr.bf16.mxu1 %v3145_v48  ;;  %v3241_v48 = vld [vmem:[%s4098_s0 + $0x26c] ss:$16 sps:$4 sm:$0xff]  }
  0x59   :  { %1233 = vmatmul.mubr.bf16.gmra.mxu0 %v3147_v49  ;;  %v3243_v49 = vld [vmem:[%s4098_s0 + $0x260] ss:$16 sps:$4 sm:$0xff]  }
  0x5a   :  { %1522 = vmatmul.mubr.bf16.gmra.mxu1 %v3148_v50  ;;  %1240 = vmatprep.mubr.bf16.mxu0 %v3149_v51  ;;  %v3244_v50 = vld [vmem:[%s4098_s0 + $0x268] ss:$16 sps:$4 sm:$0xff]   ;;  %v3245_v51 = vld [vmem:[%s4098_s0 + $0x284] ss:$16 sps:$4 sm:$0xff]  }
  0x5b   :  { %1529 = vmatprep.mubr.bf16.mxu1 %v3151_v52  ;;  %v3247_v52 = vld [vmem:[%s4098_s0 + $0x28c] ss:$16 sps:$4 sm:$0xff]  }
  0x61   :  { %1241 = vmatmul.mubr.bf16.gmra.mxu0 %v3153_v53  ;;  %v3249_v53 = vld [vmem:[%s4098_s0 + $0x280] ss:$16 sps:$4 sm:$0xff]  }
  0x62   :  { %1530 = vmatmul.mubr.bf16.gmra.mxu1 %v3154_v54  ;;  %1248 = vmatprep.mubr.bf16.mxu0 %v3155_v55  ;;  %v3250_v54 = vld [vmem:[%s4098_s0 + $0x288] ss:$16 sps:$4 sm:$0xff]   ;;  %v3251_v55 = vld [vmem:[%s4098_s0 + $0x2a4] ss:$16 sps:$4 sm:$0xff]  }
  0x63   :  { %1537 = vmatprep.mubr.bf16.mxu1 %v3157_v56  ;;  %v3253_v56 = vld [vmem:[%s4098_s0 + $0x2ac] ss:$16 sps:$4 sm:$0xff]  }
  0x69   :  { %1249 = vmatmul.mubr.bf16.gmra.mxu0 %v3159_v57  ;;  %v3255_v57 = vld [vmem:[%s4098_s0 + $0x2a0] ss:$16 sps:$4 sm:$0xff]  }
  0x6a   :  { %1538 = vmatmul.mubr.bf16.gmra.mxu1 %v3160_v58  ;;  %1256 = vmatprep.mubr.bf16.mxu0 %v3161_v59  ;;  %v3256_v58 = vld [vmem:[%s4098_s0 + $0x2a8] ss:$16 sps:$4 sm:$0xff]   ;;  %v3257_v59 = vld [vmem:[%s4098_s0 + $0x2c4] ss:$16 sps:$4 sm:$0xff]  }
  0x6b   :  { %1545 = vmatprep.mubr.bf16.mxu1 %v3163_v60  ;;  %v3259_v60 = vld [vmem:[%s4098_s0 + $0x2cc] ss:$16 sps:$4 sm:$0xff]  }
  0x71   :  { %1257 = vmatmul.mubr.bf16.gmra.mxu0 %v3165_v61  ;;  %v3261_v61 = vld [vmem:[%s4098_s0 + $0x2c0] ss:$16 sps:$4 sm:$0xff]  }
  0x72   :  { %1546 = vmatmul.mubr.bf16.gmra.mxu1 %v3166_v62  ;;  %1264 = vmatprep.mubr.bf16.mxu0 %v3167_v63  ;;  %v3262_v62 = vld [vmem:[%s4098_s0 + $0x2c8] ss:$16 sps:$4 sm:$0xff]   ;;  %v3263_v63 = vld [vmem:[%s4098_s0 + $0x2e4] ss:$16 sps:$4 sm:$0xff]  }
  0x73   :  { %1553 = vmatprep.mubr.bf16.mxu1 %v3169_v0  ;;  %v3265_v0 = vld [vmem:[%s4098_s0 + $0x2ec] ss:$16 sps:$4 sm:$0xff]  }
  0x79   :  { %1265 = vmatmul.mubr.bf16.gmra.mxu0 %v3171_v1  ;;  %v3267_v1 = vld [vmem:[%s4098_s0 + $0x2e0] ss:$16 sps:$4 sm:$0xff]  }
  0x7a   :  { %1554 = vmatmul.mubr.bf16.gmra.mxu1 %v3172_v2  ;;  %1272 = vmatprep.mubr.bf16.mxu0 %v3173_v3  ;;  %v3268_v2 = vld [vmem:[%s4098_s0 + $0x2e8] ss:$16 sps:$4 sm:$0xff]   ;;  %v3269_v3 = vld [vmem:[%s4098_s0 + $0x304] ss:$16 sps:$4 sm:$0xff]  }
  0x7b   :  { %1561 = vmatprep.mubr.bf16.mxu1 %v3175_v4  ;;  %v3271_v4 = vld [vmem:[%s4098_s0 + $0x30c] ss:$16 sps:$4 sm:$0xff]  }
  0x81   :  { %1273 = vmatmul.mubr.bf16.gmra.mxu0 %v3177_v5  ;;  %v3273_v5 = vld [vmem:[%s4098_s0 + $0x300] ss:$16 sps:$4 sm:$0xff]  }
  0x82   :  { %1562 = vmatmul.mubr.bf16.gmra.mxu1 %v3178_v6  ;;  %1280 = vmatprep.mubr.bf16.mxu0 %v3179_v7  ;;  %v3274_v6 = vld [vmem:[%s4098_s0 + $0x308] ss:$16 sps:$4 sm:$0xff]   ;;  %v3275_v7 = vld [vmem:[%s4098_s0 + $0x324] ss:$16 sps:$4 sm:$0xff]  }
  0x83   :  { %1569 = vmatprep.mubr.bf16.mxu1 %v3181_v8  ;;  %v3277_v8 = vld [vmem:[%s4098_s0 + $0x32c] ss:$16 sps:$4 sm:$0xff]  }
  0x89   :  { %1281 = vmatmul.mubr.bf16.gmra.mxu0 %v3183_v9 }
  0x8a   :  { %1570 = vmatmul.mubr.bf16.gmra.mxu1 %v3184_v10  ;;  %1288 = vmatprep.mubr.bf16.mxu0 %v3185_v11  ;;  %v3782_v11 = vpop.permute.xlu0 %1956 }
  0x8b   :  { %1577 = vmatprep.mubr.bf16.mxu1 %v3187_v12 }
  0x91   :  { %1289 = vmatmul.mubr.bf16.gmra.mxu0 %v3189_v13 }
  0x92   :  { %1578 = vmatmul.mubr.bf16.gmra.mxu1 %v3190_v14  ;;  %1296 = vmatprep.mubr.bf16.mxu0 %v3191_v15  ;;  %v3787_v15 = vld [vmem:[%s4099_s2] ss:$0 sm:$0xff] }
  0x93   :  { %1585 = vmatprep.mubr.bf16.mxu1 %v3193_v16 }
  0x99   :  { %1297 = vmatmul.mubr.bf16.gmra.mxu0 %v3195_v17 }
  0x9a   :  { %1586 = vmatmul.mubr.bf16.gmra.mxu1 %v3196_v18  ;;  %1304 = vmatprep.mubr.bf16.mxu0 %v3197_v19  ;;  %v3279_v18 = vld [vmem:[%s4098_s0 + $0x320] ss:$16 sps:$4 sm:$0xff]  }
  0x9b   :  { %1593 = vmatprep.mubr.bf16.mxu1 %v3199_v20  ;;  %v3280_v20 = vld [vmem:[%s4098_s0 + $0x328] ss:$16 sps:$4 sm:$0xff]  }
  0xa1   :  { %1305 = vmatmul.mubr.bf16.gmra.mxu0 %v3201_v21  ;;  %v3281_v21 = vld [vmem:[%s4098_s0 + $0x344] ss:$16 sps:$4 sm:$0xff]  }
  0xa2   :  { %1594 = vmatmul.mubr.bf16.gmra.mxu1 %v3202_v22  ;;  %1312 = vmatprep.mubr.bf16.mxu0 %v3203_v23 }
  0xa3   :  { %1601 = vmatprep.mubr.bf16.mxu1 %v3205_v24 }
  0xa9   :  { %1313 = vmatmul.mubr.bf16.gmra.mxu0 %v3207_v25  ;;  %v3283_v25 = vld [vmem:[%s4098_s0 + $0x34c] ss:$16 sps:$4 sm:$0xff]  }
  0xaa   :  { %1602 = vmatmul.mubr.bf16.gmra.mxu1 %v3208_v26  ;;  %1320 = vmatprep.mubr.bf16.mxu0 %v3209_v27 }
  0xab   :  { %1609 = vmatprep.mubr.bf16.mxu1 %v3211_v28 }
  0xb1   :  { %1321 = vmatmul.mubr.bf16.gmra.mxu0 %v3213_v29 }
  0xb2   :  { %1610 = vmatmul.mubr.bf16.gmra.mxu1 %v3214_v30  ;;  %1328 = vmatprep.mubr.bf16.mxu0 %v3215_v31 }
  0xb3   :  { %1617 = vmatprep.mubr.bf16.mxu1 %v3217_v32 }
  0xb9   :  { %1329 = vmatmul.mubr.bf16.gmra.mxu0 %v3219_v33 }
  0xba   :  { %1618 = vmatmul.mubr.bf16.gmra.mxu1 %v3220_v34  ;;  %1336 = vmatprep.mubr.bf16.mxu0 %v3221_v35 }
  0xbb   :  { %1625 = vmatprep.mubr.bf16.mxu1 %v3223_v36 }
  0xc1   :  { %1337 = vmatmul.mubr.bf16.gmra.mxu0 %v3225_v37 }
  0xc2   :  { %1626 = vmatmul.mubr.bf16.gmra.mxu1 %v3226_v38  ;;  %1344 = vmatprep.mubr.bf16.mxu0 %v3227_v39  ;;  %v3285_v38 = vld [vmem:[%s4098_s0 + $0x340] ss:$16 sps:$4 sm:$0xff]  }
  0xc3   :  { %1633 = vmatprep.mubr.bf16.mxu1 %v3229_v40  ;;  %v3286_v40 = vld [vmem:[%s4098_s0 + $0x348] ss:$16 sps:$4 sm:$0xff]  }
  0xc9   :  { %1345 = vmatmul.mubr.bf16.gmra.mxu0 %v3231_v41  ;;  %v3287_v41 = vld [vmem:[%s4098_s0 + $0x364] ss:$16 sps:$4 sm:$0xff]  }
  0xca   :  { %1634 = vmatmul.mubr.bf16.gmra.mxu1 %v3232_v42  ;;  %1352 = vmatprep.mubr.bf16.mxu0 %v3233_v43 }
  0xcb   :  { %1641 = vmatprep.mubr.bf16.mxu1 %v3235_v44 }
  0xd1   :  { %1353 = vmatmul.mubr.bf16.gmra.mxu0 %v3237_v45 }
  0xd2   :  { %1642 = vmatmul.mubr.bf16.gmra.mxu1 %v3238_v46  ;;  %1360 = vmatprep.mubr.bf16.mxu0 %v3239_v47  ;;  %v3289_v47 = vld [vmem:[%s4098_s0 + $0x36c] ss:$16 sps:$4 sm:$0xff]  }
  0xd3   :  { %1649 = vmatprep.mubr.bf16.mxu1 %v3241_v48 }
  0xd9   :  { %1361 = vmatmul.mubr.bf16.gmra.mxu0 %v3243_v49 }
  0xda   :  { %1650 = vmatmul.mubr.bf16.gmra.mxu1 %v3244_v50  ;;  %1368 = vmatprep.mubr.bf16.mxu0 %v3245_v51 }
  0xdb   :  { %1657 = vmatprep.mubr.bf16.mxu1 %v3247_v52 }
  0xe1   :  { %1369 = vmatmul.mubr.bf16.gmra.mxu0 %v3249_v53 }
  0xe2   :  { %1658 = vmatmul.mubr.bf16.gmra.mxu1 %v3250_v54  ;;  %1376 = vmatprep.mubr.bf16.mxu0 %v3251_v55 }
  0xe3   :  { %1665 = vmatprep.mubr.bf16.mxu1 %v3253_v56 }
  0xe9   :  { %1377 = vmatmul.mubr.bf16.gmra.mxu0 %v3255_v57 }
  0xea   :  { %1666 = vmatmul.mubr.bf16.gmra.mxu1 %v3256_v58  ;;  %1384 = vmatprep.mubr.bf16.mxu0 %v3257_v59 }
  0xeb   :  { %1673 = vmatprep.mubr.bf16.mxu1 %v3259_v60 }
  0xf1   :  { %1385 = vmatmul.mubr.bf16.gmra.mxu0 %v3261_v61  ;;  %v3291_v61 = vld [vmem:[%s4098_s0 + $0x360] ss:$16 sps:$4 sm:$0xff]  }
  0xf2   :  { %1674 = vmatmul.mubr.bf16.gmra.mxu1 %v3262_v62  ;;  %1392 = vmatprep.mubr.bf16.mxu0 %v3263_v63  ;;  %v3292_v63 = vld [vmem:[%s4098_s0 + $0x368] ss:$16 sps:$4 sm:$0xff]  }
  0xf3   :  { %1681 = vmatprep.mubr.bf16.mxu1 %v3265_v0  ;;  %v3295_v0 = vld [vmem:[%s4098_s0 + $0x384] ss:$16 sps:$4 sm:$0xff]  }
  0xf9   :  { %1393 = vmatmul.mubr.bf16.gmra.mxu0 %v3267_v1 }
  0xfa   :  { %1682 = vmatmul.mubr.bf16.gmra.mxu1 %v3268_v2  ;;  %1400 = vmatprep.mubr.bf16.mxu0 %v3269_v3 }
  0xfb   :  { %1689 = vmatprep.mubr.bf16.mxu1 %v3271_v4 }
 0x101   :  { %v1210_v9 = vpop.f32.mrf.mxu0  ;;  %1401 = vmatmul.mubr.bf16.gmra.mxu0 %v3273_v5 }
 0x102   :  { %v1499_v10 = vpop.f32.mrf.mxu1  ;;  %1690 = vmatmul.mubr.bf16.gmra.mxu1 %v3274_v6  ;;  %1408 = vmatprep.mubr.bf16.mxu0 %v3275_v7  ;;  %v3298_v6 = vld [vmem:[%s4098_s0 + $0x38c] ss:$16 sps:$4 sm:$0xff]  }
 0x103   :  { %v1500_v12 = vadd.f32 %v1499_v10, %v1210_v9  ;;  %v1212_v13 = vpop.f32.mrf.mxu0  ;;  %1697 = vmatprep.mubr.bf16.mxu1 %v3277_v8 }
 0x104   :  { %v1501_v14 = vpop.f32.mrf.mxu1 }
 0x105   :  { %v1213_v16 = vpop.f32.mrf.mxu0  ;;  %v1959_v17 = vmul.f32 %v3782_v11, %v1500_v12 }
 0x106   :  { %v1502_v19 = vpop.f32.mrf.mxu1 }
 0x107   :  { %v1503_v22 = vadd.f32 %v1502_v19, %v1213_v16  ;;  %v2030_v23 = vadd.f32 %v3787_v15, %v1959_v17  ;;  %v1215_v24 = vpop.f32.mrf.mxu0 }
 0x108   :  { %v1504_v26 = vpop.f32.mrf.mxu1  ;;  %v3296_v24 = vld [vmem:[%s4098_s0 + $0x388] ss:$16 sps:$4 sm:$0xff]  }
 0x109   :  { %v1960_v27 = vmul.f32 %v3782_v11, %v1503_v22  ;;  %v1218_v28 = vpop.f32.mrf.mxu0  ;;  %1409 = vmatmul.mubr.bf16.gmra.mxu0 %v3279_v18  ;;  %v2158_v31 = vmul.f32 0.2, %v2030_v23  ;;  %vm2094_vm0 = vcmp.ge.f32.partialorder %v2030_v23, 0.0  ;;  %v3293_v22 = vld [vmem:[%s4098_s0 + $0x380] ss:$16 sps:$4 sm:$0xff]  }
 0x10a   :  { %v1507_v29 = vpop.f32.mrf.mxu1  ;;  %1698 = vmatmul.mubr.bf16.gmra.mxu1 %v3280_v20  ;;  %1416 = vmatprep.mubr.bf16.mxu0 %v3281_v21 }
 0x10b   :  { %v2031_v30 = vadd.f32 %v3787_v15, %v1960_v27  ;;  %v1508_v32 = vadd.f32 %v1507_v29, %v1218_v28  ;;  %v1220_v33 = vpop.f32.mrf.mxu0  ;;  %1705 = vmatprep.mubr.bf16.mxu1 %v3283_v25  ;;  %v2222_v42 = vsel %vm2094_vm0, %v2030_v23, %v2158_v31  ;;  %v3301_v25 = vld [vmem:[%s4098_s0 + $0x3a4] ss:$16 sps:$4 sm:$0xff]   ;;  %v3304_v31 = vld [vmem:[%s4098_s0 + $0x3ac] ss:$16 sps:$4 sm:$0xff]  }
 0x10c   :  { %v1509_v34 = vpop.f32.mrf.mxu1 }
 0x10d   :  { %vm2095_vm1 = vcmp.ge.f32.partialorder %v2031_v30, 0.0  ;;  %v2159_v35 = vmul.f32 0.2, %v2031_v30  ;;  %v1961_v36 = vmul.f32 %v3782_v11, %v1508_v32  ;;  %v1221_v37 = vpop.f32.mrf.mxu0 }
 0x10e   :  { %v1510_v39 = vpop.f32.mrf.mxu1 }
 0x10f   :  { %v2223_v43 = vsel %vm2095_vm1, %v2031_v30, %v2159_v35  ;;  %v2032_v44 = vadd.f32 %v3787_v15, %v1961_v36  ;;  %v1511_v45 = vadd.f32 %v1510_v39, %v1221_v37  ;;  %v1223_v46 = vpop.f32.mrf.mxu0 }
 0x110   :  { %v2903_v48 = vpack.c.bf16 %v2223_v43, %v2222_v42  ;;  %v1512_v49 = vpop.f32.mrf.mxu1 }
 0x111   :  { %v1962_v50 = vmul.f32 %v3782_v11, %v1511_v45  ;;  %v1226_v51 = vpop.f32.mrf.mxu0  ;;  %1417 = vmatmul.mubr.bf16.gmra.mxu0 %v3285_v38  ;;  %v2160_v53 = vmul.f32 0.2, %v2032_v44  ;;  %vm2096_vm2 = vcmp.ge.f32.partialorder %v2032_v44, 0.0  ;;  %v3299_v45 = vld [vmem:[%s4098_s0 + $0x3a0] ss:$16 sps:$4 sm:$0xff]  }
 0x112   :  { %2904 = vst [vmem:[%s4100_s4] sm:$0xff] %v2903_v48   ;;  %v1515_v52 = vpop.f32.mrf.mxu1  ;;  %1706 = vmatmul.mubr.bf16.gmra.mxu1 %v3286_v40  ;;  %1424 = vmatprep.mubr.bf16.mxu0 %v3287_v41  ;;  %v3307_v48 = vld [vmem:[%s4098_s0 + $0x3c4] ss:$16 sps:$4 sm:$0xff]  }
 0x113   :  { %v2033_v54 = vadd.f32 %v3787_v15, %v1962_v50  ;;  %v1516_v55 = vadd.f32 %v1515_v52, %v1226_v51  ;;  %v1228_v56 = vpop.f32.mrf.mxu0  ;;  %1713 = vmatprep.mubr.bf16.mxu1 %v3289_v47  ;;  %v2224_v1 = vsel %vm2096_vm2, %v2032_v44, %v2160_v53  ;;  %v3302_v47 = vld [vmem:[%s4098_s0 + $0x3a8] ss:$16 sps:$4 sm:$0xff]  }
 0x114   :  { %v1517_v57 = vpop.f32.mrf.mxu1 }
 0x115   :  { %vm2097_vm3 = vcmp.ge.f32.partialorder %v2033_v54, 0.0  ;;  %v2161_v58 = vmul.f32 0.2, %v2033_v54  ;;  %v1963_v59 = vmul.f32 %v3782_v11, %v1516_v55  ;;  %v1229_v60 = vpop.f32.mrf.mxu0 }
 0x116   :  { %v1518_v62 = vpop.f32.mrf.mxu1 }
 0x117   :  { %v2225_v2 = vsel %vm2097_vm3, %v2033_v54, %v2161_v58  ;;  %v2034_v3 = vadd.f32 %v3787_v15, %v1963_v59  ;;  %v1519_v4 = vadd.f32 %v1518_v62, %v1229_v60  ;;  %v1231_v5 = vpop.f32.mrf.mxu0  ;;  %v3310_v54 = vld [vmem:[%s4098_s0 + $0x3cc] ss:$16 sps:$4 sm:$0xff]  }
 0x118   :  { %v2908_v7 = vpack.c.bf16 %v2225_v2, %v2224_v1  ;;  %v1520_v8 = vpop.f32.mrf.mxu1 }
 0x119   :  { %v1964_v9 = vmul.f32 %v3782_v11, %v1519_v4  ;;  %v1234_v10 = vpop.f32.mrf.mxu0  ;;  %1425 = vmatmul.mubr.bf16.gmra.mxu0 %v3291_v61  ;;  %v2162_v13 = vmul.f32 0.2, %v2034_v3  ;;  %vm2098_vm4 = vcmp.ge.f32.partialorder %v2034_v3, 0.0  ;;  %v3305_v4 = vld [vmem:[%s4098_s0 + $0x3c0] ss:$16 sps:$4 sm:$0xff]  }
 0x11a   :  { %3060 = vst [vmem:[%s4100_s4 + $0x8] sm:$0xff] %v2908_v7   ;;  %v1523_v12 = vpop.f32.mrf.mxu1  ;;  %1714 = vmatmul.mubr.bf16.gmra.mxu1 %v3292_v63  ;;  %1432 = vmatprep.mubr.bf16.mxu0 %v3295_v0  ;;  %v3313_v7 = vld [vmem:[%s4098_s0 + $0x3e4] ss:$16 sps:$4 sm:$0xff]  }
 0x11b   :  { %v2035_v14 = vadd.f32 %v3787_v15, %v1964_v9  ;;  %v1524_v16 = vadd.f32 %v1523_v12, %v1234_v10  ;;  %v1236_v17 = vpop.f32.mrf.mxu0  ;;  %1721 = vmatprep.mubr.bf16.mxu1 %v3298_v6  ;;  %v2226_v26 = vsel %vm2098_vm4, %v2034_v3, %v2162_v13  ;;  %v3308_v6 = vld [vmem:[%s4098_s0 + $0x3c8] ss:$16 sps:$4 sm:$0xff]  }
 0x11c   :  { %v1525_v18 = vpop.f32.mrf.mxu1 }
 0x11d   :  { %vm2099_vm5 = vcmp.ge.f32.partialorder %v2035_v14, 0.0  ;;  %v2163_v19 = vmul.f32 0.2, %v2035_v14  ;;  %v1965_v20 = vmul.f32 %v3782_v11, %v1524_v16  ;;  %v1237_v21 = vpop.f32.mrf.mxu0 }
 0x11e   :  { %v1526_v23 = vpop.f32.mrf.mxu1 }
 0x11f   :  { %v2227_v27 = vsel %vm2099_vm5, %v2035_v14, %v2163_v19  ;;  %v2036_v28 = vadd.f32 %v3787_v15, %v1965_v20  ;;  %v1527_v29 = vadd.f32 %v1526_v23, %v1237_v21  ;;  %v1239_v30 = vpop.f32.mrf.mxu0  ;;  %v3316_v14 = vld [vmem:[%s4098_s0 + $0x3ec] ss:$16 sps:$4 sm:$0xff]  }
 0x120   :  { %v2913_v32 = vpack.c.bf16 %v2227_v27, %v2226_v26  ;;  %v1528_v33 = vpop.f32.mrf.mxu1 }
 0x121   :  { %v1966_v34 = vmul.f32 %v3782_v11, %v1527_v29  ;;  %v1242_v35 = vpop.f32.mrf.mxu0  ;;  %1433 = vmatmul.mubr.bf16.gmra.mxu0 %v3293_v22  ;;  %v2164_v37 = vmul.f32 0.2, %v2036_v28  ;;  %vm2100_vm6 = vcmp.ge.f32.partialorder %v2036_v28, 0.0  ;;  %v3311_v29 = vld [vmem:[%s4098_s0 + $0x3e0] ss:$16 sps:$4 sm:$0xff]  }
 0x122   :  { %3061 = vst [vmem:[%s4100_s4 + $0x10] sm:$0xff] %v2913_v32   ;;  %v1531_v36 = vpop.f32.mrf.mxu1  ;;  %1722 = vmatmul.mubr.bf16.gmra.mxu1 %v3296_v24  ;;  %1440 = vmatprep.mubr.bf16.mxu0 %v3301_v25 }
 0x123   :  { %v2037_v38 = vadd.f32 %v3787_v15, %v1966_v34  ;;  %v1532_v39 = vadd.f32 %v1531_v36, %v1242_v35  ;;  %v1244_v40 = vpop.f32.mrf.mxu0  ;;  %1729 = vmatprep.mubr.bf16.mxu1 %v3304_v31  ;;  %v2228_v49 = vsel %vm2100_vm6, %v2036_v28, %v2164_v37  ;;  %v3314_v31 = vld [vmem:[%s4098_s0 + $0x3e8] ss:$16 sps:$4 sm:$0xff]  }
 0x124   :  { %v1533_v41 = vpop.f32.mrf.mxu1 }
 0x125   :  { %vm2101_vm7 = vcmp.ge.f32.partialorder %v2037_v38, 0.0  ;;  %v2165_v42 = vmul.f32 0.2, %v2037_v38  ;;  %v1967_v43 = vmul.f32 %v3782_v11, %v1532_v39  ;;  %v1245_v44 = vpop.f32.mrf.mxu0 }
 0x126   :  { %v1534_v46 = vpop.f32.mrf.mxu1 }
 0x127   :  { %v2229_v50 = vsel %vm2101_vm7, %v2037_v38, %v2165_v42  ;;  %v2038_v51 = vadd.f32 %v3787_v15, %v1967_v43  ;;  %v1535_v52 = vadd.f32 %v1534_v46, %v1245_v44  ;;  %v1247_v53 = vpop.f32.mrf.mxu0 }
 0x128   :  { %v2918_v55 = vpack.c.bf16 %v2229_v50, %v2228_v49  ;;  %v1536_v56 = vpop.f32.mrf.mxu1 }
 0x129   :  { %v1968_v57 = vmul.f32 %v3782_v11, %v1535_v52  ;;  %v1250_v58 = vpop.f32.mrf.mxu0  ;;  %1441 = vmatmul.mubr.bf16.gmra.mxu0 %v3299_v45  ;;  %v2166_v60 = vmul.f32 0.2, %v2038_v51  ;;  %vm2102_vm8 = vcmp.ge.f32.partialorder %v2038_v51, 0.0 }
 0x12a   :  { %3062 = vst [vmem:[%s4100_s4 + $0x18] sm:$0xff] %v2918_v55   ;;  %v1539_v59 = vpop.f32.mrf.mxu1  ;;  %1730 = vmatmul.mubr.bf16.gmra.mxu1 %v3302_v47  ;;  %1448 = vmatprep.mubr.bf16.mxu0 %v3307_v48 }
 0x12b   :  { %v2039_v61 = vadd.f32 %v3787_v15, %v1968_v57  ;;  %v1540_v62 = vadd.f32 %v1539_v59, %v1250_v58  ;;  %v1252_v63 = vpop.f32.mrf.mxu0  ;;  %1737 = vmatprep.mubr.bf16.mxu1 %v3310_v54  ;;  %v2230_v8 = vsel %vm2102_vm8, %v2038_v51, %v2166_v60 }
 0x12c   :  { %v1541_v0 = vpop.f32.mrf.mxu1 }
 0x12d   :  { %vm2103_vm9 = vcmp.ge.f32.partialorder %v2039_v61, 0.0  ;;  %v2167_v1 = vmul.f32 0.2, %v2039_v61  ;;  %v1969_v2 = vmul.f32 %v3782_v11, %v1540_v62  ;;  %v1253_v3 = vpop.f32.mrf.mxu0 }
 0x12e   :  { %v1542_v5 = vpop.f32.mrf.mxu1 }
 0x12f   :  { %v2231_v9 = vsel %vm2103_vm9, %v2039_v61, %v2167_v1  ;;  %v2040_v10 = vadd.f32 %v3787_v15, %v1969_v2  ;;  %v1543_v12 = vadd.f32 %v1542_v5, %v1253_v3  ;;  %v1255_v13 = vpop.f32.mrf.mxu0 }
 0x130   :  { %v2923_v16 = vpack.c.bf16 %v2231_v9, %v2230_v8  ;;  %v1544_v17 = vpop.f32.mrf.mxu1 }
 0x131   :  { %v1970_v18 = vmul.f32 %v3782_v11, %v1543_v12  ;;  %v1258_v19 = vpop.f32.mrf.mxu0  ;;  %1449 = vmatmul.mubr.bf16.gmra.mxu0 %v3305_v4  ;;  %v2168_v21 = vmul.f32 0.2, %v2040_v10  ;;  %vm2104_vm10 = vcmp.ge.f32.partialorder %v2040_v10, 0.0 }
 0x132   :  { %3063 = vst [vmem:[%s4100_s4 + $0x20] sm:$0xff] %v2923_v16   ;;  %v1547_v20 = vpop.f32.mrf.mxu1  ;;  %1738 = vmatmul.mubr.bf16.gmra.mxu1 %v3308_v6  ;;  %1456 = vmatprep.mubr.bf16.mxu0 %v3313_v7 }
 0x133   :  { %v2041_v22 = vadd.f32 %v3787_v15, %v1970_v18  ;;  %v1548_v23 = vadd.f32 %v1547_v20, %v1258_v19  ;;  %v1260_v24 = vpop.f32.mrf.mxu0  ;;  %1745 = vmatprep.mubr.bf16.mxu1 %v3316_v14  ;;  %v2232_v32 = vsel %vm2104_vm10, %v2040_v10, %v2168_v21 }
 0x134   :  { %v1549_v25 = vpop.f32.mrf.mxu1 }
 0x135   :  { %vm2105_vm11 = vcmp.ge.f32.partialorder %v2041_v22, 0.0  ;;  %v2169_v26 = vmul.f32 0.2, %v2041_v22  ;;  %v1971_v27 = vmul.f32 %v3782_v11, %v1548_v23  ;;  %v1261_v28 = vpop.f32.mrf.mxu0 }
 0x136   :  { %v1550_v30 = vpop.f32.mrf.mxu1 }
 0x137   :  { %v2233_v33 = vsel %vm2105_vm11, %v2041_v22, %v2169_v26  ;;  %v2042_v34 = vadd.f32 %v3787_v15, %v1971_v27  ;;  %v1551_v35 = vadd.f32 %v1550_v30, %v1261_v28  ;;  %v1263_v36 = vpop.f32.mrf.mxu0 }
 0x138   :  { %v2928_v37 = vpack.c.bf16 %v2233_v33, %v2232_v32  ;;  %v1552_v38 = vpop.f32.mrf.mxu1 }
 0x139   :  { %v1972_v39 = vmul.f32 %v3782_v11, %v1551_v35  ;;  %v1266_v40 = vpop.f32.mrf.mxu0  ;;  %1457 = vmatmul.mubr.bf16.gmra.mxu0 %v3311_v29  ;;  %v2170_v42 = vmul.f32 0.2, %v2042_v34  ;;  %vm2106_vm12 = vcmp.ge.f32.partialorder %v2042_v34, 0.0 }
 0x13a   :  { %3064 = vst [vmem:[%s4100_s4 + $0x28] sm:$0xff] %v2928_v37   ;;  %v1555_v41 = vpop.f32.mrf.mxu1  ;;  %1746 = vmatmul.mubr.bf16.gmra.mxu1 %v3314_v31 }
 0x13b   :  { %v2043_v43 = vadd.f32 %v3787_v15, %v1972_v39  ;;  %v1556_v44 = vadd.f32 %v1555_v41, %v1266_v40  ;;  %v1268_v45 = vpop.f32.mrf.mxu0  ;;  %v2234_v51 = vsel %vm2106_vm12, %v2042_v34, %v2170_v42 }
 0x13c   :  { %v1557_v46 = vpop.f32.mrf.mxu1 }
 0x13d   :  { %vm2107_vm13 = vcmp.ge.f32.partialorder %v2043_v43, 0.0  ;;  %v2171_v47 = vmul.f32 0.2, %v2043_v43  ;;  %v1973_v48 = vmul.f32 %v3782_v11, %v1556_v44  ;;  %v1269_v49 = vpop.f32.mrf.mxu0 }
 0x13e   :  { %v1558_v50 = vpop.f32.mrf.mxu1 }
 0x13f   :  { %v2235_v52 = vsel %vm2107_vm13, %v2043_v43, %v2171_v47  ;;  %v2044_v53 = vadd.f32 %v3787_v15, %v1973_v48  ;;  %v1559_v54 = vadd.f32 %v1558_v50, %v1269_v49  ;;  %v1271_v55 = vpop.f32.mrf.mxu0 }
 0x140   :  { %v2933_v56 = vpack.c.bf16 %v2235_v52, %v2234_v51  ;;  %v1560_v57 = vpop.f32.mrf.mxu1 }
 0x141   :  { %v1974_v58 = vmul.f32 %v3782_v11, %v1559_v54  ;;  %v1274_v59 = vpop.f32.mrf.mxu0  ;;  %v2172_v61 = vmul.f32 0.2, %v2044_v53  ;;  %vm2108_vm14 = vcmp.ge.f32.partialorder %v2044_v53, 0.0 }
 0x142   :  { %3065 = vst [vmem:[%s4100_s4 + $0x30] sm:$0xff] %v2933_v56   ;;  %v1563_v60 = vpop.f32.mrf.mxu1 }
 0x143   :  { %v2045_v62 = vadd.f32 %v3787_v15, %v1974_v58  ;;  %v1564_v63 = vadd.f32 %v1563_v60, %v1274_v59  ;;  %v1276_v0 = vpop.f32.mrf.mxu0  ;;  %v2236_v6 = vsel %vm2108_vm14, %v2044_v53, %v2172_v61 }
 0x144   :  { %v1565_v1 = vpop.f32.mrf.mxu1 }
 0x145   :  { %vm2109_vm15 = vcmp.ge.f32.partialorder %v2045_v62, 0.0  ;;  %v2173_v2 = vmul.f32 0.2, %v2045_v62  ;;  %v1975_v3 = vmul.f32 %v3782_v11, %v1564_v63  ;;  %v1277_v4 = vpop.f32.mrf.mxu0 }
 0x146   :  { %v1566_v5 = vpop.f32.mrf.mxu1 }
 0x147   :  { %v2237_v7 = vsel %vm2109_vm15, %v2045_v62, %v2173_v2  ;;  %v2046_v8 = vadd.f32 %v3787_v15, %v1975_v3  ;;  %v1567_v9 = vadd.f32 %v1566_v5, %v1277_v4  ;;  %v1279_v10 = vpop.f32.mrf.mxu0 }
 0x148   :  { %v2938_v12 = vpack.c.bf16 %v2237_v7, %v2236_v6  ;;  %v1568_v13 = vpop.f32.mrf.mxu1 }
 0x149   :  { %v1976_v14 = vmul.f32 %v3782_v11, %v1567_v9  ;;  %v1282_v16 = vpop.f32.mrf.mxu0  ;;  %v2174_v18 = vmul.f32 0.2, %v2046_v8  ;;  %vm2110_vm0 = vcmp.ge.f32.partialorder %v2046_v8, 0.0 }
 0x14a   :  { %3066 = vst [vmem:[%s4100_s4 + $0x38] sm:$0xff] %v2938_v12   ;;  %v1571_v17 = vpop.f32.mrf.mxu1 }
 0x14b   :  { %v2047_v19 = vadd.f32 %v3787_v15, %v1976_v14  ;;  %v1572_v20 = vadd.f32 %v1571_v17, %v1282_v16  ;;  %v1284_v21 = vpop.f32.mrf.mxu0  ;;  %v2238_v27 = vsel %vm2110_vm0, %v2046_v8, %v2174_v18 }
 0x14c   :  { %v1573_v22 = vpop.f32.mrf.mxu1 }
 0x14d   :  { %vm2111_vm1 = vcmp.ge.f32.partialorder %v2047_v19, 0.0  ;;  %v2175_v23 = vmul.f32 0.2, %v2047_v19  ;;  %v1977_v24 = vmul.f32 %v3782_v11, %v1572_v20  ;;  %v1285_v25 = vpop.f32.mrf.mxu0 }
 0x14e   :  { %v1574_v26 = vpop.f32.mrf.mxu1 }
 0x14f   :  { %v2239_v28 = vsel %vm2111_vm1, %v2047_v19, %v2175_v23  ;;  %v2048_v29 = vadd.f32 %v3787_v15, %v1977_v24  ;;  %v1575_v30 = vadd.f32 %v1574_v26, %v1285_v25  ;;  %v1287_v31 = vpop.f32.mrf.mxu0 }
 0x150   :  { %v2943_v32 = vpack.c.bf16 %v2239_v28, %v2238_v27  ;;  %v1576_v33 = vpop.f32.mrf.mxu1 }
 0x151   :  { %v1978_v34 = vmul.f32 %v3782_v11, %v1575_v30  ;;  %v1290_v35 = vpop.f32.mrf.mxu0  ;;  %v2176_v37 = vmul.f32 0.2, %v2048_v29  ;;  %vm2112_vm2 = vcmp.ge.f32.partialorder %v2048_v29, 0.0 }
 0x152   :  { %3067 = vst [vmem:[%s4100_s4 + $0x40] sm:$0xff] %v2943_v32   ;;  %v1579_v36 = vpop.f32.mrf.mxu1 }
 0x153   :  { %v2049_v38 = vadd.f32 %v3787_v15, %v1978_v34  ;;  %v1580_v39 = vadd.f32 %v1579_v36, %v1290_v35  ;;  %v1292_v40 = vpop.f32.mrf.mxu0  ;;  %v2240_v46 = vsel %vm2112_vm2, %v2048_v29, %v2176_v37 }
 0x154   :  { %v1581_v41 = vpop.f32.mrf.mxu1 }
 0x155   :  { %vm2113_vm3 = vcmp.ge.f32.partialorder %v2049_v38, 0.0  ;;  %v2177_v42 = vmul.f32 0.2, %v2049_v38  ;;  %v1979_v43 = vmul.f32 %v3782_v11, %v1580_v39  ;;  %v1293_v44 = vpop.f32.mrf.mxu0 }
 0x156   :  { %v1582_v45 = vpop.f32.mrf.mxu1 }
 0x157   :  { %v2241_v47 = vsel %vm2113_vm3, %v2049_v38, %v2177_v42  ;;  %v2050_v48 = vadd.f32 %v3787_v15, %v1979_v43  ;;  %v1583_v49 = vadd.f32 %v1582_v45, %v1293_v44  ;;  %v1295_v50 = vpop.f32.mrf.mxu0 }
 0x158   :  { %v2948_v51 = vpack.c.bf16 %v2241_v47, %v2240_v46  ;;  %v1584_v52 = vpop.f32.mrf.mxu1 }
 0x159   :  { %v1980_v53 = vmul.f32 %v3782_v11, %v1583_v49  ;;  %v1298_v54 = vpop.f32.mrf.mxu0  ;;  %v2178_v56 = vmul.f32 0.2, %v2050_v48  ;;  %vm2114_vm4 = vcmp.ge.f32.partialorder %v2050_v48, 0.0 }
 0x15a   :  { %3068 = vst [vmem:[%s4100_s4 + $0x48] sm:$0xff] %v2948_v51   ;;  %v1587_v55 = vpop.f32.mrf.mxu1 }
 0x15b   :  { %v2051_v57 = vadd.f32 %v3787_v15, %v1980_v53  ;;  %v1588_v58 = vadd.f32 %v1587_v55, %v1298_v54  ;;  %v1300_v59 = vpop.f32.mrf.mxu0  ;;  %v2242_v1 = vsel %vm2114_vm4, %v2050_v48, %v2178_v56 }
 0x15c   :  { %v1589_v60 = vpop.f32.mrf.mxu1 }
 0x15d   :  { %vm2115_vm5 = vcmp.ge.f32.partialorder %v2051_v57, 0.0  ;;  %v2179_v61 = vmul.f32 0.2, %v2051_v57  ;;  %v1981_v62 = vmul.f32 %v3782_v11, %v1588_v58  ;;  %v1301_v63 = vpop.f32.mrf.mxu0 }
 0x15e   :  { %v1590_v0 = vpop.f32.mrf.mxu1 }
 0x15f   :  { %v2243_v2 = vsel %vm2115_vm5, %v2051_v57, %v2179_v61  ;;  %v2052_v3 = vadd.f32 %v3787_v15, %v1981_v62  ;;  %v1591_v4 = vadd.f32 %v1590_v0, %v1301_v63  ;;  %v1303_v5 = vpop.f32.mrf.mxu0 }
 0x160   :  { %v2953_v6 = vpack.c.bf16 %v2243_v2, %v2242_v1  ;;  %v1592_v7 = vpop.f32.mrf.mxu1 }
 0x161   :  { %v1982_v8 = vmul.f32 %v3782_v11, %v1591_v4  ;;  %v1306_v9 = vpop.f32.mrf.mxu0  ;;  %v2180_v12 = vmul.f32 0.2, %v2052_v3  ;;  %vm2116_vm6 = vcmp.ge.f32.partialorder %v2052_v3, 0.0 }
 0x162   :  { %3069 = vst [vmem:[%s4100_s4 + $0x50] sm:$0xff] %v2953_v6   ;;  %v1595_v10 = vpop.f32.mrf.mxu1 }
 0x163   :  { %v2053_v13 = vadd.f32 %v3787_v15, %v1982_v8  ;;  %v1596_v14 = vadd.f32 %v1595_v10, %v1306_v9  ;;  %v1308_v16 = vpop.f32.mrf.mxu0  ;;  %v2244_v22 = vsel %vm2116_vm6, %v2052_v3, %v2180_v12 }
 0x164   :  { %v1597_v17 = vpop.f32.mrf.mxu1 }
 0x165   :  { %vm2117_vm7 = vcmp.ge.f32.partialorder %v2053_v13, 0.0  ;;  %v2181_v18 = vmul.f32 0.2, %v2053_v13  ;;  %v1983_v19 = vmul.f32 %v3782_v11, %v1596_v14  ;;  %v1309_v20 = vpop.f32.mrf.mxu0 }
 0x166   :  { %v1598_v21 = vpop.f32.mrf.mxu1 }
 0x167   :  { %v2245_v23 = vsel %vm2117_vm7, %v2053_v13, %v2181_v18  ;;  %v2054_v24 = vadd.f32 %v3787_v15, %v1983_v19  ;;  %v1599_v25 = vadd.f32 %v1598_v21, %v1309_v20  ;;  %v1311_v26 = vpop.f32.mrf.mxu0 }
 0x168   :  { %v2958_v27 = vpack.c.bf16 %v2245_v23, %v2244_v22  ;;  %v1600_v28 = vpop.f32.mrf.mxu1 }
 0x169   :  { %v1984_v29 = vmul.f32 %v3782_v11, %v1599_v25  ;;  %v1314_v30 = vpop.f32.mrf.mxu0  ;;  %v2182_v32 = vmul.f32 0.2, %v2054_v24  ;;  %vm2118_vm8 = vcmp.ge.f32.partialorder %v2054_v24, 0.0 }
 0x16a   :  { %3070 = vst [vmem:[%s4100_s4 + $0x58] sm:$0xff] %v2958_v27   ;;  %v1603_v31 = vpop.f32.mrf.mxu1 }
 0x16b   :  { %v2055_v33 = vadd.f32 %v3787_v15, %v1984_v29  ;;  %v1604_v34 = vadd.f32 %v1603_v31, %v1314_v30  ;;  %v1316_v35 = vpop.f32.mrf.mxu0  ;;  %v2246_v41 = vsel %vm2118_vm8, %v2054_v24, %v2182_v32 }
 0x16c   :  { %v1605_v36 = vpop.f32.mrf.mxu1 }
 0x16d   :  { %vm2119_vm9 = vcmp.ge.f32.partialorder %v2055_v33, 0.0  ;;  %v2183_v37 = vmul.f32 0.2, %v2055_v33  ;;  %v1985_v38 = vmul.f32 %v3782_v11, %v1604_v34  ;;  %v1317_v39 = vpop.f32.mrf.mxu0 }
 0x16e   :  { %v1606_v40 = vpop.f32.mrf.mxu1 }
 0x16f   :  { %v2247_v42 = vsel %vm2119_vm9, %v2055_v33, %v2183_v37  ;;  %v2056_v43 = vadd.f32 %v3787_v15, %v1985_v38  ;;  %v1607_v44 = vadd.f32 %v1606_v40, %v1317_v39  ;;  %v1319_v45 = vpop.f32.mrf.mxu0 }
 0x170   :  { %v2963_v46 = vpack.c.bf16 %v2247_v42, %v2246_v41  ;;  %v1608_v47 = vpop.f32.mrf.mxu1 }
 0x171   :  { %v1986_v48 = vmul.f32 %v3782_v11, %v1607_v44  ;;  %v1322_v49 = vpop.f32.mrf.mxu0  ;;  %v2184_v51 = vmul.f32 0.2, %v2056_v43  ;;  %vm2120_vm10 = vcmp.ge.f32.partialorder %v2056_v43, 0.0 }
 0x172   :  { %3071 = vst [vmem:[%s4100_s4 + $0x60] sm:$0xff] %v2963_v46   ;;  %v1611_v50 = vpop.f32.mrf.mxu1 }
 0x173   :  { %v2057_v52 = vadd.f32 %v3787_v15, %v1986_v48  ;;  %v1612_v53 = vadd.f32 %v1611_v50, %v1322_v49  ;;  %v1324_v54 = vpop.f32.mrf.mxu0  ;;  %v2248_v60 = vsel %vm2120_vm10, %v2056_v43, %v2184_v51 }
 0x174   :  { %v1613_v55 = vpop.f32.mrf.mxu1 }
 0x175   :  { %vm2121_vm11 = vcmp.ge.f32.partialorder %v2057_v52, 0.0  ;;  %v2185_v56 = vmul.f32 0.2, %v2057_v52  ;;  %v1987_v57 = vmul.f32 %v3782_v11, %v1612_v53  ;;  %v1325_v58 = vpop.f32.mrf.mxu0 }
 0x176   :  { %v1614_v59 = vpop.f32.mrf.mxu1 }
 0x177   :  { %v2249_v61 = vsel %vm2121_vm11, %v2057_v52, %v2185_v56  ;;  %v2058_v62 = vadd.f32 %v3787_v15, %v1987_v57  ;;  %v1615_v63 = vadd.f32 %v1614_v59, %v1325_v58  ;;  %v1327_v0 = vpop.f32.mrf.mxu0 }
 0x178   :  { %v2968_v1 = vpack.c.bf16 %v2249_v61, %v2248_v60  ;;  %v1616_v2 = vpop.f32.mrf.mxu1 }
 0x179   :  { %v1988_v3 = vmul.f32 %v3782_v11, %v1615_v63  ;;  %v1330_v4 = vpop.f32.mrf.mxu0  ;;  %v2186_v6 = vmul.f32 0.2, %v2058_v62  ;;  %vm2122_vm12 = vcmp.ge.f32.partialorder %v2058_v62, 0.0 }
 0x17a   :  { %3072 = vst [vmem:[%s4100_s4 + $0x68] sm:$0xff] %v2968_v1   ;;  %v1619_v5 = vpop.f32.mrf.mxu1 }
 0x17b   :  { %v2059_v7 = vadd.f32 %v3787_v15, %v1988_v3  ;;  %v1620_v8 = vadd.f32 %v1619_v5, %v1330_v4  ;;  %v1332_v9 = vpop.f32.mrf.mxu0  ;;  %v2250_v17 = vsel %vm2122_vm12, %v2058_v62, %v2186_v6 }
 0x17c   :  { %v1621_v10 = vpop.f32.mrf.mxu1 }
 0x17d   :  { %vm2123_vm13 = vcmp.ge.f32.partialorder %v2059_v7, 0.0  ;;  %v2187_v12 = vmul.f32 0.2, %v2059_v7  ;;  %v1989_v13 = vmul.f32 %v3782_v11, %v1620_v8  ;;  %v1333_v14 = vpop.f32.mrf.mxu0 }
 0x17e   :  { %v1622_v16 = vpop.f32.mrf.mxu1 }
 0x17f   :  { %v2251_v18 = vsel %vm2123_vm13, %v2059_v7, %v2187_v12  ;;  %v2060_v19 = vadd.f32 %v3787_v15, %v1989_v13  ;;  %v1623_v20 = vadd.f32 %v1622_v16, %v1333_v14  ;;  %v1335_v21 = vpop.f32.mrf.mxu0 }
 0x180   :  { %v2973_v22 = vpack.c.bf16 %v2251_v18, %v2250_v17  ;;  %v1624_v23 = vpop.f32.mrf.mxu1 }
 0x181   :  { %v1990_v24 = vmul.f32 %v3782_v11, %v1623_v20  ;;  %v1338_v25 = vpop.f32.mrf.mxu0  ;;  %v2188_v27 = vmul.f32 0.2, %v2060_v19  ;;  %vm2124_vm14 = vcmp.ge.f32.partialorder %v2060_v19, 0.0 }
 0x182   :  { %3073 = vst [vmem:[%s4100_s4 + $0x70] sm:$0xff] %v2973_v22   ;;  %v1627_v26 = vpop.f32.mrf.mxu1 }
 0x183   :  { %v2061_v28 = vadd.f32 %v3787_v15, %v1990_v24  ;;  %v1628_v29 = vadd.f32 %v1627_v26, %v1338_v25  ;;  %v1340_v30 = vpop.f32.mrf.mxu0  ;;  %v2252_v36 = vsel %vm2124_vm14, %v2060_v19, %v2188_v27 }
 0x184   :  { %v1629_v31 = vpop.f32.mrf.mxu1 }
 0x185   :  { %vm2125_vm15 = vcmp.ge.f32.partialorder %v2061_v28, 0.0  ;;  %v2189_v32 = vmul.f32 0.2, %v2061_v28  ;;  %v1991_v33 = vmul.f32 %v3782_v11, %v1628_v29  ;;  %v1341_v34 = vpop.f32.mrf.mxu0 }
 0x186   :  { %v1630_v35 = vpop.f32.mrf.mxu1 }
 0x187   :  { %v2253_v37 = vsel %vm2125_vm15, %v2061_v28, %v2189_v32  ;;  %v2062_v38 = vadd.f32 %v3787_v15, %v1991_v33  ;;  %v1631_v39 = vadd.f32 %v1630_v35, %v1341_v34  ;;  %v1343_v40 = vpop.f32.mrf.mxu0 }
 0x188   :  { %v2978_v41 = vpack.c.bf16 %v2253_v37, %v2252_v36  ;;  %v1632_v42 = vpop.f32.mrf.mxu1 }
 0x189   :  { %v1992_v43 = vmul.f32 %v3782_v11, %v1631_v39  ;;  %v1346_v44 = vpop.f32.mrf.mxu0  ;;  %v2190_v46 = vmul.f32 0.2, %v2062_v38  ;;  %vm2126_vm0 = vcmp.ge.f32.partialorder %v2062_v38, 0.0 }
 0x18a   :  { %3074 = vst [vmem:[%s4100_s4 + $0x78] sm:$0xff] %v2978_v41   ;;  %v1635_v45 = vpop.f32.mrf.mxu1 }
 0x18b   :  { %v2063_v47 = vadd.f32 %v3787_v15, %v1992_v43  ;;  %v1636_v48 = vadd.f32 %v1635_v45, %v1346_v44  ;;  %v1348_v49 = vpop.f32.mrf.mxu0  ;;  %v2254_v55 = vsel %vm2126_vm0, %v2062_v38, %v2190_v46 }
 0x18c   :  { %v1637_v50 = vpop.f32.mrf.mxu1 }
 0x18d   :  { %vm2127_vm1 = vcmp.ge.f32.partialorder %v2063_v47, 0.0  ;;  %v2191_v51 = vmul.f32 0.2, %v2063_v47  ;;  %v1993_v52 = vmul.f32 %v3782_v11, %v1636_v48  ;;  %v1349_v53 = vpop.f32.mrf.mxu0 }
 0x18e   :  { %v1638_v54 = vpop.f32.mrf.mxu1 }
 0x18f   :  { %v2255_v56 = vsel %vm2127_vm1, %v2063_v47, %v2191_v51  ;;  %v2064_v57 = vadd.f32 %v3787_v15, %v1993_v52  ;;  %v1639_v58 = vadd.f32 %v1638_v54, %v1349_v53  ;;  %v1351_v59 = vpop.f32.mrf.mxu0 }
 0x190   :  { %v2983_v60 = vpack.c.bf16 %v2255_v56, %v2254_v55  ;;  %v1640_v61 = vpop.f32.mrf.mxu1 }
 0x191   :  { %v1994_v62 = vmul.f32 %v3782_v11, %v1639_v58  ;;  %v1354_v63 = vpop.f32.mrf.mxu0  ;;  %v2192_v1 = vmul.f32 0.2, %v2064_v57  ;;  %vm2128_vm2 = vcmp.ge.f32.partialorder %v2064_v57, 0.0 }
 0x192   :  { %3075 = vst [vmem:[%s4100_s4 + $0x80] sm:$0xff] %v2983_v60   ;;  %v1643_v0 = vpop.f32.mrf.mxu1 }
 0x193   :  { %v2065_v2 = vadd.f32 %v3787_v15, %v1994_v62  ;;  %v1644_v3 = vadd.f32 %v1643_v0, %v1354_v63  ;;  %v1356_v4 = vpop.f32.mrf.mxu0  ;;  %v2256_v10 = vsel %vm2128_vm2, %v2064_v57, %v2192_v1 }
 0x194   :  { %v1645_v5 = vpop.f32.mrf.mxu1 }
 0x195   :  { %vm2129_vm3 = vcmp.ge.f32.partialorder %v2065_v2, 0.0  ;;  %v2193_v6 = vmul.f32 0.2, %v2065_v2  ;;  %v1995_v7 = vmul.f32 %v3782_v11, %v1644_v3  ;;  %v1357_v8 = vpop.f32.mrf.mxu0 }
 0x196   :  { %v1646_v9 = vpop.f32.mrf.mxu1 }
 0x197   :  { %v2257_v12 = vsel %vm2129_vm3, %v2065_v2, %v2193_v6  ;;  %v2066_v13 = vadd.f32 %v3787_v15, %v1995_v7  ;;  %v1647_v14 = vadd.f32 %v1646_v9, %v1357_v8  ;;  %v1359_v16 = vpop.f32.mrf.mxu0  ;;  %v4015_v7 = vld [vmem:[%s4099_s2] ss:$0 sm:$0xff] }
 0x198   :  { %v2988_v17 = vpack.c.bf16 %v2257_v12, %v2256_v10  ;;  %v1648_v18 = vpop.f32.mrf.mxu1 }
 0x199   :  { %v1996_v19 = vmul.f32 %v3782_v11, %v1647_v14  ;;  %v1362_v20 = vpop.f32.mrf.mxu0  ;;  %v2194_v22 = vmul.f32 0.2, %v2066_v13  ;;  %vm2130_vm4 = vcmp.ge.f32.partialorder %v2066_v13, 0.0 }
 0x19a   :  { %3076 = vst [vmem:[%s4100_s4 + $0x88] sm:$0xff] %v2988_v17   ;;  %v1651_v21 = vpop.f32.mrf.mxu1 }
 0x19b   :  { %v2067_v23 = vadd.f32 %v3787_v15, %v1996_v19  ;;  %v1652_v24 = vadd.f32 %v1651_v21, %v1362_v20  ;;  %v1364_v25 = vpop.f32.mrf.mxu0  ;;  %v2258_v31 = vsel %vm2130_vm4, %v2066_v13, %v2194_v22 }
 0x19c   :  { %v1653_v26 = vpop.f32.mrf.mxu1 }
 0x19d   :  { %vm2131_vm5 = vcmp.ge.f32.partialorder %v2067_v23, 0.0  ;;  %v2195_v27 = vmul.f32 0.2, %v2067_v23  ;;  %v1997_v28 = vmul.f32 %v3782_v11, %v1652_v24  ;;  %v1365_v29 = vpop.f32.mrf.mxu0 }
 0x19e   :  { %v1654_v30 = vpop.f32.mrf.mxu1 }
 0x19f   :  { %v2259_v32 = vsel %vm2131_vm5, %v2067_v23, %v2195_v27  ;;  %v2068_v33 = vadd.f32 %v3787_v15, %v1997_v28  ;;  %v1655_v34 = vadd.f32 %v1654_v30, %v1365_v29  ;;  %v1367_v35 = vpop.f32.mrf.mxu0 }
 0x1a0   :  { %v2993_v36 = vpack.c.bf16 %v2259_v32, %v2258_v31  ;;  %v1656_v37 = vpop.f32.mrf.mxu1 }
 0x1a1   :  { %v1998_v38 = vmul.f32 %v3782_v11, %v1655_v34  ;;  %v1370_v39 = vpop.f32.mrf.mxu0  ;;  %v2196_v41 = vmul.f32 0.2, %v2068_v33  ;;  %vm2132_vm6 = vcmp.ge.f32.partialorder %v2068_v33, 0.0 }
 0x1a2   :  { %3077 = vst [vmem:[%s4100_s4 + $0x90] sm:$0xff] %v2993_v36   ;;  %v1659_v40 = vpop.f32.mrf.mxu1 }
 0x1a3   :  { %v2069_v42 = vadd.f32 %v3787_v15, %v1998_v38  ;;  %v1660_v43 = vadd.f32 %v1659_v40, %v1370_v39  ;;  %v1372_v44 = vpop.f32.mrf.mxu0  ;;  %v2260_v50 = vsel %vm2132_vm6, %v2068_v33, %v2196_v41 }
 0x1a4   :  { %v1661_v45 = vpop.f32.mrf.mxu1 }
 0x1a5   :  { %vm2133_vm7 = vcmp.ge.f32.partialorder %v2069_v42, 0.0  ;;  %v2197_v46 = vmul.f32 0.2, %v2069_v42  ;;  %v1999_v47 = vmul.f32 %v3782_v11, %v1660_v43  ;;  %v1373_v48 = vpop.f32.mrf.mxu0 }
 0x1a6   :  { %v1662_v49 = vpop.f32.mrf.mxu1 }
 0x1a7   :  { %v2261_v51 = vsel %vm2133_vm7, %v2069_v42, %v2197_v46  ;;  %v2070_v52 = vadd.f32 %v3787_v15, %v1999_v47  ;;  %v1663_v53 = vadd.f32 %v1662_v49, %v1373_v48  ;;  %v1375_v54 = vpop.f32.mrf.mxu0 }
 0x1a8   :  { %v2998_v55 = vpack.c.bf16 %v2261_v51, %v2260_v50  ;;  %v1664_v56 = vpop.f32.mrf.mxu1 }
 0x1a9   :  { %v2000_v57 = vmul.f32 %v3782_v11, %v1663_v53  ;;  %v1378_v58 = vpop.f32.mrf.mxu0  ;;  %v2198_v60 = vmul.f32 0.2, %v2070_v52  ;;  %vm2134_vm8 = vcmp.ge.f32.partialorder %v2070_v52, 0.0 }
 0x1aa   :  { %3078 = vst [vmem:[%s4100_s4 + $0x98] sm:$0xff] %v2998_v55   ;;  %v1667_v59 = vpop.f32.mrf.mxu1 }
 0x1ab   :  { %v2071_v61 = vadd.f32 %v3787_v15, %v2000_v57  ;;  %v1668_v62 = vadd.f32 %v1667_v59, %v1378_v58  ;;  %v1380_v63 = vpop.f32.mrf.mxu0  ;;  %v2262_v5 = vsel %vm2134_vm8, %v2070_v52, %v2198_v60 }
 0x1ac   :  { %v1669_v0 = vpop.f32.mrf.mxu1 }
 0x1ad   :  { %vm2135_vm9 = vcmp.ge.f32.partialorder %v2071_v61, 0.0  ;;  %v2199_v1 = vmul.f32 0.2, %v2071_v61  ;;  %v2001_v2 = vmul.f32 %v3782_v11, %v1668_v62  ;;  %v1381_v3 = vpop.f32.mrf.mxu0 }
 0x1ae   :  { %v1670_v4 = vpop.f32.mrf.mxu1 }
 0x1af   :  { %v2263_v6 = vsel %vm2135_vm9, %v2071_v61, %v2199_v1  ;;  %v2072_v8 = vadd.f32 %v4015_v7, %v2001_v2  ;;  %v1671_v15 = vadd.f32 %v1670_v4, %v1381_v3  ;;  %v1383_v9 = vpop.f32.mrf.mxu0 }
 0x1b0   :  { %v3003_v10 = vpack.c.bf16 %v2263_v6, %v2262_v5  ;;  %v1672_v12 = vpop.f32.mrf.mxu1 }
 0x1b1   :  { %v2002_v13 = vmul.f32 %v3782_v11, %v1671_v15  ;;  %v1386_v14 = vpop.f32.mrf.mxu0  ;;  %v2200_v17 = vmul.f32 0.2, %v2072_v8  ;;  %vm2136_vm10 = vcmp.ge.f32.partialorder %v2072_v8, 0.0 }
 0x1b2   :  { %3079 = vst [vmem:[%s4100_s4 + $0xa0] sm:$0xff] %v3003_v10   ;;  %v1675_v16 = vpop.f32.mrf.mxu1 }
 0x1b3   :  { %v2073_v18 = vadd.f32 %v4015_v7, %v2002_v13  ;;  %v1676_v19 = vadd.f32 %v1675_v16, %v1386_v14  ;;  %v1388_v20 = vpop.f32.mrf.mxu0  ;;  %v2264_v26 = vsel %vm2136_vm10, %v2072_v8, %v2200_v17 }
 0x1b4   :  { %v1677_v21 = vpop.f32.mrf.mxu1 }
 0x1b5   :  { %vm2137_vm11 = vcmp.ge.f32.partialorder %v2073_v18, 0.0  ;;  %v2201_v22 = vmul.f32 0.2, %v2073_v18  ;;  %v2003_v23 = vmul.f32 %v3782_v11, %v1676_v19  ;;  %v1389_v24 = vpop.f32.mrf.mxu0 }
 0x1b6   :  { %v1678_v25 = vpop.f32.mrf.mxu1 }
 0x1b7   :  { %v2265_v27 = vsel %vm2137_vm11, %v2073_v18, %v2201_v22  ;;  %v2074_v28 = vadd.f32 %v4015_v7, %v2003_v23  ;;  %v1679_v29 = vadd.f32 %v1678_v25, %v1389_v24  ;;  %v1391_v30 = vpop.f32.mrf.mxu0 }
 0x1b8   :  { %v3008_v31 = vpack.c.bf16 %v2265_v27, %v2264_v26  ;;  %v1680_v32 = vpop.f32.mrf.mxu1 }
 0x1b9   :  { %v2004_v33 = vmul.f32 %v3782_v11, %v1679_v29  ;;  %v1394_v34 = vpop.f32.mrf.mxu0  ;;  %v2202_v36 = vmul.f32 0.2, %v2074_v28  ;;  %vm2138_vm12 = vcmp.ge.f32.partialorder %v2074_v28, 0.0 }
 0x1ba   :  { %3080 = vst [vmem:[%s4100_s4 + $0xa8] sm:$0xff] %v3008_v31   ;;  %v1683_v35 = vpop.f32.mrf.mxu1 }
 0x1bb   :  { %v2075_v37 = vadd.f32 %v4015_v7, %v2004_v33  ;;  %v1684_v38 = vadd.f32 %v1683_v35, %v1394_v34  ;;  %v1396_v39 = vpop.f32.mrf.mxu0  ;;  %v2266_v45 = vsel %vm2138_vm12, %v2074_v28, %v2202_v36 }
 0x1bc   :  { %v1685_v40 = vpop.f32.mrf.mxu1 }
 0x1bd   :  { %vm2139_vm13 = vcmp.ge.f32.partialorder %v2075_v37, 0.0  ;;  %v2203_v41 = vmul.f32 0.2, %v2075_v37  ;;  %v2005_v42 = vmul.f32 %v3782_v11, %v1684_v38  ;;  %v1397_v43 = vpop.f32.mrf.mxu0 }
 0x1be   :  { %v1686_v44 = vpop.f32.mrf.mxu1 }
 0x1bf   :  { %v2267_v46 = vsel %vm2139_vm13, %v2075_v37, %v2203_v41  ;;  %v2076_v47 = vadd.f32 %v4015_v7, %v2005_v42  ;;  %v1687_v48 = vadd.f32 %v1686_v44, %v1397_v43  ;;  %v1399_v49 = vpop.f32.mrf.mxu0 }
 0x1c0   :  { %v3013_v50 = vpack.c.bf16 %v2267_v46, %v2266_v45  ;;  %v1688_v51 = vpop.f32.mrf.mxu1 }
 0x1c1   :  { %v2006_v52 = vmul.f32 %v3782_v11, %v1687_v48  ;;  %v1402_v53 = vpop.f32.mrf.mxu0  ;;  %v2204_v55 = vmul.f32 0.2, %v2076_v47  ;;  %vm2140_vm14 = vcmp.ge.f32.partialorder %v2076_v47, 0.0 }
 0x1c2   :  { %3081 = vst [vmem:[%s4100_s4 + $0xb0] sm:$0xff] %v3013_v50   ;;  %v1691_v54 = vpop.f32.mrf.mxu1 }
 0x1c3   :  { %v2077_v56 = vadd.f32 %v4015_v7, %v2006_v52  ;;  %v1692_v57 = vadd.f32 %v1691_v54, %v1402_v53  ;;  %v1404_v58 = vpop.f32.mrf.mxu0  ;;  %v2268_v0 = vsel %vm2140_vm14, %v2076_v47, %v2204_v55 }
 0x1c4   :  { %v1693_v59 = vpop.f32.mrf.mxu1 }
 0x1c5   :  { %vm2141_vm15 = vcmp.ge.f32.partialorder %v2077_v56, 0.0  ;;  %v2205_v60 = vmul.f32 0.2, %v2077_v56  ;;  %v2007_v61 = vmul.f32 %v3782_v11, %v1692_v57  ;;  %v1405_v62 = vpop.f32.mrf.mxu0 }
 0x1c6   :  { %v1694_v63 = vpop.f32.mrf.mxu1 }
 0x1c7   :  { %v2269_v1 = vsel %vm2141_vm15, %v2077_v56, %v2205_v60  ;;  %v2078_v2 = vadd.f32 %v4015_v7, %v2007_v61  ;;  %v1695_v3 = vadd.f32 %v1694_v63, %v1405_v62  ;;  %v1407_v4 = vpop.f32.mrf.mxu0 }
 0x1c8   :  { %v3018_v5 = vpack.c.bf16 %v2269_v1, %v2268_v0  ;;  %v1696_v6 = vpop.f32.mrf.mxu1 }
 0x1c9   :  { %v2008_v8 = vmul.f32 %v3782_v11, %v1695_v3  ;;  %v1410_v15 = vpop.f32.mrf.mxu0  ;;  %v2206_v10 = vmul.f32 0.2, %v2078_v2  ;;  %vm2142_vm0 = vcmp.ge.f32.partialorder %v2078_v2, 0.0 }
 0x1ca   :  { %3082 = vst [vmem:[%s4100_s4 + $0xb8] sm:$0xff] %v3018_v5   ;;  %v1699_v9 = vpop.f32.mrf.mxu1 }
 0x1cb   :  { %v2079_v12 = vadd.f32 %v4015_v7, %v2008_v8  ;;  %v1700_v13 = vadd.f32 %v1699_v9, %v1410_v15  ;;  %v1412_v14 = vpop.f32.mrf.mxu0  ;;  %v2270_v21 = vsel %vm2142_vm0, %v2078_v2, %v2206_v10 }
 0x1cc   :  { %v1701_v16 = vpop.f32.mrf.mxu1 }
 0x1cd   :  { %vm2143_vm1 = vcmp.ge.f32.partialorder %v2079_v12, 0.0  ;;  %v2207_v17 = vmul.f32 0.2, %v2079_v12  ;;  %v2009_v18 = vmul.f32 %v3782_v11, %v1700_v13  ;;  %v1413_v19 = vpop.f32.mrf.mxu0 }
 0x1ce   :  { %v1702_v20 = vpop.f32.mrf.mxu1 }
 0x1cf   :  { %v2271_v22 = vsel %vm2143_vm1, %v2079_v12, %v2207_v17  ;;  %v2080_v23 = vadd.f32 %v4015_v7, %v2009_v18  ;;  %v1703_v24 = vadd.f32 %v1702_v20, %v1413_v19  ;;  %v1415_v25 = vpop.f32.mrf.mxu0 }
 0x1d0   :  { %v3023_v26 = vpack.c.bf16 %v2271_v22, %v2270_v21  ;;  %v1704_v27 = vpop.f32.mrf.mxu1 }
 0x1d1   :  { %v2010_v28 = vmul.f32 %v3782_v11, %v1703_v24  ;;  %v1418_v29 = vpop.f32.mrf.mxu0  ;;  %v2208_v31 = vmul.f32 0.2, %v2080_v23  ;;  %vm2144_vm2 = vcmp.ge.f32.partialorder %v2080_v23, 0.0 }
 0x1d2   :  { %3083 = vst [vmem:[%s4100_s4 + $0xc0] sm:$0xff] %v3023_v26   ;;  %v1707_v30 = vpop.f32.mrf.mxu1 }
 0x1d3   :  { %v2081_v32 = vadd.f32 %v4015_v7, %v2010_v28  ;;  %v1708_v33 = vadd.f32 %v1707_v30, %v1418_v29  ;;  %v1420_v34 = vpop.f32.mrf.mxu0  ;;  %v2272_v40 = vsel %vm2144_vm2, %v2080_v23, %v2208_v31 }
 0x1d4   :  { %v1709_v35 = vpop.f32.mrf.mxu1 }
 0x1d5   :  { %vm2145_vm3 = vcmp.ge.f32.partialorder %v2081_v32, 0.0  ;;  %v2209_v36 = vmul.f32 0.2, %v2081_v32  ;;  %v2011_v37 = vmul.f32 %v3782_v11, %v1708_v33  ;;  %v1421_v38 = vpop.f32.mrf.mxu0 }
 0x1d6   :  { %v1710_v39 = vpop.f32.mrf.mxu1 }
 0x1d7   :  { %v2273_v41 = vsel %vm2145_vm3, %v2081_v32, %v2209_v36  ;;  %v2082_v42 = vadd.f32 %v4015_v7, %v2011_v37  ;;  %v1711_v43 = vadd.f32 %v1710_v39, %v1421_v38  ;;  %v1423_v44 = vpop.f32.mrf.mxu0 }
 0x1d8   :  { %v3028_v45 = vpack.c.bf16 %v2273_v41, %v2272_v40  ;;  %v1712_v46 = vpop.f32.mrf.mxu1 }
 0x1d9   :  { %v2012_v47 = vmul.f32 %v3782_v11, %v1711_v43  ;;  %v1426_v48 = vpop.f32.mrf.mxu0  ;;  %v2210_v50 = vmul.f32 0.2, %v2082_v42  ;;  %vm2146_vm4 = vcmp.ge.f32.partialorder %v2082_v42, 0.0 }
 0x1da   :  { %3084 = vst [vmem:[%s4100_s4 + $0xc8] sm:$0xff] %v3028_v45   ;;  %v1715_v49 = vpop.f32.mrf.mxu1 }
 0x1db   :  { %v2083_v51 = vadd.f32 %v4015_v7, %v2012_v47  ;;  %v1716_v52 = vadd.f32 %v1715_v49, %v1426_v48  ;;  %v1428_v53 = vpop.f32.mrf.mxu0  ;;  %v2274_v59 = vsel %vm2146_vm4, %v2082_v42, %v2210_v50 }
 0x1dc   :  { %v1717_v54 = vpop.f32.mrf.mxu1 }
 0x1dd   :  { %vm2147_vm5 = vcmp.ge.f32.partialorder %v2083_v51, 0.0  ;;  %v2211_v55 = vmul.f32 0.2, %v2083_v51  ;;  %v2013_v56 = vmul.f32 %v3782_v11, %v1716_v52  ;;  %v1429_v57 = vpop.f32.mrf.mxu0 }
 0x1de   :  { %v1718_v58 = vpop.f32.mrf.mxu1 }
 0x1df   :  { %v2275_v60 = vsel %vm2147_vm5, %v2083_v51, %v2211_v55  ;;  %v2084_v61 = vadd.f32 %v4015_v7, %v2013_v56  ;;  %v1719_v62 = vadd.f32 %v1718_v58, %v1429_v57  ;;  %v1431_v63 = vpop.f32.mrf.mxu0 }
 0x1e0   :  { %v3033_v0 = vpack.c.bf16 %v2275_v60, %v2274_v59  ;;  %v1720_v1 = vpop.f32.mrf.mxu1 }
 0x1e1   :  { %v2014_v2 = vmul.f32 %v3782_v11, %v1719_v62  ;;  %v1434_v3 = vpop.f32.mrf.mxu0  ;;  %v2212_v5 = vmul.f32 0.2, %v2084_v61  ;;  %vm2148_vm6 = vcmp.ge.f32.partialorder %v2084_v61, 0.0 }
 0x1e2   :  { %3085 = vst [vmem:[%s4100_s4 + $0xd0] sm:$0xff] %v3033_v0   ;;  %v1723_v4 = vpop.f32.mrf.mxu1 }
 0x1e3   :  { %v2085_v6 = vadd.f32 %v4015_v7, %v2014_v2  ;;  %v1724_v8 = vadd.f32 %v1723_v4, %v1434_v3  ;;  %v1436_v15 = vpop.f32.mrf.mxu0  ;;  %v2276_v16 = vsel %vm2148_vm6, %v2084_v61, %v2212_v5 }
 0x1e4   :  { %v1725_v9 = vpop.f32.mrf.mxu1 }
 0x1e5   :  { %vm2149_vm7 = vcmp.ge.f32.partialorder %v2085_v6, 0.0  ;;  %v2213_v10 = vmul.f32 0.2, %v2085_v6  ;;  %v2015_v12 = vmul.f32 %v3782_v11, %v1724_v8  ;;  %v1437_v13 = vpop.f32.mrf.mxu0 }
 0x1e6   :  { %v1726_v14 = vpop.f32.mrf.mxu1 }
 0x1e7   :  { %v2277_v17 = vsel %vm2149_vm7, %v2085_v6, %v2213_v10  ;;  %v2086_v18 = vadd.f32 %v4015_v7, %v2015_v12  ;;  %v1727_v19 = vadd.f32 %v1726_v14, %v1437_v13  ;;  %v1439_v20 = vpop.f32.mrf.mxu0 }
 0x1e8   :  { %v3038_v21 = vpack.c.bf16 %v2277_v17, %v2276_v16  ;;  %v1728_v22 = vpop.f32.mrf.mxu1 }
 0x1e9   :  { %v2016_v23 = vmul.f32 %v3782_v11, %v1727_v19  ;;  %v1442_v24 = vpop.f32.mrf.mxu0  ;;  %v2214_v26 = vmul.f32 0.2, %v2086_v18  ;;  %vm2150_vm8 = vcmp.ge.f32.partialorder %v2086_v18, 0.0 }
 0x1ea   :  { %3086 = vst [vmem:[%s4100_s4 + $0xd8] sm:$0xff] %v3038_v21   ;;  %v1731_v25 = vpop.f32.mrf.mxu1 }
 0x1eb   :  { %v2087_v27 = vadd.f32 %v4015_v7, %v2016_v23  ;;  %v1732_v28 = vadd.f32 %v1731_v25, %v1442_v24  ;;  %v1444_v29 = vpop.f32.mrf.mxu0  ;;  %v2278_v35 = vsel %vm2150_vm8, %v2086_v18, %v2214_v26 }
 0x1ec   :  { %v1733_v30 = vpop.f32.mrf.mxu1 }
 0x1ed   :  { %vm2151_vm9 = vcmp.ge.f32.partialorder %v2087_v27, 0.0  ;;  %v2215_v31 = vmul.f32 0.2, %v2087_v27  ;;  %v2017_v32 = vmul.f32 %v3782_v11, %v1732_v28  ;;  %v1445_v33 = vpop.f32.mrf.mxu0 }
 0x1ee   :  { %v1734_v34 = vpop.f32.mrf.mxu1 }
 0x1ef   :  { %v2279_v36 = vsel %vm2151_vm9, %v2087_v27, %v2215_v31  ;;  %v2088_v37 = vadd.f32 %v4015_v7, %v2017_v32  ;;  %v1735_v38 = vadd.f32 %v1734_v34, %v1445_v33  ;;  %v1447_v39 = vpop.f32.mrf.mxu0 }
 0x1f0   :  { %v3043_v40 = vpack.c.bf16 %v2279_v36, %v2278_v35  ;;  %v1736_v41 = vpop.f32.mrf.mxu1 }
 0x1f1   :  { %v2018_v42 = vmul.f32 %v3782_v11, %v1735_v38  ;;  %v1450_v43 = vpop.f32.mrf.mxu0  ;;  %v2216_v45 = vmul.f32 0.2, %v2088_v37  ;;  %vm2152_vm10 = vcmp.ge.f32.partialorder %v2088_v37, 0.0 }
 0x1f2   :  { %3087 = vst [vmem:[%s4100_s4 + $0xe0] sm:$0xff] %v3043_v40   ;;  %v1739_v44 = vpop.f32.mrf.mxu1 }
 0x1f3   :  { %v2089_v46 = vadd.f32 %v4015_v7, %v2018_v42  ;;  %v1740_v47 = vadd.f32 %v1739_v44, %v1450_v43  ;;  %v1452_v48 = vpop.f32.mrf.mxu0  ;;  %v2280_v54 = vsel %vm2152_vm10, %v2088_v37, %v2216_v45 }
 0x1f4   :  { %v1741_v49 = vpop.f32.mrf.mxu1 }
 0x1f5   :  { %vm2153_vm11 = vcmp.ge.f32.partialorder %v2089_v46, 0.0  ;;  %v2217_v50 = vmul.f32 0.2, %v2089_v46  ;;  %v2019_v51 = vmul.f32 %v3782_v11, %v1740_v47  ;;  %v1453_v52 = vpop.f32.mrf.mxu0 }
 0x1f6   :  { %v1742_v53 = vpop.f32.mrf.mxu1 }
 0x1f7   :  { %v2281_v55 = vsel %vm2153_vm11, %v2089_v46, %v2217_v50  ;;  %v2090_v56 = vadd.f32 %v4015_v7, %v2019_v51  ;;  %v1743_v57 = vadd.f32 %v1742_v53, %v1453_v52  ;;  %v1455_v58 = vpop.f32.mrf.mxu0 }
 0x1f8   :  { %v3048_v59 = vpack.c.bf16 %v2281_v55, %v2280_v54  ;;  %v1744_v60 = vpop.f32.mrf.mxu1 }
 0x1f9   :  { %v2020_v61 = vmul.f32 %v3782_v11, %v1743_v57  ;;  %v1458_v62 = vpop.f32.mrf.mxu0  ;;  %v2218_v0 = vmul.f32 0.2, %v2090_v56  ;;  %vm2154_vm12 = vcmp.ge.f32.partialorder %v2090_v56, 0.0 }
 0x1fa   :  { %3088 = vst [vmem:[%s4100_s4 + $0xe8] sm:$0xff] %v3048_v59   ;;  %v1747_v63 = vpop.f32.mrf.mxu1 }
 0x1fb   :  { %v2091_v1 = vadd.f32 %v4015_v7, %v2020_v61  ;;  %v1748_v2 = vadd.f32 %v1747_v63, %v1458_v62  ;;  %v1460_v3 = vpop.f32.mrf.mxu0  ;;  %v2282_v9 = vsel %vm2154_vm12, %v2090_v56, %v2218_v0 }
 0x1fc   :  { %v1749_v4 = vpop.f32.mrf.mxu1 }
 0x1fd   :  { %vm2155_vm13 = vcmp.ge.f32.partialorder %v2091_v1, 0.0  ;;  %v2219_v5 = vmul.f32 0.2, %v2091_v1  ;;  %v2021_v6 = vmul.f32 %v3782_v11, %v1748_v2  ;;  %v1461_v8 = vpop.f32.mrf.mxu0 }
 0x1fe   :  { %v1750_v15 = vpop.f32.mrf.mxu1 }
 0x1ff   :  { %v2283_v10 = vsel %vm2155_vm13, %v2091_v1, %v2219_v5  ;;  %v2092_v12 = vadd.f32 %v4015_v7, %v2021_v6  ;;  %v1751_v13 = vadd.f32 %v1750_v15, %v1461_v8  ;;  %v1463_v14 = vpop.f32.mrf.mxu0 }
 0x200   :  { %v3053_v16 = vpack.c.bf16 %v2283_v10, %v2282_v9  ;;  %v1752_v17 = vpop.f32.mrf.mxu1 }
 0x201   :  { %v2022_v18 = vmul.f32 %v3782_v11, %v1751_v13  ;;  %v2220_v19 = vmul.f32 0.2, %v2092_v12  ;;  %vm2156_vm14 = vcmp.ge.f32.partialorder %v2092_v12, 0.0 }
 0x202   :  { %3089 = vst [vmem:[%s4100_s4 + $0xf0] sm:$0xff] %v3053_v16  }
 0x203   :  { %v2093_v20 = vadd.f32 %v4015_v7, %v2022_v18  ;;  %v2284_v22 = vsel %vm2156_vm14, %v2092_v12, %v2220_v19 }
 0x205   :  { %vm2157_vm15 = vcmp.ge.f32.partialorder %v2093_v20, 0.0  ;;  %v2221_v21 = vmul.f32 0.2, %v2093_v20 }
 0x207   :  { %v2285_v23 = vsel %vm2157_vm15, %v2093_v20, %v2221_v21 }
 0x208   :  { %v3058_v24 = vpack.c.bf16 %v2285_v23, %v2284_v22 }
 0x20a   :  { %3090 = vst [vmem:[%s4100_s4 + $0xf8] sm:$0xff] %v3058_v24  }

// kernel: discriminator_forward.6
= control target key start
LH: loop header
LB: loop body
LE: loop exit
PB: predicated region body
PF: predicated region fallthrough
CT: control target
= control target key end

     0   :  { %s2113_s0 = inlined_call_operand.vmem [shape: bf16[128,1024], index: 0, kind: input, shape index: {}]   ;;  %s2114_s1 = inlined_call_operand.vmem [shape: bf16[1024,128], index: 1, kind: input, shape index: {}]   ;;  %s2115_s2 = inlined_call_operand.vmem [shape: f32[1,128], index: 2, kind: input, shape index: {}]   ;;  %s2116_s3 = inlined_call_operand.<no memory space> [shape: f32[1,1], index: 3, kind: input, shape index: {}]   ;;  %s2117_s4 = inlined_call_operand.vmem [shape: bf16[128,128], index: 4, kind: output, shape index: {}]  }
   0x1   :  { %v9_v0 = vstv %s2116_s3 }
   0x2   :  { %10 = vst [vmem:[#allocation3] sm:$0x1] %v9_v0 }
   0x3   :  { %s1867_s17 = smov 0   ;;  %s1869_s18 = smov 0  }
   0x4   :  { %s1871_s19 = smov 0   ;;  %s1873_s20 = smov 0  }
   0x5   :  { %s1875_s21 = smov 0  }
   0x6 LB: > { %s28_s3 = sadd.s32 1, %s1831_s20  ;;  %p51_p1 = scmp.ne.s32.totalorder %s1823_s18, %s1819_s17  ;;  %s1835_s21 = sphi %s1875_s21, %s16_s21   ;;  %s1831_s20 = sphi %s1873_s20, %s2121_s20   ;;  %s1827_s19 = sphi %s1871_s19, %s2120_s19   ;;  %s1823_s18 = sphi %s1869_s18, %s2119_s18   ;;  %s1819_s17 = sphi %s1867_s17, %s2118_s17  }
   0x7   : > { %p29_p0 = scmp.ge.s32.totalorder %s28_s3, 2  ;;  %p52_p2 = scmp.eq.s32.totalorder %s1835_s21, 0 }
   0x8   : > { %s44_s23 = sadd.s32 1, %s1823_s18  ;;  %p1386_p5 = scmp.ge.s32.totalorder %s1835_s21, 2 }
   0x9   : > { %s2123_s3 = smov (%p29_p0, %s28_s3), 0  ;;  %p53_p3 = por %p52_p2, %p51_p1 }
   0xa   : > { %s40_s22 = ssub.s32 %s1831_s20, %s2123_s3  ;;  %189 = sbr.rel (%p1386_p5) target bundleno = 35 (0x23), region = 24 }
   0xb   : > { %p42_p4 = scmp.eq.s32.totalorder %s40_s22, 0 }
   0xd   : > { %s1902_s24 = scalar_select %p42_p4, %s1823_s18, %s44_s23  }
   0xf   : > { %192 = sbr.rel (!%p53_p3) target bundleno = 35 (0x23), region = 28  ;;  %s194_s25 = sand.u32 (%p53_p3), 1, %s1823_s18  }
  0x10   : > { %s1482_s26 = sshll.u32 (%p53_p3), %s1831_s20, 4  ;;  %s1387_s27 = sshll.u32 (%p53_p3), %s194_s25, 8 }
  0x11   : > { %s1910_s30 = scalar_lea.vmem (%p53_p3), %s2113_s0, %s1482_s26  ;;  %s1915_s5 = scalar_lea.vmem (%p53_p3), [#allocation4], %s1387_s27 }
  0x12   : > { %v215_v1 = vld [vmem:[%s1910_s30] sm:$0xff] (%p53_p3)  ;;  %v217_v2 = vld [vmem:[%s1910_s30 + $0x8] sm:$0xff] (%p53_p3) }
  0x13   : > { %v219_v3 = vld [vmem:[%s1910_s30 + $0x20] sm:$0xff] (%p53_p3)  ;;  %216 = vst [vmem:[%s1915_s5] sm:$0xff] (%p53_p3), %v215_v1  ;;  %218 = vst [vmem:[%s1915_s5 + $0x8] sm:$0xff] (%p53_p3), %v217_v2  ;;  %v221_v4 = vld [vmem:[%s1910_s30 + $0x28] sm:$0xff] (%p53_p3) }
  0x14   : > { %220 = vst [vmem:[%s1915_s5 + $0x10] sm:$0xff] %v219_v3  ;;  %v223_v5 = vld [vmem:[%s1910_s30 + $0x40] sm:$0xff]  ;;  %v225_v6 = vld [vmem:[%s1910_s30 + $0x48] sm:$0xff]  ;;  %222 = vst [vmem:[%s1915_s5 + $0x18] sm:$0xff] %v221_v4 }
  0x15   : > { %224 = vst [vmem:[%s1915_s5 + $0x20] sm:$0xff] %v223_v5  ;;  %226 = vst [vmem:[%s1915_s5 + $0x28] sm:$0xff] %v225_v6  ;;  %v227_v7 = vld [vmem:[%s1910_s30 + $0x60] sm:$0xff]  ;;  %v229_v8 = vld [vmem:[%s1910_s30 + $0x68] sm:$0xff] }
  0x16   : > { %v231_v9 = vld [vmem:[%s1910_s30 + $0x80] sm:$0xff]  ;;  %228 = vst [vmem:[%s1915_s5 + $0x30] sm:$0xff] %v227_v7  ;;  %230 = vst [vmem:[%s1915_s5 + $0x38] sm:$0xff] %v229_v8  ;;  %v233_v10 = vld [vmem:[%s1910_s30 + $0x88] sm:$0xff] }
  0x17   : > { %232 = vst [vmem:[%s1915_s5 + $0x40] sm:$0xff] %v231_v9  ;;  %v235_v11 = vld [vmem:[%s1910_s30 + $0xa0] sm:$0xff]  ;;  %v237_v12 = vld [vmem:[%s1910_s30 + $0xa8] sm:$0xff]  ;;  %234 = vst [vmem:[%s1915_s5 + $0x48] sm:$0xff] %v233_v10 }
  0x18   : > { %236 = vst [vmem:[%s1915_s5 + $0x50] sm:$0xff] %v235_v11  ;;  %238 = vst [vmem:[%s1915_s5 + $0x58] sm:$0xff] %v237_v12  ;;  %v239_v13 = vld [vmem:[%s1910_s30 + $0xc0] sm:$0xff]  ;;  %v241_v14 = vld [vmem:[%s1910_s30 + $0xc8] sm:$0xff] }
  0x19   : > { %v243_v15 = vld [vmem:[%s1910_s30 + $0xe0] sm:$0xff]  ;;  %240 = vst [vmem:[%s1915_s5 + $0x60] sm:$0xff] %v239_v13  ;;  %242 = vst [vmem:[%s1915_s5 + $0x68] sm:$0xff] %v241_v14  ;;  %v245_v16 = vld [vmem:[%s1910_s30 + $0xe8] sm:$0xff] }
  0x1a   : > { %244 = vst [vmem:[%s1915_s5 + $0x70] sm:$0xff] %v243_v15  ;;  %v247_v17 = vld [vmem:[%s1910_s30 + $0x100] sm:$0xff]  ;;  %v249_v18 = vld [vmem:[%s1910_s30 + $0x108] sm:$0xff]  ;;  %246 = vst [vmem:[%s1915_s5 + $0x78] sm:$0xff] %v245_v16 }
  0x1b   : > { %248 = vst [vmem:[%s1915_s5 + $0x80] sm:$0xff] %v247_v17  ;;  %250 = vst [vmem:[%s1915_s5 + $0x88] sm:$0xff] %v249_v18  ;;  %v251_v19 = vld [vmem:[%s1910_s30 + $0x120] sm:$0xff]  ;;  %v253_v20 = vld [vmem:[%s1910_s30 + $0x128] sm:$0xff] }
  0x1c   : > { %v255_v21 = vld [vmem:[%s1910_s30 + $0x140] sm:$0xff]  ;;  %252 = vst [vmem:[%s1915_s5 + $0x90] sm:$0xff] %v251_v19  ;;  %254 = vst [vmem:[%s1915_s5 + $0x98] sm:$0xff] %v253_v20  ;;  %v257_v22 = vld [vmem:[%s1910_s30 + $0x148] sm:$0xff] }
  0x1d   : > { %256 = vst [vmem:[%s1915_s5 + $0xa0] sm:$0xff] %v255_v21  ;;  %v259_v23 = vld [vmem:[%s1910_s30 + $0x160] sm:$0xff]  ;;  %v261_v24 = vld [vmem:[%s1910_s30 + $0x168] sm:$0xff]  ;;  %258 = vst [vmem:[%s1915_s5 + $0xa8] sm:$0xff] %v257_v22 }
  0x1e   : > { %260 = vst [vmem:[%s1915_s5 + $0xb0] sm:$0xff] %v259_v23  ;;  %262 = vst [vmem:[%s1915_s5 + $0xb8] sm:$0xff] %v261_v24  ;;  %v263_v25 = vld [vmem:[%s1910_s30 + $0x180] sm:$0xff]  ;;  %v265_v26 = vld [vmem:[%s1910_s30 + $0x188] sm:$0xff] }
  0x1f   : > { %v267_v27 = vld [vmem:[%s1910_s30 + $0x1a0] sm:$0xff]  ;;  %264 = vst [vmem:[%s1915_s5 + $0xc0] sm:$0xff] %v263_v25  ;;  %266 = vst [vmem:[%s1915_s5 + $0xc8] sm:$0xff] %v265_v26  ;;  %v269_v28 = vld [vmem:[%s1910_s30 + $0x1a8] sm:$0xff] }
  0x20   : > { %268 = vst [vmem:[%s1915_s5 + $0xd0] sm:$0xff] %v267_v27  ;;  %v271_v29 = vld [vmem:[%s1910_s30 + $0x1c0] sm:$0xff]  ;;  %v273_v30 = vld [vmem:[%s1910_s30 + $0x1c8] sm:$0xff]  ;;  %270 = vst [vmem:[%s1915_s5 + $0xd8] sm:$0xff] %v269_v28 }
  0x21   : > { %272 = vst [vmem:[%s1915_s5 + $0xe0] sm:$0xff] %v271_v29  ;;  %274 = vst [vmem:[%s1915_s5 + $0xe8] sm:$0xff] %v273_v30  ;;  %v275_v31 = vld [vmem:[%s1910_s30 + $0x1e0] sm:$0xff]  ;;  %v277_v32 = vld [vmem:[%s1910_s30 + $0x1e8] sm:$0xff] }
  0x22   : > { %276 = vst [vmem:[%s1915_s5 + $0xf0] sm:$0xff] %v275_v31  ;;  %278 = vst [vmem:[%s1915_s5 + $0xf8] sm:$0xff] %v277_v32 }
  0x23 PF: > { %p1390_p6 = scmp.ge.s32.totalorder %s1835_s21, 1  ;;  %p295_p7 = scmp.lt.s32.totalorder %s1835_s21, 3 }
  0x25   : > { %p296_p8 = pnand %p1390_p6, %p295_p7 }
  0x26   : > { %s302_s6 = sand.u32 (!%p296_p8), 1, %s1819_s17   ;;  %s1392_s7 = sshll.u32 (!%p296_p8), %s1827_s19, 6 }
  0x27   : > { %299 = sbr.rel (%p296_p8) target bundleno = 507 (0x1fb), region = 55  ;;  %s1391_s8 = sshll.u32 (!%p296_p8), %s302_s6, 8 }
  0x28   : > { %p344_p9 = scmp.lt.s32.totalorder (!%p296_p8), %s1392_s7, 127  ;;  %s1987_s13 = scalar_lea.vmem (!%p296_p8), [#allocation4], %s1391_s8 }
  0x29   : > { %p1394_p10 = scmp.ne.s32.totalorder (!%p296_p8), %s1827_s19, 0 }
  0x2c   : > { %s2125_s7 = smov (!%p344_p9, %s1392_s7), 127  ;;  %368 = sbr.rel (%p1394_p10) target bundleno = 58 (0x3a), region = 63 }
  0x2d   : > { %s1393_s9 = sshll.u32 %s2125_s7, 2 }
  0x2e   : > { %s1985_s12 = scalar_lea.vmem %s2114_s1, %s1393_s9 }
  0x31   : > { %v1837_v33 = vmov 0.0  }
  0x32   : > { %369 = vst [vmem:[#allocation2 + $0x30] sm:$0xff] %v1837_v33  ;;  %370 = vst [vmem:[#allocation2] sm:$0xff] %v1837_v33 }
  0x33   : > { %371 = vst [vmem:[#allocation2 + $0x58] sm:$0xff] %v1837_v33  ;;  %372 = vst [vmem:[#allocation2 + $0x18] sm:$0xff] %v1837_v33 }
  0x34   : > { %373 = vst [vmem:[#allocation2 + $0x50] sm:$0xff] %v1837_v33  ;;  %374 = vst [vmem:[#allocation2 + $0x68] sm:$0xff] %v1837_v33 }
  0x35   : > { %375 = vst [vmem:[#allocation2 + $0x8] sm:$0xff] %v1837_v33  ;;  %376 = vst [vmem:[#allocation2 + $0x48] sm:$0xff] %v1837_v33 }
  0x36   : > { %377 = vst [vmem:[#allocation2 + $0x40] sm:$0xff] %v1837_v33  ;;  %378 = vst [vmem:[#allocation2 + $0x20] sm:$0xff] %v1837_v33 }
  0x37   : > { %379 = vst [vmem:[#allocation2 + $0x10] sm:$0xff] %v1837_v33  ;;  %380 = vst [vmem:[#allocation2 + $0x38] sm:$0xff] %v1837_v33 }
  0x38   : > { %381 = vst [vmem:[#allocation2 + $0x60] sm:$0xff] %v1837_v33  ;;  %382 = vst [vmem:[#allocation2 + $0x70] sm:$0xff] %v1837_v33 }
  0x39   : > { %383 = vst [vmem:[#allocation2 + $0x78] sm:$0xff] %v1837_v33  ;;  %384 = vst [vmem:[#allocation2 + $0x28] sm:$0xff] %v1837_v33 }
  0x3a PF: > { %v1716_v34 = vld [vmem:[%s1985_s12 + $0x78] sm:$0xff]   ;;  %v1720_v38 = vld [vmem:[%s1985_s12 + $0x70] sm:$0xff]   ;;  %v1724_v42 = vld [vmem:[%s1985_s12 + $0x68] sm:$0xff]   ;;  %p1459_p11 = scmp.ne.s32.totalorder %s1827_s19, 1 }
  0x3b   : > { %v1717_v35 = vld [vmem:[%s1985_s12 + $0xf8] sm:$0xff]   ;;  %1546 = vmatprep.subr.bf16.mxu0 %v1716_v34  ;;  %v1721_v39 = vld [vmem:[%s1985_s12 + $0xf0] sm:$0xff]   ;;  %v1725_v43 = vld [vmem:[%s1985_s12 + $0xe8] sm:$0xff]  }
  0x3c   : > { %v1718_v36 = vld [vmem:[%s1985_s12 + $0x38] sm:$0xff]   ;;  %1610 = vmatprep.subr.bf16.mxu1 %v1717_v35  ;;  %v1722_v40 = vld [vmem:[%s1985_s12 + $0x30] sm:$0xff]   ;;  %v1726_v44 = vld [vmem:[%s1985_s12 + $0x28] sm:$0xff]  }
  0x3d   : > { %v1719_v37 = vld [vmem:[%s1985_s12 + $0xb8] sm:$0xff]   ;;  %1547 = vmatpush3.bf16.msra.mxu0 %v1718_v36  ;;  %v1723_v41 = vld [vmem:[%s1985_s12 + $0xb0] sm:$0xff]   ;;  %v1727_v45 = vld [vmem:[%s1985_s12 + $0xa8] sm:$0xff]  }
  0x3e   : > { %1611 = vmatpush3.bf16.msra.mxu1 %v1719_v37  ;;  %1548 = vmatprep.subr.bf16.mxu0 %v1720_v38  ;;  %v1728_v46 = vld [vmem:[%s1985_s12 + $0x60] sm:$0xff]   ;;  %v1732_v50 = vld [vmem:[%s1985_s12 + $0x58] sm:$0xff]   ;;  %v1736_v54 = vld [vmem:[%s1985_s12 + $0x50] sm:$0xff]  }
  0x3f   : > { %1612 = vmatprep.subr.bf16.mxu1 %v1721_v39  ;;  %v1729_v47 = vld [vmem:[%s1985_s12 + $0xe0] sm:$0xff]   ;;  %v1733_v51 = vld [vmem:[%s1985_s12 + $0xd8] sm:$0xff]   ;;  %v1737_v55 = vld [vmem:[%s1985_s12 + $0xd0] sm:$0xff]  }
  0x40   : > { %v1730_v48 = vld [vmem:[%s1985_s12 + $0x20] sm:$0xff]   ;;  %v1734_v52 = vld [vmem:[%s1985_s12 + $0x18] sm:$0xff]   ;;  %v1738_v56 = vld [vmem:[%s1985_s12 + $0x10] sm:$0xff]  }
  0x41   : > { %1549 = vmatpush3.bf16.msra.mxu0 %v1722_v40  ;;  %v1731_v49 = vld [vmem:[%s1985_s12 + $0xa0] sm:$0xff]   ;;  %v1735_v53 = vld [vmem:[%s1985_s12 + $0x98] sm:$0xff]   ;;  %v1739_v57 = vld [vmem:[%s1985_s12 + $0x90] sm:$0xff]  }
  0x42   : > { %1613 = vmatpush3.bf16.msra.mxu1 %v1723_v41  ;;  %1550 = vmatprep.subr.bf16.mxu0 %v1724_v42  ;;  %v1740_v58 = vld [vmem:[%s1985_s12 + $0x48] sm:$0xff]   ;;  %v1744_v62 = vld [vmem:[%s1985_s12 + $0x40] sm:$0xff]   ;;  %v385_v41 = vld [vmem:[#allocation2 + $0x30] sm:$0xff] }
  0x43   : > { %1614 = vmatprep.subr.bf16.mxu1 %v1725_v43  ;;  %v1741_v59 = vld [vmem:[%s1985_s12 + $0xc8] sm:$0xff]   ;;  %v1745_v63 = vld [vmem:[%s1985_s12 + $0xc0] sm:$0xff]  }
  0x44   : > { %v1742_v60 = vld [vmem:[%s1985_s12 + $0x8] sm:$0xff]   ;;  %v1746_v0 = vld [vmem:[%s1985_s12] sm:$0xff]  }
  0x45   : > { %1551 = vmatpush3.bf16.msra.mxu0 %v1726_v44  ;;  %v1743_v61 = vld [vmem:[%s1985_s12 + $0x88] sm:$0xff]   ;;  %v1747_v1 = vld [vmem:[%s1985_s12 + $0x80] sm:$0xff]  }
  0x46   : > { %1615 = vmatpush3.bf16.msra.mxu1 %v1727_v45  ;;  %1552 = vmatprep.subr.bf16.mxu0 %v1728_v46  ;;  %v1748_v2 = vld [vmem:[%s1987_s13] ss:$16 sps:$4 sm:$0xff]   ;;  %v1750_v3 = vld [vmem:[%s1987_s13 + $0x4] ss:$16 sps:$4 sm:$0xff]   ;;  %v1751_v4 = vld [vmem:[%s1987_s13 + $0x8] ss:$16 sps:$4 sm:$0xff]  }
  0x47   : > { %1616 = vmatprep.subr.bf16.mxu1 %v1729_v47  ;;  %v1753_v5 = vld [vmem:[%s1987_s13 + $0xc] ss:$16 sps:$4 sm:$0xff]   ;;  %881 = vmatprep.mubr.bf16.mxu0 %v1750_v3  ;;  %v1754_v6 = vld [vmem:[%s1987_s13 + $0x24] ss:$16 sps:$4 sm:$0xff]   ;;  %v1758_v8 = vld [vmem:[%s1987_s13 + $0x20] ss:$16 sps:$4 sm:$0xff]  }
  0x48   : > { %978 = vmatprep.mubr.bf16.mxu1 %v1753_v5  ;;  %v1756_v7 = vld [vmem:[%s1987_s13 + $0x2c] ss:$16 sps:$4 sm:$0xff]   ;;  %v1759_v9 = vld [vmem:[%s1987_s13 + $0x28] ss:$16 sps:$4 sm:$0xff]   ;;  %v1760_v10 = vld [vmem:[%s1987_s13 + $0x44] ss:$16 sps:$4 sm:$0xff]  }
  0x49   : > { %1553 = vmatpush3.bf16.msra.mxu0 %v1730_v48  ;;  %v1762_v11 = vld [vmem:[%s1987_s13 + $0x4c] ss:$16 sps:$4 sm:$0xff]   ;;  %v1764_v12 = vld [vmem:[%s1987_s13 + $0x40] ss:$16 sps:$4 sm:$0xff]   ;;  %v1765_v13 = vld [vmem:[%s1987_s13 + $0x48] ss:$16 sps:$4 sm:$0xff]  }
  0x4a   : > { %1617 = vmatpush3.bf16.msra.mxu1 %v1731_v49  ;;  %1554 = vmatprep.subr.bf16.mxu0 %v1732_v50  ;;  %v1766_v14 = vld [vmem:[%s1987_s13 + $0x64] ss:$16 sps:$4 sm:$0xff]   ;;  %v1768_v15 = vld [vmem:[%s1987_s13 + $0x6c] ss:$16 sps:$4 sm:$0xff]   ;;  %v1770_v16 = vld [vmem:[%s1987_s13 + $0x60] ss:$16 sps:$4 sm:$0xff]  }
  0x4b   : > { %1618 = vmatprep.subr.bf16.mxu1 %v1733_v51  ;;  %v1771_v17 = vld [vmem:[%s1987_s13 + $0x68] ss:$16 sps:$4 sm:$0xff]   ;;  %v1772_v18 = vld [vmem:[%s1987_s13 + $0x84] ss:$16 sps:$4 sm:$0xff]   ;;  %v1774_v19 = vld [vmem:[%s1987_s13 + $0x8c] ss:$16 sps:$4 sm:$0xff]  }
  0x4c   : > { %v1776_v20 = vld [vmem:[%s1987_s13 + $0x80] ss:$16 sps:$4 sm:$0xff]   ;;  %v1777_v21 = vld [vmem:[%s1987_s13 + $0x88] ss:$16 sps:$4 sm:$0xff]   ;;  %v1778_v22 = vld [vmem:[%s1987_s13 + $0xa4] ss:$16 sps:$4 sm:$0xff]  }
  0x4d   : > { %1555 = vmatpush3.bf16.msra.mxu0 %v1734_v52  ;;  %v1780_v23 = vld [vmem:[%s1987_s13 + $0xac] ss:$16 sps:$4 sm:$0xff]   ;;  %v1782_v24 = vld [vmem:[%s1987_s13 + $0xa0] ss:$16 sps:$4 sm:$0xff]   ;;  %v1783_v25 = vld [vmem:[%s1987_s13 + $0xa8] ss:$16 sps:$4 sm:$0xff]  }
  0x4e   : > { %1619 = vmatpush3.bf16.msra.mxu1 %v1735_v53  ;;  %1556 = vmatprep.subr.bf16.mxu0 %v1736_v54  ;;  %v1784_v26 = vld [vmem:[%s1987_s13 + $0xc4] ss:$16 sps:$4 sm:$0xff]   ;;  %v1786_v27 = vld [vmem:[%s1987_s13 + $0xcc] ss:$16 sps:$4 sm:$0xff]   ;;  %v1788_v28 = vld [vmem:[%s1987_s13 + $0xc0] ss:$16 sps:$4 sm:$0xff]  }
  0x4f   : > { %1620 = vmatprep.subr.bf16.mxu1 %v1737_v55  ;;  %v1789_v29 = vld [vmem:[%s1987_s13 + $0xc8] ss:$16 sps:$4 sm:$0xff]   ;;  %v1790_v30 = vld [vmem:[%s1987_s13 + $0xe4] ss:$16 sps:$4 sm:$0xff]   ;;  %v1792_v31 = vld [vmem:[%s1987_s13 + $0xec] ss:$16 sps:$4 sm:$0xff]  }
  0x50   : > { %v1794_v32 = vld [vmem:[%s1987_s13 + $0xe0] ss:$16 sps:$4 sm:$0xff]   ;;  %v1795_v33 = vld [vmem:[%s1987_s13 + $0xe8] ss:$16 sps:$4 sm:$0xff]  }
  0x51   : > { %1557 = vmatpush3.bf16.msra.mxu0 %v1738_v56  ;;  %v386_v50 = vld [vmem:[#allocation2] sm:$0xff] }
  0x52   : > { %1621 = vmatpush3.bf16.msra.mxu1 %v1739_v57  ;;  %1558 = vmatprep.subr.bf16.mxu0 %v1740_v58 }
  0x53   : > { %1622 = vmatprep.subr.bf16.mxu1 %v1741_v59  ;;  %v387_v59 = vld [vmem:[#allocation2 + $0x58] sm:$0xff] }
  0x55   : > { %1559 = vmatpush3.bf16.msra.mxu0 %v1742_v60 }
  0x56   : > { %1623 = vmatpush3.bf16.msra.mxu1 %v1743_v61  ;;  %1560 = vmatprep.subr.bf16.mxu0 %v1744_v62 }
  0x57   : > { %1624 = vmatprep.subr.bf16.mxu1 %v1745_v63 }
  0x59   : > { %1561 = vmatpush3.bf16.msra.mxu0 %v1746_v0 }
  0x5a   : > { %1625 = vmatpush3.bf16.msra.mxu1 %v1747_v1 }
  0x5c   : > { %882 = vmatmul.mubr.bf16.vlgmr.msra.gmra.mxu0 %v1748_v2 }
  0x5d   : > { %979 = vmatmul.mubr.bf16.vlgmr.msra.gmra.mxu1 %v1751_v4  ;;  %889 = vmatprep.mubr.bf16.mxu0 %v1754_v6  ;;  %v388_v4 = vld [vmem:[#allocation2 + $0x18] sm:$0xff] }
  0x5e   : > { %986 = vmatprep.mubr.bf16.mxu1 %v1756_v7 }
  0x64   : > { %890 = vmatmul.mubr.bf16.gmra.mxu0 %v1758_v8 }
  0x65   : > { %987 = vmatmul.mubr.bf16.gmra.mxu1 %v1759_v9  ;;  %897 = vmatprep.mubr.bf16.mxu0 %v1760_v10 }
  0x66   : > { %994 = vmatprep.mubr.bf16.mxu1 %v1762_v11 }
  0x6c   : > { %898 = vmatmul.mubr.bf16.gmra.mxu0 %v1764_v12 }
  0x6d   : > { %995 = vmatmul.mubr.bf16.gmra.mxu1 %v1765_v13  ;;  %905 = vmatprep.mubr.bf16.mxu0 %v1766_v14  ;;  %v389_v13 = vld [vmem:[#allocation2 + $0x50] sm:$0xff] }
  0x6e   : > { %1002 = vmatprep.mubr.bf16.mxu1 %v1768_v15 }
  0x74   : > { %906 = vmatmul.mubr.bf16.gmra.mxu0 %v1770_v16 }
  0x75   : > { %1003 = vmatmul.mubr.bf16.gmra.mxu1 %v1771_v17  ;;  %913 = vmatprep.mubr.bf16.mxu0 %v1772_v18 }
  0x76   : > { %1010 = vmatprep.mubr.bf16.mxu1 %v1774_v19 }
  0x7c   : > { %914 = vmatmul.mubr.bf16.gmra.mxu0 %v1776_v20 }
  0x7d   : > { %1011 = vmatmul.mubr.bf16.gmra.mxu1 %v1777_v21  ;;  %921 = vmatprep.mubr.bf16.mxu0 %v1778_v22  ;;  %v390_v22 = vld [vmem:[#allocation2 + $0x68] sm:$0xff] }
  0x7e   : > { %1018 = vmatprep.mubr.bf16.mxu1 %v1780_v23 }
  0x84   : > { %922 = vmatmul.mubr.bf16.gmra.mxu0 %v1782_v24 }
  0x85   : > { %1019 = vmatmul.mubr.bf16.gmra.mxu1 %v1783_v25  ;;  %929 = vmatprep.mubr.bf16.mxu0 %v1784_v26 }
  0x86   : > { %1026 = vmatprep.mubr.bf16.mxu1 %v1786_v27 }
  0x8c   : > { %930 = vmatmul.mubr.bf16.gmra.mxu0 %v1788_v28 }
  0x8d   : > { %1027 = vmatmul.mubr.bf16.gmra.mxu1 %v1789_v29  ;;  %937 = vmatprep.mubr.bf16.mxu0 %v1790_v30 }
  0x8e   : > { %1034 = vmatprep.mubr.bf16.mxu1 %v1792_v31  ;;  %v391_v31 = vld [vmem:[#allocation2 + $0x8] sm:$0xff] }
  0x94   : > { %938 = vmatmul.mubr.bf16.gmra.mxu0 %v1794_v32 }
  0x95   : > { %1035 = vmatmul.mubr.bf16.gmra.mxu1 %v1795_v33 }
 0x11c   : > { %v1562_v34 = vpop.f32.mrf.mxu0 }
 0x11d   : > { %v1626_v35 = vpop.f32.mrf.mxu1 }
 0x11e   : > { %v1563_v36 = vpop.f32.mrf.mxu0 }
 0x11f   : > { %v1564_v37 = vadd.f32 %v1563_v36, %v1562_v34  ;;  %v1627_v38 = vpop.f32.mrf.mxu1 }
 0x120   : > { %v1628_v39 = vadd.f32 %v1627_v38, %v1626_v35  ;;  %v1565_v40 = vpop.f32.mrf.mxu0 }
 0x121   : > { %v1629_v42 = vpop.f32.mrf.mxu1 }
 0x122   : > { %v981_v43 = vadd.f32 %v1628_v39, %v1564_v37  ;;  %v1566_v44 = vpop.f32.mrf.mxu0 }
 0x123   : > { %v1567_v45 = vadd.f32 %v1566_v44, %v1565_v40  ;;  %v1630_v46 = vpop.f32.mrf.mxu1  ;;  %v392_v40 = vld [vmem:[#allocation2 + $0x48] sm:$0xff] }
 0x124   : > { %v1043_v47 = vadd.f32 %v981_v43, %v385_v41  ;;  %v1631_v48 = vadd.f32 %v1630_v46, %v1629_v42  ;;  %v1568_v49 = vpop.f32.mrf.mxu0 }
 0x125   : > { %v1632_v51 = vpop.f32.mrf.mxu1 }
 0x126   : > { %1059 = vst [vmem:[#allocation2 + $0x30] sm:$0xff] %v1043_v47  ;;  %v984_v52 = vadd.f32 %v1631_v48, %v1567_v45  ;;  %v1569_v53 = vpop.f32.mrf.mxu0 }
 0x127   : > { %v1570_v54 = vadd.f32 %v1569_v53, %v1568_v49  ;;  %v1633_v55 = vpop.f32.mrf.mxu1  ;;  %v393_v49 = vld [vmem:[#allocation2 + $0x40] sm:$0xff] }
 0x128   : > { %v1044_v56 = vadd.f32 %v984_v52, %v386_v50  ;;  %v1634_v57 = vadd.f32 %v1633_v55, %v1632_v51  ;;  %v1571_v58 = vpop.f32.mrf.mxu0 }
 0x129   : > { %v1635_v60 = vpop.f32.mrf.mxu1 }
 0x12a   : > { %1060 = vst [vmem:[#allocation2] sm:$0xff] %v1044_v56  ;;  %v989_v61 = vadd.f32 %v1634_v57, %v1570_v54  ;;  %v1572_v62 = vpop.f32.mrf.mxu0 }
 0x12b   : > { %v1573_v63 = vadd.f32 %v1572_v62, %v1571_v58  ;;  %v1636_v0 = vpop.f32.mrf.mxu1  ;;  %v394_v58 = vld [vmem:[#allocation2 + $0x20] sm:$0xff] }
 0x12c   : > { %v1045_v1 = vadd.f32 %v989_v61, %v387_v59  ;;  %v1637_v2 = vadd.f32 %v1636_v0, %v1635_v60  ;;  %v1574_v3 = vpop.f32.mrf.mxu0 }
 0x12d   : > { %v1638_v5 = vpop.f32.mrf.mxu1 }
 0x12e   : > { %1061 = vst [vmem:[#allocation2 + $0x58] sm:$0xff] %v1045_v1  ;;  %v992_v6 = vadd.f32 %v1637_v2, %v1573_v63  ;;  %v1575_v7 = vpop.f32.mrf.mxu0 }
 0x12f   : > { %v1576_v8 = vadd.f32 %v1575_v7, %v1574_v3  ;;  %v1639_v9 = vpop.f32.mrf.mxu1  ;;  %v395_v3 = vld [vmem:[#allocation2 + $0x10] sm:$0xff] }
 0x130   : > { %v1046_v10 = vadd.f32 %v992_v6, %v388_v4  ;;  %v1640_v11 = vadd.f32 %v1639_v9, %v1638_v5  ;;  %v1577_v12 = vpop.f32.mrf.mxu0 }
 0x131   : > { %v1641_v14 = vpop.f32.mrf.mxu1 }
 0x132   : > { %1062 = vst [vmem:[#allocation2 + $0x18] sm:$0xff] %v1046_v10  ;;  %v997_v15 = vadd.f32 %v1640_v11, %v1576_v8  ;;  %v1578_v16 = vpop.f32.mrf.mxu0 }
 0x133   : > { %v1579_v17 = vadd.f32 %v1578_v16, %v1577_v12  ;;  %v1642_v18 = vpop.f32.mrf.mxu1  ;;  %v396_v12 = vld [vmem:[#allocation2 + $0x38] sm:$0xff] }
 0x134   : > { %v1047_v19 = vadd.f32 %v997_v15, %v389_v13  ;;  %v1643_v20 = vadd.f32 %v1642_v18, %v1641_v14  ;;  %v1580_v21 = vpop.f32.mrf.mxu0 }
 0x135   : > { %v1644_v23 = vpop.f32.mrf.mxu1 }
 0x136   : > { %1063 = vst [vmem:[#allocation2 + $0x50] sm:$0xff] %v1047_v19  ;;  %v1000_v24 = vadd.f32 %v1643_v20, %v1579_v17  ;;  %v1581_v25 = vpop.f32.mrf.mxu0 }
 0x137   : > { %v1582_v26 = vadd.f32 %v1581_v25, %v1580_v21  ;;  %v1645_v27 = vpop.f32.mrf.mxu1  ;;  %v397_v21 = vld [vmem:[#allocation2 + $0x60] sm:$0xff] }
 0x138   : > { %v1048_v28 = vadd.f32 %v1000_v24, %v390_v22  ;;  %v1646_v29 = vadd.f32 %v1645_v27, %v1644_v23  ;;  %v1583_v30 = vpop.f32.mrf.mxu0 }
 0x139   : > { %v1647_v32 = vpop.f32.mrf.mxu1 }
 0x13a   : > { %1064 = vst [vmem:[#allocation2 + $0x68] sm:$0xff] %v1048_v28  ;;  %v1005_v33 = vadd.f32 %v1646_v29, %v1582_v26  ;;  %v1584_v34 = vpop.f32.mrf.mxu0 }
 0x13b   : > { %v1585_v35 = vadd.f32 %v1584_v34, %v1583_v30  ;;  %v1648_v36 = vpop.f32.mrf.mxu1  ;;  %v398_v30 = vld [vmem:[#allocation2 + $0x70] sm:$0xff] }
 0x13c   : > { %v1049_v37 = vadd.f32 %v1005_v33, %v391_v31  ;;  %v1649_v38 = vadd.f32 %v1648_v36, %v1647_v32  ;;  %v1586_v39 = vpop.f32.mrf.mxu0 }
 0x13d   : > { %v1650_v41 = vpop.f32.mrf.mxu1 }
 0x13e   : > { %1065 = vst [vmem:[#allocation2 + $0x8] sm:$0xff] %v1049_v37  ;;  %v1008_v42 = vadd.f32 %v1649_v38, %v1585_v35  ;;  %v1587_v43 = vpop.f32.mrf.mxu0 }
 0x13f   : > { %v1588_v44 = vadd.f32 %v1587_v43, %v1586_v39  ;;  %v1651_v45 = vpop.f32.mrf.mxu1  ;;  %v399_v39 = vld [vmem:[#allocation2 + $0x78] sm:$0xff] }
 0x140   : > { %v1050_v46 = vadd.f32 %v1008_v42, %v392_v40  ;;  %v1652_v47 = vadd.f32 %v1651_v45, %v1650_v41  ;;  %v1589_v48 = vpop.f32.mrf.mxu0 }
 0x141   : > { %v1653_v50 = vpop.f32.mrf.mxu1 }
 0x142   : > { %1066 = vst [vmem:[#allocation2 + $0x48] sm:$0xff] %v1050_v46  ;;  %v1013_v51 = vadd.f32 %v1652_v47, %v1588_v44  ;;  %v1590_v52 = vpop.f32.mrf.mxu0  ;;  %v400_v47 = vld [vmem:[#allocation2 + $0x28] sm:$0xff] }
 0x143   : > { %v1591_v53 = vadd.f32 %v1590_v52, %v1589_v48  ;;  %v1654_v54 = vpop.f32.mrf.mxu1 }
 0x144   : > { %v1051_v55 = vadd.f32 %v1013_v51, %v393_v49  ;;  %v1655_v56 = vadd.f32 %v1654_v54, %v1653_v50  ;;  %v1592_v57 = vpop.f32.mrf.mxu0 }
 0x145   : > { %v1656_v59 = vpop.f32.mrf.mxu1 }
 0x146   : > { %1067 = vst [vmem:[#allocation2 + $0x40] sm:$0xff] %v1051_v55  ;;  %v1016_v60 = vadd.f32 %v1655_v56, %v1591_v53  ;;  %v1593_v61 = vpop.f32.mrf.mxu0 }
 0x147   : > { %v1594_v62 = vadd.f32 %v1593_v61, %v1592_v57  ;;  %v1657_v63 = vpop.f32.mrf.mxu1 }
 0x148   : > { %v1052_v0 = vadd.f32 %v1016_v60, %v394_v58  ;;  %v1658_v1 = vadd.f32 %v1657_v63, %v1656_v59  ;;  %v1595_v2 = vpop.f32.mrf.mxu0 }
 0x149   : > { %v1659_v4 = vpop.f32.mrf.mxu1 }
 0x14a   : > { %1068 = vst [vmem:[#allocation2 + $0x20] sm:$0xff] %v1052_v0  ;;  %v1021_v5 = vadd.f32 %v1658_v1, %v1594_v62  ;;  %v1596_v6 = vpop.f32.mrf.mxu0 }
 0x14b   : > { %v1597_v7 = vadd.f32 %v1596_v6, %v1595_v2  ;;  %v1660_v8 = vpop.f32.mrf.mxu1 }
 0x14c   : > { %v1053_v9 = vadd.f32 %v1021_v5, %v395_v3  ;;  %v1661_v10 = vadd.f32 %v1660_v8, %v1659_v4  ;;  %v1598_v11 = vpop.f32.mrf.mxu0 }
 0x14d   : > { %v1662_v13 = vpop.f32.mrf.mxu1 }
 0x14e   : > { %1069 = vst [vmem:[#allocation2 + $0x10] sm:$0xff] %v1053_v9  ;;  %v1024_v14 = vadd.f32 %v1661_v10, %v1597_v7  ;;  %v1599_v15 = vpop.f32.mrf.mxu0 }
 0x14f   : > { %v1600_v16 = vadd.f32 %v1599_v15, %v1598_v11  ;;  %v1663_v17 = vpop.f32.mrf.mxu1 }
 0x150   : > { %v1054_v18 = vadd.f32 %v1024_v14, %v396_v12  ;;  %v1664_v19 = vadd.f32 %v1663_v17, %v1662_v13  ;;  %v1601_v20 = vpop.f32.mrf.mxu0 }
 0x151   : > { %v1665_v22 = vpop.f32.mrf.mxu1 }
 0x152   : > { %1070 = vst [vmem:[#allocation2 + $0x38] sm:$0xff] %v1054_v18  ;;  %v1029_v23 = vadd.f32 %v1664_v19, %v1600_v16  ;;  %v1602_v24 = vpop.f32.mrf.mxu0 }
 0x153   : > { %v1603_v25 = vadd.f32 %v1602_v24, %v1601_v20  ;;  %v1666_v26 = vpop.f32.mrf.mxu1 }
 0x154   : > { %v1055_v27 = vadd.f32 %v1029_v23, %v397_v21  ;;  %v1667_v28 = vadd.f32 %v1666_v26, %v1665_v22  ;;  %v1604_v29 = vpop.f32.mrf.mxu0 }
 0x155   : > { %v1668_v31 = vpop.f32.mrf.mxu1 }
 0x156   : > { %1071 = vst [vmem:[#allocation2 + $0x60] sm:$0xff] %v1055_v27  ;;  %v1032_v32 = vadd.f32 %v1667_v28, %v1603_v25  ;;  %v1605_v33 = vpop.f32.mrf.mxu0 }
 0x157   : > { %v1606_v34 = vadd.f32 %v1605_v33, %v1604_v29  ;;  %v1669_v35 = vpop.f32.mrf.mxu1 }
 0x158   : > { %v1056_v36 = vadd.f32 %v1032_v32, %v398_v30  ;;  %v1670_v37 = vadd.f32 %v1669_v35, %v1668_v31  ;;  %v1607_v38 = vpop.f32.mrf.mxu0 }
 0x159   : > { %v1671_v40 = vpop.f32.mrf.mxu1 }
 0x15a   : > { %1072 = vst [vmem:[#allocation2 + $0x70] sm:$0xff] %v1056_v36  ;;  %v1037_v41 = vadd.f32 %v1670_v37, %v1606_v34  ;;  %v1608_v42 = vpop.f32.mrf.mxu0 }
 0x15b   : > { %v1609_v43 = vadd.f32 %v1608_v42, %v1607_v38  ;;  %v1672_v44 = vpop.f32.mrf.mxu1 }
 0x15c   : > { %v1057_v45 = vadd.f32 %v1037_v41, %v399_v39  ;;  %v1673_v46 = vadd.f32 %v1672_v44, %v1671_v40 }
 0x15e   : > { %1073 = vst [vmem:[#allocation2 + $0x78] sm:$0xff] %v1057_v45  ;;  %v1040_v48 = vadd.f32 %v1673_v46, %v1609_v43  ;;  %1078 = sbr.rel (%p1459_p11) target bundleno = 507 (0x1fb), region = 67 }
 0x160   : > { %v1058_v49 = vadd.f32 %v1040_v48, %v400_v47 }
 0x162   : > { %1074 = vst [vmem:[#allocation2 + $0x28] sm:$0xff] %v1058_v49 }
 0x163   : > { %v1460_v50 = vld [vmem:[#allocation3] ss:$0 sm:$0xff]  ;;  %v1838_v51 = vmov 0   ;;  %v1079_v52 = vld [vmem:[#allocation2 + $0x30] sm:$0xff]  ;;  %v1081_v54 = vld [vmem:[#allocation2 + $0x58] sm:$0xff] }
 0x164   : > { %1796 = vset.pattern.permute.xlu0 %v1838_v51  ;;  %v1080_v53 = vld [vmem:[#allocation2] sm:$0xff]  ;;  %v1082_v55 = vld [vmem:[#allocation2 + $0x18] sm:$0xff]  ;;  %v1083_v56 = vld [vmem:[#allocation2 + $0x50] sm:$0xff] }
 0x165   : > { %1102 = vperm.xlu0 %1796, %v1460_v50   ;;  %v1084_v57 = vld [vmem:[#allocation2 + $0x68] sm:$0xff]  ;;  %v1087_v60 = vld [vmem:[#allocation2 + $0x40] sm:$0xff]  ;;  %v1089_v63 = vld [vmem:[#allocation2 + $0x10] sm:$0xff] }
 0x166   : > { %v1085_v58 = vld [vmem:[#allocation2 + $0x8] sm:$0xff]  ;;  %v1088_v61 = vld [vmem:[#allocation2 + $0x20] sm:$0xff]  ;;  %v1090_v0 = vld [vmem:[#allocation2 + $0x38] sm:$0xff] }
 0x167   : > { %v1086_v59 = vld [vmem:[#allocation2 + $0x48] sm:$0xff]  ;;  %v1091_v1 = vld [vmem:[#allocation2 + $0x60] sm:$0xff]  ;;  %v1092_v2 = vld [vmem:[#allocation2 + $0x70] sm:$0xff] }
 0x168   : > { %v1093_v3 = vld [vmem:[#allocation2 + $0x78] sm:$0xff]  ;;  %v1461_v9 = vld [vmem:[%s2115_s2] ss:$0 sm:$0xff] }
 0x169   : > { %v1094_v4 = vld [vmem:[#allocation2 + $0x28] sm:$0xff] }
 0x1e0   : > { %v1103_v62 = vpop.permute.xlu0 %1102 }
 0x1e1   : > { %v1105_v5 = vmul.f32 %v1103_v62, %v1079_v52  ;;  %v1106_v6 = vmul.f32 %v1103_v62, %v1080_v53  ;;  %v1107_v7 = vmul.f32 %v1103_v62, %v1081_v54  ;;  %v1108_v8 = vmul.f32 %v1103_v62, %v1082_v55 }
 0x1e2   : > { %v1109_v10 = vmul.f32 %v1103_v62, %v1083_v56  ;;  %v1110_v11 = vmul.f32 %v1103_v62, %v1084_v57  ;;  %v1111_v12 = vmul.f32 %v1103_v62, %v1085_v58  ;;  %v1112_v13 = vmul.f32 %v1103_v62, %v1086_v59 }
 0x1e3   : > { %v1113_v14 = vmul.f32 %v1103_v62, %v1087_v60  ;;  %v1114_v15 = vmul.f32 %v1103_v62, %v1088_v61  ;;  %v1115_v16 = vmul.f32 %v1103_v62, %v1089_v63  ;;  %v1116_v17 = vmul.f32 %v1103_v62, %v1090_v0 }
 0x1e4   : > { %v1117_v18 = vmul.f32 %v1103_v62, %v1091_v1  ;;  %v1118_v19 = vmul.f32 %v1103_v62, %v1092_v2  ;;  %v1119_v20 = vmul.f32 %v1103_v62, %v1093_v3  ;;  %v1120_v21 = vmul.f32 %v1103_v62, %v1094_v4 }
 0x1e5   : > { %v1128_v22 = vadd.f32 %v1461_v9, %v1105_v5  ;;  %v1129_v23 = vadd.f32 %v1461_v9, %v1106_v6  ;;  %v1130_v24 = vadd.f32 %v1461_v9, %v1107_v7  ;;  %v1131_v25 = vadd.f32 %v1461_v9, %v1108_v8 }
 0x1e6   : > { %v1132_v26 = vadd.f32 %v1461_v9, %v1109_v10  ;;  %v1133_v27 = vadd.f32 %v1461_v9, %v1110_v11  ;;  %v1134_v28 = vadd.f32 %v1461_v9, %v1111_v12  ;;  %v1135_v29 = vadd.f32 %v1461_v9, %v1112_v13 }
 0x1e7   : > { %v1136_v30 = vadd.f32 %v1461_v9, %v1113_v14  ;;  %v1137_v31 = vadd.f32 %v1461_v9, %v1114_v15  ;;  %v1138_v32 = vadd.f32 %v1461_v9, %v1115_v16  ;;  %v1139_v33 = vadd.f32 %v1461_v9, %v1116_v17 }
 0x1e8   : > { %v1140_v34 = vadd.f32 %v1461_v9, %v1117_v18  ;;  %v1141_v35 = vadd.f32 %v1461_v9, %v1118_v19  ;;  %v1142_v36 = vadd.f32 %v1461_v9, %v1119_v20  ;;  %v1143_v37 = vadd.f32 %v1461_v9, %v1120_v21 }
 0x1e9   : > { %vm1144_vm0 = vcmp.ge.f32.partialorder %v1128_v22, 0.0  ;;  %vm1145_vm1 = vcmp.ge.f32.partialorder %v1129_v23, 0.0  ;;  %vm1146_vm2 = vcmp.ge.f32.partialorder %v1130_v24, 0.0  ;;  %vm1147_vm3 = vcmp.ge.f32.partialorder %v1131_v25, 0.0 }
 0x1ea   : > { %vm1148_vm4 = vcmp.ge.f32.partialorder %v1132_v26, 0.0  ;;  %vm1149_vm5 = vcmp.ge.f32.partialorder %v1133_v27, 0.0  ;;  %vm1150_vm6 = vcmp.ge.f32.partialorder %v1134_v28, 0.0  ;;  %vm1151_vm7 = vcmp.ge.f32.partialorder %v1135_v29, 0.0 }
 0x1eb   : > { %vm1152_vm8 = vcmp.ge.f32.partialorder %v1136_v30, 0.0  ;;  %vm1153_vm9 = vcmp.ge.f32.partialorder %v1137_v31, 0.0  ;;  %vm1154_vm10 = vcmp.ge.f32.partialorder %v1138_v32, 0.0  ;;  %vm1155_vm11 = vcmp.ge.f32.partialorder %v1139_v33, 0.0 }
 0x1ec   : > { %vm1156_vm12 = vcmp.ge.f32.partialorder %v1140_v34, 0.0  ;;  %vm1157_vm13 = vcmp.ge.f32.partialorder %v1141_v35, 0.0  ;;  %vm1158_vm14 = vcmp.ge.f32.partialorder %v1142_v36, 0.0  ;;  %vm1159_vm15 = vcmp.ge.f32.partialorder %v1143_v37, 0.0 }
 0x1ed   : > { %v1160_v38 = vmul.f32 0.2, %v1128_v22  ;;  %v1161_v39 = vmul.f32 0.2, %v1129_v23  ;;  %v1162_v40 = vmul.f32 0.2, %v1130_v24 }
 0x1ee   : > { %v1163_v41 = vmul.f32 0.2, %v1131_v25  ;;  %v1164_v42 = vmul.f32 0.2, %v1132_v26  ;;  %v1165_v43 = vmul.f32 0.2, %v1133_v27 }
 0x1ef   : > { %v1166_v44 = vmul.f32 0.2, %v1134_v28  ;;  %v1167_v45 = vmul.f32 0.2, %v1135_v29  ;;  %v1168_v46 = vmul.f32 0.2, %v1136_v30  ;;  %v1176_v47 = vsel %vm1144_vm0, %v1128_v22, %v1160_v38 }
 0x1f0   : > { %v1169_v48 = vmul.f32 0.2, %v1137_v31  ;;  %v1170_v49 = vmul.f32 0.2, %v1138_v32  ;;  %v1171_v50 = vmul.f32 0.2, %v1139_v33  ;;  %v1177_v51 = vsel %vm1145_vm1, %v1129_v23, %v1161_v39 }
 0x1f1   : > { %v1172_v52 = vmul.f32 0.2, %v1140_v34  ;;  %v1173_v53 = vmul.f32 0.2, %v1141_v35  ;;  %v1174_v54 = vmul.f32 0.2, %v1142_v36  ;;  %v1178_v55 = vsel %vm1146_vm2, %v1130_v24, %v1162_v40 }
 0x1f2   : > { %v1175_v56 = vmul.f32 0.2, %v1143_v37  ;;  %v1179_v57 = vsel %vm1147_vm3, %v1131_v25, %v1163_v41  ;;  %v1180_v58 = vsel %vm1148_vm4, %v1132_v26, %v1164_v42  ;;  %v1181_v59 = vsel %vm1149_vm5, %v1133_v27, %v1165_v43 }
 0x1f3   : > { %v1182_v60 = vsel %vm1150_vm6, %v1134_v28, %v1166_v44  ;;  %v1183_v61 = vsel %vm1151_vm7, %v1135_v29, %v1167_v45  ;;  %v1184_v62 = vsel %vm1152_vm8, %v1136_v30, %v1168_v46  ;;  %v1185_v63 = vsel %vm1153_vm9, %v1137_v31, %v1169_v48 }
 0x1f4   : > { %v1186_v0 = vsel %vm1154_vm10, %v1138_v32, %v1170_v49  ;;  %v1187_v1 = vsel %vm1155_vm11, %v1139_v33, %v1171_v50  ;;  %v1188_v2 = vsel %vm1156_vm12, %v1140_v34, %v1172_v52  ;;  %v1189_v3 = vsel %vm1157_vm13, %v1141_v35, %v1173_v53 }
 0x1f5   : > { %v1190_v4 = vsel %vm1158_vm14, %v1142_v36, %v1174_v54  ;;  %v1191_v5 = vsel %vm1159_vm15, %v1143_v37, %v1175_v56  ;;  %v1502_v6 = vpack.c.bf16 %v1177_v51, %v1176_v47  ;;  %v1507_v7 = vpack.c.bf16 %v1179_v57, %v1178_v55 }
 0x1f6   : > { %v1512_v8 = vpack.c.bf16 %v1181_v59, %v1180_v58  ;;  %v1517_v9 = vpack.c.bf16 %v1183_v61, %v1182_v60  ;;  %v1522_v10 = vpack.c.bf16 %v1185_v63, %v1184_v62  ;;  %v1527_v11 = vpack.c.bf16 %v1187_v1, %v1186_v0 }
 0x1f7   : > { %1503 = vst [vmem:[%s2117_s4] sm:$0xff] %v1502_v6   ;;  %1539 = vst [vmem:[%s2117_s4 + $0x8] sm:$0xff] %v1507_v7   ;;  %v1532_v12 = vpack.c.bf16 %v1189_v3, %v1188_v2  ;;  %v1537_v13 = vpack.c.bf16 %v1191_v5, %v1190_v4 }
 0x1f8   : > { %1540 = vst [vmem:[%s2117_s4 + $0x10] sm:$0xff] %v1512_v8   ;;  %1541 = vst [vmem:[%s2117_s4 + $0x18] sm:$0xff] %v1517_v9  }
 0x1f9   : > { %1542 = vst [vmem:[%s2117_s4 + $0x20] sm:$0xff] %v1522_v10   ;;  %1543 = vst [vmem:[%s2117_s4 + $0x28] sm:$0xff] %v1527_v11  }
 0x1fa   : > { %1544 = vst [vmem:[%s2117_s4 + $0x30] sm:$0xff] %v1532_v12   ;;  %1545 = vst [vmem:[%s2117_s4 + $0x38] sm:$0xff] %v1537_v13  }
 0x1fb PF: > { %s16_s21 = sadd.s32 1, %s1835_s21   ;;  %s2118_s17 = smov %s1823_s18 }
 0x1fc   : > { %p13_p12 = scmp.ge.s32.totalorder %s16_s21, 4   ;;  %s2119_s18 = smov %s1902_s24 }
 0x1fd   : > { %s2120_s19 = smov %s1831_s20  ;;  %s2121_s20 = smov %s2123_s3 }
 0x1fe   :  { %15 = sbr.rel (!%p13_p12) target bundleno = 6 (0x6), region = 108 }

// kernel: discriminator_forward.7
= control target key start
LH: loop header
LB: loop body
LE: loop exit
PB: predicated region body
PF: predicated region fallthrough
CT: control target
= control target key end

     0   :  { %s1621_s0 = inlined_call_operand.vmem [shape: bf16[32,2048], index: 0, kind: input, shape index: {}]   ;;  %s1622_s1 = inlined_call_operand.vmem [shape: bf16[2048,256], index: 1, kind: input, shape index: {}]   ;;  %s1623_s2 = inlined_call_operand.vmem [shape: f32[1,256], index: 2, kind: input, shape index: {}]   ;;  %s1624_s3 = inlined_call_operand.<no memory space> [shape: f32[1,1], index: 3, kind: input, shape index: {}]   ;;  %s1625_s4 = inlined_call_operand.vmem [shape: bf16[32,256], index: 4, kind: output, shape index: {}]  }
   0x1   :  { %v9_v0 = vstv %s1624_s3 }
   0x2   :  { %10 = vst [vmem:[#allocation3] sm:$0x1] %v9_v0 }
   0x3   :  { %s1455_s17 = smov 0   ;;  %s1457_s18 = smov 0  }
   0x4   :  { %s1459_s19 = smov 0   ;;  %s1461_s20 = smov 0  }
   0x5   :  { %s1463_s21 = smov 0  }
   0x6 LB: > { %s28_s3 = sadd.s32 1, %s1419_s20  ;;  %p51_p1 = scmp.ne.s32.totalorder %s1411_s18, %s1407_s17  ;;  %s1423_s21 = sphi %s1463_s21, %s16_s21   ;;  %s1419_s20 = sphi %s1461_s20, %s1629_s20   ;;  %s1415_s19 = sphi %s1459_s19, %s1628_s19   ;;  %s1411_s18 = sphi %s1457_s18, %s1627_s18   ;;  %s1407_s17 = sphi %s1455_s17, %s1626_s17  }
   0x7   : > { %p29_p0 = scmp.ge.s32.totalorder %s28_s3, 4  ;;  %p52_p2 = scmp.eq.s32.totalorder %s1423_s21, 0 }
   0x8   : > { %s44_s23 = sadd.s32 1, %s1411_s18  ;;  %p1136_p5 = scmp.ge.s32.totalorder %s1423_s21, 4 }
   0x9   : > { %s1631_s3 = smov (%p29_p0, %s28_s3), 0  ;;  %p53_p3 = por %p52_p2, %p51_p1 }
   0xa   : > { %s40_s22 = ssub.s32 %s1419_s20, %s1631_s3  ;;  %191 = sbr.rel (%p1136_p5) target bundleno = 23 (0x17), region = 24 }
   0xb   : > { %p42_p4 = scmp.eq.s32.totalorder %s40_s22, 0 }
   0xd   : > { %s1490_s24 = scalar_select %p42_p4, %s1411_s18, %s44_s23  }
   0xf   : > { %194 = sbr.rel (!%p53_p3) target bundleno = 23 (0x17), region = 28  ;;  %s196_s25 = sand.u32 (%p53_p3), 1, %s1411_s18  }
  0x10   : > { %s1228_s26 = sshll.u32 (%p53_p3), %s1419_s20, 4  ;;  %s1137_s27 = sshll.u32 (%p53_p3), %s196_s25, 6 }
  0x11   : > { %s204_s30 = scalar_lea.vmem (%p53_p3), %s1621_s0, %s1228_s26  ;;  %s198_s5 = scalar_lea.vmem (%p53_p3), [#allocation4], %s1137_s27 }
  0x12   : > { %v217_v1 = vld [vmem:[%s204_s30] sm:$0xff] (%p53_p3)  ;;  %v219_v2 = vld [vmem:[%s204_s30 + $0x8] sm:$0xff] (%p53_p3) }
  0x13   : > { %v221_v3 = vld [vmem:[%s204_s30 + $0x40] sm:$0xff] (%p53_p3)  ;;  %218 = vst [vmem:[%s198_s5] sm:$0xff] (%p53_p3), %v217_v1  ;;  %220 = vst [vmem:[%s198_s5 + $0x8] sm:$0xff] (%p53_p3), %v219_v2  ;;  %v223_v4 = vld [vmem:[%s204_s30 + $0x48] sm:$0xff] (%p53_p3) }
  0x14   : > { %222 = vst [vmem:[%s198_s5 + $0x10] sm:$0xff] %v221_v3  ;;  %v225_v5 = vld [vmem:[%s204_s30 + $0x80] sm:$0xff]  ;;  %v227_v6 = vld [vmem:[%s204_s30 + $0x88] sm:$0xff]  ;;  %224 = vst [vmem:[%s198_s5 + $0x18] sm:$0xff] %v223_v4 }
  0x15   : > { %226 = vst [vmem:[%s198_s5 + $0x20] sm:$0xff] %v225_v5  ;;  %228 = vst [vmem:[%s198_s5 + $0x28] sm:$0xff] %v227_v6  ;;  %v229_v7 = vld [vmem:[%s204_s30 + $0xc0] sm:$0xff]  ;;  %v231_v8 = vld [vmem:[%s204_s30 + $0xc8] sm:$0xff] }
  0x16   : > { %230 = vst [vmem:[%s198_s5 + $0x30] sm:$0xff] %v229_v7  ;;  %232 = vst [vmem:[%s198_s5 + $0x38] sm:$0xff] %v231_v8 }
  0x17 PF: > { %p1140_p6 = scmp.ge.s32.totalorder %s1423_s21, 1  ;;  %p252_p7 = scmp.lt.s32.totalorder %s1423_s21, 5 }
  0x19   : > { %p253_p8 = pnand %p1140_p6, %p252_p7 }
  0x1a   : > { %s259_s6 = sand.u32 (!%p253_p8), 1, %s1407_s17   ;;  %s1142_s7 = sshll.u32 (!%p253_p8), %s1415_s19, 6 }
  0x1b   : > { %256 = sbr.rel (%p253_p8) target bundleno = 460 (0x1cc), region = 55  ;;  %s1141_s8 = sshll.u32 (!%p253_p8), %s259_s6, 6 }
  0x1c   : > { %p307_p9 = scmp.lt.s32.totalorder (!%p253_p8), %s1142_s7, 255  ;;  %s1507_s13 = scalar_lea.vmem (!%p253_p8), [#allocation4], %s1141_s8 }
  0x1d   : > { %p1145_p10 = scmp.ne.s32.totalorder (!%p253_p8), %s1415_s19, 0 }
  0x20   : > { %s1633_s7 = smov (!%p307_p9, %s1142_s7), 255  ;;  %337 = sbr.rel (%p1145_p10) target bundleno = 42 (0x2a), region = 63 }
  0x21   : > { %s1229_s9 = sshll.u32 %s1633_s7, 3 }
  0x22   : > { %s1505_s12 = scalar_lea.vmem %s1622_s1, %s1229_s9 }
  0x25   : > { %v1425_v9 = vmov 0.0  }
  0x26   : > { %338 = vst [vmem:[#allocation2 + $0x30] sm:$0xff] %v1425_v9  ;;  %339 = vst [vmem:[#allocation2] sm:$0xff] %v1425_v9 }
  0x27   : > { %340 = vst [vmem:[#allocation2 + $0x18] sm:$0xff] %v1425_v9  ;;  %341 = vst [vmem:[#allocation2 + $0x10] sm:$0xff] %v1425_v9 }
  0x28   : > { %342 = vst [vmem:[#allocation2 + $0x8] sm:$0xff] %v1425_v9  ;;  %343 = vst [vmem:[#allocation2 + $0x20] sm:$0xff] %v1425_v9 }
  0x29   : > { %344 = vst [vmem:[#allocation2 + $0x28] sm:$0xff] %v1425_v9  ;;  %345 = vst [vmem:[#allocation2 + $0x38] sm:$0xff] %v1425_v9 }
  0x2a PF: > { %v1276_v10 = vld [vmem:[%s1505_s12 + $0x74] ss:$8 sps:$4 sm:$0xff]   ;;  %v1280_v12 = vld [vmem:[%s1505_s12 + $0x70] ss:$8 sps:$4 sm:$0xff]   ;;  %v1282_v14 = vld [vmem:[%s1505_s12 + $0x64] ss:$8 sps:$4 sm:$0xff]  }
  0x2b   : > { %v1278_v11 = vld [vmem:[%s1505_s12 + $0x174] ss:$8 sps:$4 sm:$0xff]   ;;  %786 = vmatprep.subr.bf16.mxu0 %v1276_v10  ;;  %v1281_v13 = vld [vmem:[%s1505_s12 + $0x170] ss:$8 sps:$4 sm:$0xff]   ;;  %v1284_v15 = vld [vmem:[%s1505_s12 + $0x164] ss:$8 sps:$4 sm:$0xff]  }
  0x2c   : > { %839 = vmatprep.subr.bf16.mxu1 %v1278_v11  ;;  %787 = vmatpush1.bf16.msra.mxu0 %v1280_v12  ;;  %v1286_v16 = vld [vmem:[%s1505_s12 + $0x60] ss:$8 sps:$4 sm:$0xff]   ;;  %v1288_v18 = vld [vmem:[%s1505_s12 + $0x54] ss:$8 sps:$4 sm:$0xff]   ;;  %v1292_v20 = vld [vmem:[%s1505_s12 + $0x50] ss:$8 sps:$4 sm:$0xff]  }
  0x2d   : > { %840 = vmatpush1.bf16.msra.mxu1 %v1281_v13  ;;  %788 = vmatprep.subr.bf16.mxu0 %v1282_v14  ;;  %v1287_v17 = vld [vmem:[%s1505_s12 + $0x160] ss:$8 sps:$4 sm:$0xff]   ;;  %v1290_v19 = vld [vmem:[%s1505_s12 + $0x154] ss:$8 sps:$4 sm:$0xff]   ;;  %v1293_v21 = vld [vmem:[%s1505_s12 + $0x150] ss:$8 sps:$4 sm:$0xff]  }
  0x2e   : > { %841 = vmatprep.subr.bf16.mxu1 %v1284_v15  ;;  %v1294_v22 = vld [vmem:[%s1505_s12 + $0x44] ss:$8 sps:$4 sm:$0xff]   ;;  %v1298_v24 = vld [vmem:[%s1505_s12 + $0x40] ss:$8 sps:$4 sm:$0xff]   ;;  %v1300_v26 = vld [vmem:[%s1505_s12 + $0x34] ss:$8 sps:$4 sm:$0xff]  }
  0x2f   : > { %v1296_v23 = vld [vmem:[%s1505_s12 + $0x144] ss:$8 sps:$4 sm:$0xff]   ;;  %v1299_v25 = vld [vmem:[%s1505_s12 + $0x140] ss:$8 sps:$4 sm:$0xff]   ;;  %v1302_v27 = vld [vmem:[%s1505_s12 + $0x134] ss:$8 sps:$4 sm:$0xff]  }
  0x30   : > { %789 = vmatpush1.bf16.msra.mxu0 %v1286_v16  ;;  %v1304_v28 = vld [vmem:[%s1505_s12 + $0x30] ss:$8 sps:$4 sm:$0xff]   ;;  %v1306_v30 = vld [vmem:[%s1505_s12 + $0x24] ss:$8 sps:$4 sm:$0xff]   ;;  %v1310_v32 = vld [vmem:[%s1505_s12 + $0x20] ss:$8 sps:$4 sm:$0xff]  }
  0x31   : > { %842 = vmatpush1.bf16.msra.mxu1 %v1287_v17  ;;  %790 = vmatprep.subr.bf16.mxu0 %v1288_v18  ;;  %v1305_v29 = vld [vmem:[%s1505_s12 + $0x130] ss:$8 sps:$4 sm:$0xff]   ;;  %v1308_v31 = vld [vmem:[%s1505_s12 + $0x124] ss:$8 sps:$4 sm:$0xff]   ;;  %v1311_v33 = vld [vmem:[%s1505_s12 + $0x120] ss:$8 sps:$4 sm:$0xff]  }
  0x32   : > { %843 = vmatprep.subr.bf16.mxu1 %v1290_v19  ;;  %v1312_v34 = vld [vmem:[%s1505_s12 + $0x14] ss:$8 sps:$4 sm:$0xff]   ;;  %v1316_v36 = vld [vmem:[%s1505_s12 + $0x10] ss:$8 sps:$4 sm:$0xff]   ;;  %v1318_v38 = vld [vmem:[%s1505_s12 + $0x4] ss:$8 sps:$4 sm:$0xff]  }
  0x33   : > { %v1314_v35 = vld [vmem:[%s1505_s12 + $0x114] ss:$8 sps:$4 sm:$0xff]   ;;  %v1317_v37 = vld [vmem:[%s1505_s12 + $0x110] ss:$8 sps:$4 sm:$0xff]   ;;  %v1320_v39 = vld [vmem:[%s1505_s12 + $0x104] ss:$8 sps:$4 sm:$0xff]  }
  0x34   : > { %791 = vmatpush1.bf16.msra.mxu0 %v1292_v20  ;;  %v1322_v40 = vld [vmem:[%s1505_s12] ss:$8 sps:$4 sm:$0xff]   ;;  %v1324_v42 = vld [vmem:[%s1505_s12 + $0xf4] ss:$8 sps:$4 sm:$0xff]   ;;  %v1328_v44 = vld [vmem:[%s1505_s12 + $0xf0] ss:$8 sps:$4 sm:$0xff]  }
  0x35   : > { %844 = vmatpush1.bf16.msra.mxu1 %v1293_v21  ;;  %792 = vmatprep.subr.bf16.mxu0 %v1294_v22  ;;  %v1323_v41 = vld [vmem:[%s1505_s12 + $0x100] ss:$8 sps:$4 sm:$0xff]   ;;  %v1326_v43 = vld [vmem:[%s1505_s12 + $0x1f4] ss:$8 sps:$4 sm:$0xff]   ;;  %v1329_v45 = vld [vmem:[%s1505_s12 + $0x1f0] ss:$8 sps:$4 sm:$0xff]  }
  0x36   : > { %845 = vmatprep.subr.bf16.mxu1 %v1296_v23  ;;  %v1330_v46 = vld [vmem:[%s1505_s12 + $0xe4] ss:$8 sps:$4 sm:$0xff]   ;;  %v1334_v48 = vld [vmem:[%s1505_s12 + $0xe0] ss:$8 sps:$4 sm:$0xff]   ;;  %v1336_v50 = vld [vmem:[%s1505_s12 + $0xd4] ss:$8 sps:$4 sm:$0xff]  }
  0x37   : > { %v1332_v47 = vld [vmem:[%s1505_s12 + $0x1e4] ss:$8 sps:$4 sm:$0xff]   ;;  %v1335_v49 = vld [vmem:[%s1505_s12 + $0x1e0] ss:$8 sps:$4 sm:$0xff]   ;;  %v1338_v51 = vld [vmem:[%s1505_s12 + $0x1d4] ss:$8 sps:$4 sm:$0xff]  }
  0x38   : > { %793 = vmatpush1.bf16.msra.mxu0 %v1298_v24  ;;  %v1340_v52 = vld [vmem:[%s1505_s12 + $0xd0] ss:$8 sps:$4 sm:$0xff]   ;;  %v1342_v54 = vld [vmem:[%s1505_s12 + $0xc4] ss:$8 sps:$4 sm:$0xff]   ;;  %v1346_v56 = vld [vmem:[%s1505_s12 + $0xc0] ss:$8 sps:$4 sm:$0xff]  }
  0x39   : > { %846 = vmatpush1.bf16.msra.mxu1 %v1299_v25  ;;  %794 = vmatprep.subr.bf16.mxu0 %v1300_v26  ;;  %v1341_v53 = vld [vmem:[%s1505_s12 + $0x1d0] ss:$8 sps:$4 sm:$0xff]   ;;  %v1344_v55 = vld [vmem:[%s1505_s12 + $0x1c4] ss:$8 sps:$4 sm:$0xff]   ;;  %v1347_v57 = vld [vmem:[%s1505_s12 + $0x1c0] ss:$8 sps:$4 sm:$0xff]  }
  0x3a   : > { %847 = vmatprep.subr.bf16.mxu1 %v1302_v27  ;;  %v1348_v58 = vld [vmem:[%s1505_s12 + $0xb4] ss:$8 sps:$4 sm:$0xff]   ;;  %v1352_v62 = vld [vmem:[%s1505_s12 + $0xb0] ss:$8 sps:$4 sm:$0xff]   ;;  %v1354_v0 = vld [vmem:[%s1505_s12 + $0xa4] ss:$8 sps:$4 sm:$0xff]  }
  0x3b   : > { %v1374_v59 = vld [vmem:[%s1507_s13 + $0x4] ss:$16 sps:$4 sm:$0xff]   ;;  %v1377_v61 = vld [vmem:[%s1507_s13 + $0xc] ss:$16 sps:$4 sm:$0xff]   ;;  %v1372_v12 = vld [vmem:[%s1507_s13] ss:$16 sps:$4 sm:$0xff]  }
  0x3c   : > { %795 = vmatpush1.bf16.msra.mxu0 %v1304_v28  ;;  %v1350_v60 = vld [vmem:[%s1505_s12 + $0x1b4] ss:$8 sps:$4 sm:$0xff]   ;;  %818 = vmatprep.mubr.bf16.mxu0 %v1374_v59  ;;  %v1353_v63 = vld [vmem:[%s1505_s12 + $0x1b0] ss:$8 sps:$4 sm:$0xff]   ;;  %v1356_v1 = vld [vmem:[%s1505_s12 + $0x1a4] ss:$8 sps:$4 sm:$0xff]  }
  0x3d   : > { %848 = vmatpush1.bf16.msra.mxu1 %v1305_v29  ;;  %796 = vmatprep.subr.bf16.mxu0 %v1306_v30  ;;  %v1358_v2 = vld [vmem:[%s1505_s12 + $0xa0] ss:$8 sps:$4 sm:$0xff]   ;;  %v1360_v4 = vld [vmem:[%s1505_s12 + $0x94] ss:$8 sps:$4 sm:$0xff]   ;;  %v1364_v6 = vld [vmem:[%s1505_s12 + $0x90] ss:$8 sps:$4 sm:$0xff]  }
  0x3e   : > { %849 = vmatprep.subr.bf16.mxu1 %v1308_v31  ;;  %871 = vmatprep.mubr.bf16.mxu1 %v1377_v61  ;;  %v1359_v3 = vld [vmem:[%s1505_s12 + $0x1a0] ss:$8 sps:$4 sm:$0xff]   ;;  %v1362_v5 = vld [vmem:[%s1505_s12 + $0x194] ss:$8 sps:$4 sm:$0xff]   ;;  %v1365_v7 = vld [vmem:[%s1505_s12 + $0x190] ss:$8 sps:$4 sm:$0xff]  }
  0x3f   : > { %v1366_v8 = vld [vmem:[%s1505_s12 + $0x84] ss:$8 sps:$4 sm:$0xff]   ;;  %v1370_v10 = vld [vmem:[%s1505_s12 + $0x80] ss:$8 sps:$4 sm:$0xff]   ;;  %v346_v19 = vld [vmem:[#allocation2 + $0x30] sm:$0xff]  ;;  %p1218_p11 = scmp.ne.s32.totalorder %s1415_s19, 3 }
  0x40   : > { %797 = vmatpush1.bf16.msra.mxu0 %v1310_v32  ;;  %v1368_v9 = vld [vmem:[%s1505_s12 + $0x184] ss:$8 sps:$4 sm:$0xff]   ;;  %v1371_v11 = vld [vmem:[%s1505_s12 + $0x180] ss:$8 sps:$4 sm:$0xff]   ;;  %v348_v28 = vld [vmem:[#allocation2 + $0x18] sm:$0xff] }
  0x41   : > { %850 = vmatpush1.bf16.msra.mxu1 %v1311_v33  ;;  %798 = vmatprep.subr.bf16.mxu0 %v1312_v34  ;;  %v1375_v13 = vld [vmem:[%s1507_s13 + $0x8] ss:$16 sps:$4 sm:$0xff]   ;;  %v1378_v14 = vld [vmem:[%s1507_s13 + $0x24] ss:$16 sps:$4 sm:$0xff]   ;;  %v1380_v15 = vld [vmem:[%s1507_s13 + $0x2c] ss:$16 sps:$4 sm:$0xff]  }
  0x42   : > { %851 = vmatprep.subr.bf16.mxu1 %v1314_v35  ;;  %v1382_v16 = vld [vmem:[%s1507_s13 + $0x20] ss:$16 sps:$4 sm:$0xff]   ;;  %v1383_v17 = vld [vmem:[%s1507_s13 + $0x28] ss:$16 sps:$4 sm:$0xff]  }
  0x43   : > { %v347_v23 = vld [vmem:[#allocation2] sm:$0xff]  ;;  %v349_v33 = vld [vmem:[#allocation2 + $0x10] sm:$0xff] }
  0x44   : > { %799 = vmatpush1.bf16.msra.mxu0 %v1316_v36 }
  0x45   : > { %852 = vmatpush1.bf16.msra.mxu1 %v1317_v37  ;;  %800 = vmatprep.subr.bf16.mxu0 %v1318_v38  ;;  %v350_v38 = vld [vmem:[#allocation2 + $0x8] sm:$0xff] }
  0x46   : > { %853 = vmatprep.subr.bf16.mxu1 %v1320_v39 }
  0x48   : > { %801 = vmatpush1.bf16.msra.mxu0 %v1322_v40 }
  0x49   : > { %854 = vmatpush1.bf16.msra.mxu1 %v1323_v41  ;;  %802 = vmatprep.subr.bf16.mxu0 %v1324_v42 }
  0x4a   : > { %855 = vmatprep.subr.bf16.mxu1 %v1326_v43  ;;  %v351_v43 = vld [vmem:[#allocation2 + $0x20] sm:$0xff] }
  0x4c   : > { %803 = vmatpush2.bf16.msra.mxu0 %v1328_v44 }
  0x4d   : > { %856 = vmatpush2.bf16.msra.mxu1 %v1329_v45  ;;  %804 = vmatprep.subr.bf16.mxu0 %v1330_v46 }
  0x4e   : > { %857 = vmatprep.subr.bf16.mxu1 %v1332_v47 }
  0x50   : > { %805 = vmatpush2.bf16.msra.mxu0 %v1334_v48  ;;  %v352_v48 = vld [vmem:[#allocation2 + $0x28] sm:$0xff] }
  0x51   : > { %858 = vmatpush2.bf16.msra.mxu1 %v1335_v49  ;;  %806 = vmatprep.subr.bf16.mxu0 %v1336_v50 }
  0x52   : > { %859 = vmatprep.subr.bf16.mxu1 %v1338_v51 }
  0x54   : > { %807 = vmatpush2.bf16.msra.mxu0 %v1340_v52 }
  0x55   : > { %860 = vmatpush2.bf16.msra.mxu1 %v1341_v53  ;;  %808 = vmatprep.subr.bf16.mxu0 %v1342_v54  ;;  %v353_v53 = vld [vmem:[#allocation2 + $0x38] sm:$0xff] }
  0x56   : > { %861 = vmatprep.subr.bf16.mxu1 %v1344_v55 }
  0x58   : > { %809 = vmatpush2.bf16.msra.mxu0 %v1346_v56 }
  0x59   : > { %862 = vmatpush2.bf16.msra.mxu1 %v1347_v57  ;;  %810 = vmatprep.subr.bf16.mxu0 %v1348_v58 }
  0x5a   : > { %863 = vmatprep.subr.bf16.mxu1 %v1350_v60 }
  0x5c   : > { %811 = vmatpush2.bf16.msra.mxu0 %v1352_v62 }
  0x5d   : > { %864 = vmatpush2.bf16.msra.mxu1 %v1353_v63  ;;  %812 = vmatprep.subr.bf16.mxu0 %v1354_v0 }
  0x5e   : > { %865 = vmatprep.subr.bf16.mxu1 %v1356_v1 }
  0x60   : > { %813 = vmatpush2.bf16.msra.mxu0 %v1358_v2 }
  0x61   : > { %866 = vmatpush2.bf16.msra.mxu1 %v1359_v3  ;;  %814 = vmatprep.subr.bf16.mxu0 %v1360_v4 }
  0x62   : > { %867 = vmatprep.subr.bf16.mxu1 %v1362_v5 }
  0x64   : > { %815 = vmatpush2.bf16.msra.mxu0 %v1364_v6 }
  0x65   : > { %868 = vmatpush2.bf16.msra.mxu1 %v1365_v7  ;;  %816 = vmatprep.subr.bf16.mxu0 %v1366_v8 }
  0x66   : > { %869 = vmatprep.subr.bf16.mxu1 %v1368_v9 }
  0x68   : > { %817 = vmatpush2.bf16.msra.mxu0 %v1370_v10 }
  0x69   : > { %870 = vmatpush2.bf16.msra.mxu1 %v1371_v11 }
  0x6b   : > { %819 = vmatmul.mubr.bf16.vlgmr.msra.gmra.mxu0 %v1372_v12 }
  0x6c   : > { %872 = vmatmul.mubr.bf16.vlgmr.msra.gmra.mxu1 %v1375_v13  ;;  %828 = vmatprep.mubr.bf16.mxu0 %v1378_v14 }
  0x6d   : > { %881 = vmatprep.mubr.bf16.mxu1 %v1380_v15 }
  0x73   : > { %829 = vmatmul.mubr.bf16.gmra.mxu0 %v1382_v16 }
  0x74   : > { %882 = vmatmul.mubr.bf16.gmra.mxu1 %v1383_v17 }
 0x12b   : > { %v820_v18 = vpop.f32.mrf.mxu0 }
 0x12c   : > { %v873_v20 = vpop.f32.mrf.mxu1 }
 0x12d   : > { %v874_v21 = vadd.f32 %v873_v20, %v820_v18  ;;  %v822_v22 = vpop.f32.mrf.mxu0 }
 0x12e   : > { %v875_v24 = vpop.f32.mrf.mxu1 }
 0x12f   : > { %v892_v25 = vadd.f32 %v874_v21, %v346_v19  ;;  %v876_v26 = vadd.f32 %v875_v24, %v822_v22  ;;  %v824_v27 = vpop.f32.mrf.mxu0 }
 0x130   : > { %v877_v29 = vpop.f32.mrf.mxu1 }
 0x131   : > { %900 = vst [vmem:[#allocation2 + $0x30] sm:$0xff] %v892_v25  ;;  %v893_v30 = vadd.f32 %v876_v26, %v347_v23  ;;  %v878_v31 = vadd.f32 %v877_v29, %v824_v27  ;;  %v826_v32 = vpop.f32.mrf.mxu0 }
 0x132   : > { %v879_v34 = vpop.f32.mrf.mxu1 }
 0x133   : > { %901 = vst [vmem:[#allocation2] sm:$0xff] %v893_v30  ;;  %v894_v35 = vadd.f32 %v878_v31, %v348_v28  ;;  %v880_v36 = vadd.f32 %v879_v34, %v826_v32  ;;  %v830_v37 = vpop.f32.mrf.mxu0 }
 0x134   : > { %v883_v39 = vpop.f32.mrf.mxu1 }
 0x135   : > { %902 = vst [vmem:[#allocation2 + $0x18] sm:$0xff] %v894_v35  ;;  %v895_v40 = vadd.f32 %v880_v36, %v349_v33  ;;  %v884_v41 = vadd.f32 %v883_v39, %v830_v37  ;;  %v832_v42 = vpop.f32.mrf.mxu0 }
 0x136   : > { %v885_v44 = vpop.f32.mrf.mxu1 }
 0x137   : > { %903 = vst [vmem:[#allocation2 + $0x10] sm:$0xff] %v895_v40  ;;  %v896_v45 = vadd.f32 %v884_v41, %v350_v38  ;;  %v886_v46 = vadd.f32 %v885_v44, %v832_v42  ;;  %v834_v47 = vpop.f32.mrf.mxu0 }
 0x138   : > { %v887_v49 = vpop.f32.mrf.mxu1 }
 0x139   : > { %904 = vst [vmem:[#allocation2 + $0x8] sm:$0xff] %v896_v45  ;;  %v897_v50 = vadd.f32 %v886_v46, %v351_v43  ;;  %v888_v51 = vadd.f32 %v887_v49, %v834_v47  ;;  %v836_v52 = vpop.f32.mrf.mxu0 }
 0x13a   : > { %v889_v54 = vpop.f32.mrf.mxu1 }
 0x13b   : > { %905 = vst [vmem:[#allocation2 + $0x20] sm:$0xff] %v897_v50  ;;  %v898_v55 = vadd.f32 %v888_v51, %v352_v48  ;;  %v890_v56 = vadd.f32 %v889_v54, %v836_v52  ;;  %911 = sbr.rel (%p1218_p11) target bundleno = 460 (0x1cc), region = 67 }
 0x13d   : > { %906 = vst [vmem:[#allocation2 + $0x28] sm:$0xff] %v898_v55  ;;  %v899_v57 = vadd.f32 %v890_v56, %v353_v53 }
 0x13f   : > { %907 = vst [vmem:[#allocation2 + $0x38] sm:$0xff] %v899_v57 }
 0x140   : > { %v1219_v58 = vld [vmem:[#allocation3] ss:$0 sm:$0xff]  ;;  %v1426_v59 = vmov 0   ;;  %v940_v60 = vlaneseq  ;;  %v912_v1 = vld [vmem:[#allocation2 + $0x30] sm:$0xff]  ;;  %v914_v3 = vld [vmem:[#allocation2 + $0x18] sm:$0xff] }
 0x141   : > { %1384 = vset.pattern.permute.xlu0 %v1426_v59  ;;  %v938_v0 = vld [vmem:[%s1623_s2] sm:$0x3]  ;;  %v915_v4 = vld [vmem:[#allocation2 + $0x10] sm:$0xff]  ;;  %v916_v5 = vld [vmem:[#allocation2 + $0x8] sm:$0xff] }
 0x142   : > { %927 = vperm.xlu0 %1384, %v1219_v58   ;;  %v941_v61 = vshrl.u32 %v940_v60, 7  ;;  %v913_v2 = vld [vmem:[#allocation2] sm:$0xff] }
 0x143   : > { %v917_v8 = vld [vmem:[#allocation2 + $0x20] sm:$0xff] }
 0x144   : > { %v942_v62 = vsub.s32 0, %v941_v61  ;;  %v946_v63 = vsub.s32 1, %v941_v61  ;;  %v918_v9 = vld [vmem:[#allocation2 + $0x28] sm:$0xff] }
 0x146   : > { %v943_v6 = vrot.slane %v938_v0, %v942_v62  ;;  %v947_v7 = vrot.slane %v938_v0, %v946_v63  ;;  %v919_v10 = vld [vmem:[#allocation2 + $0x38] sm:$0xff] }
 0x1bd   : > { %v928_v11 = vpop.permute.xlu0 %927 }
 0x1be   : > { %v930_v12 = vmul.f32 %v928_v11, %v912_v1  ;;  %v931_v13 = vmul.f32 %v928_v11, %v913_v2  ;;  %v932_v14 = vmul.f32 %v928_v11, %v914_v3  ;;  %v933_v15 = vmul.f32 %v928_v11, %v915_v4 }
 0x1bf   : > { %v934_v16 = vmul.f32 %v928_v11, %v916_v5  ;;  %v935_v17 = vmul.f32 %v928_v11, %v917_v8  ;;  %v936_v18 = vmul.f32 %v928_v11, %v918_v9  ;;  %v937_v19 = vmul.f32 %v928_v11, %v919_v10 }
 0x1c0   : > { %v950_v20 = vadd.f32 %v943_v6, %v930_v12  ;;  %v951_v21 = vadd.f32 %v947_v7, %v931_v13  ;;  %v952_v22 = vadd.f32 %v943_v6, %v932_v14  ;;  %v953_v23 = vadd.f32 %v947_v7, %v933_v15 }
 0x1c1   : > { %v954_v24 = vadd.f32 %v943_v6, %v934_v16  ;;  %v955_v25 = vadd.f32 %v947_v7, %v935_v17  ;;  %v956_v26 = vadd.f32 %v943_v6, %v936_v18  ;;  %v957_v27 = vadd.f32 %v947_v7, %v937_v19 }
 0x1c2   : > { %vm958_vm0 = vcmp.ge.f32.partialorder %v950_v20, 0.0  ;;  %vm959_vm1 = vcmp.ge.f32.partialorder %v951_v21, 0.0  ;;  %vm960_vm2 = vcmp.ge.f32.partialorder %v952_v22, 0.0  ;;  %vm961_vm3 = vcmp.ge.f32.partialorder %v953_v23, 0.0 }
 0x1c3   : > { %vm962_vm4 = vcmp.ge.f32.partialorder %v954_v24, 0.0  ;;  %vm963_vm5 = vcmp.ge.f32.partialorder %v955_v25, 0.0  ;;  %vm964_vm6 = vcmp.ge.f32.partialorder %v956_v26, 0.0  ;;  %vm965_vm7 = vcmp.ge.f32.partialorder %v957_v27, 0.0 }
 0x1c4   : > { %v966_v28 = vmul.f32 0.2, %v950_v20  ;;  %v967_v29 = vmul.f32 0.2, %v951_v21  ;;  %v968_v30 = vmul.f32 0.2, %v952_v22 }
 0x1c5   : > { %v969_v31 = vmul.f32 0.2, %v953_v23  ;;  %v970_v32 = vmul.f32 0.2, %v954_v24  ;;  %v971_v33 = vmul.f32 0.2, %v955_v25 }
 0x1c6   : > { %v972_v34 = vmul.f32 0.2, %v956_v26  ;;  %v973_v35 = vmul.f32 0.2, %v957_v27  ;;  %v974_v36 = vsel %vm958_vm0, %v950_v20, %v966_v28  ;;  %v975_v37 = vsel %vm959_vm1, %v951_v21, %v967_v29 }
 0x1c7   : > { %v976_v38 = vsel %vm960_vm2, %v952_v22, %v968_v30  ;;  %v977_v39 = vsel %vm961_vm3, %v953_v23, %v969_v31  ;;  %v978_v40 = vsel %vm962_vm4, %v954_v24, %v970_v32  ;;  %v979_v41 = vsel %vm963_vm5, %v955_v25, %v971_v33 }
 0x1c8   : > { %v980_v42 = vsel %vm964_vm6, %v956_v26, %v972_v34  ;;  %v981_v43 = vsel %vm965_vm7, %v957_v27, %v973_v35  ;;  %v1230_v44 = vpack.c.bf16 %v975_v37, %v974_v36  ;;  %v1231_v45 = vpack.c.bf16 %v977_v39, %v976_v38 }
 0x1c9   : > { %v1232_v46 = vpack.c.bf16 %v979_v41, %v978_v40  ;;  %v1233_v47 = vpack.c.bf16 %v981_v43, %v980_v42 }
 0x1ca   : > { %1006 = vst [vmem:[%s1625_s4] sm:$0xff] %v1230_v44  ;;  %1007 = vst [vmem:[%s1625_s4 + $0x8] sm:$0xff] %v1231_v45 }
 0x1cb   : > { %1008 = vst [vmem:[%s1625_s4 + $0x10] sm:$0xff] %v1232_v46  ;;  %1009 = vst [vmem:[%s1625_s4 + $0x18] sm:$0xff] %v1233_v47 }
 0x1cc PF: > { %s16_s21 = sadd.s32 1, %s1423_s21   ;;  %s1626_s17 = smov %s1411_s18 }
 0x1cd   : > { %p13_p12 = scmp.ge.s32.totalorder %s16_s21, 6   ;;  %s1627_s18 = smov %s1490_s24 }
 0x1ce   : > { %s1628_s19 = smov %s1419_s20  ;;  %s1629_s20 = smov %s1631_s3 }
 0x1cf   :  { %15 = sbr.rel (!%p13_p12) target bundleno = 6 (0x6), region = 108 }

</bundles_post_ra>
